<compile_context>
chip_gen: v5e
topology: v5e:2x2
jax: 0.10.0
libtpu: 0.0.40
codegen_flags: <defaults>
</compile_context>

<pallas_src>
import math
import functools

import numpy as np
import jax
import jax.numpy as jnp
from jax import lax
from jax.experimental import pallas as pl
from jax.experimental.pallas import tpu as pltpu


def attn_prop_kernel(x_ref, src_ref,
                     wq_ref, bq_ref, wkv_ref, bkv_ref,
                     wm_ref, bm_ref,
                     w1a_ref, w1b_ref, b1_ref, w2_ref, b2_ref,
                     out_ref, o_acc_ref, *, num_heads, n_valid):
    F, n_pad = x_ref.shape
    head_dim = F // num_heads
    f32 = jnp.float32
    bf16 = jnp.bfloat16
    padded = n_pad != n_valid           # static Python bool

    x_bf = x_ref[...].astype(bf16)      # (F, N)
    src_bf = src_ref[...].astype(bf16)  # (F, N)

    # --- fused Conv1d(k=1) projections: W @ X, bf16 operands, f32 accumulation.
    # The 1/sqrt(head_dim) attention scale is folded into wq/bq by the wrapper.
    q = jnp.dot(wq_ref[...], x_bf, preferred_element_type=f32) + bq_ref[...]       # (F, N)
    kv = jnp.dot(wkv_ref[...], src_bf, preferred_element_type=f32) + bkv_ref[...]  # (2F, N)

    # Cast once; heads are sliced on the sublane axis (no f32 transpose of q).
    q_bf = q.astype(bf16)               # (F, N)
    kv_bf = kv.astype(bf16)             # (2F, N)
    k_bf = kv_bf[:F, :]
    v_bf = kv_bf[F:, :]

    if padded:
        # Mask for padded *key* positions (rows of the transposed score matrix)
        # and for padded sequence positions (lanes) in the InstanceNorm stats.
        key_mask = lax.broadcasted_iota(jnp.int32, (n_pad, 1), 0) < n_valid
        lane_mask = lax.broadcasted_iota(jnp.int32, (1, n_pad), 1) < n_valid

    # --- multi-head attention. Scores are computed transposed (keys on
    # sublanes, queries on lanes) so the softmax max/sum land in (1, N) lane
    # layout and the normalization can be deferred onto the (d, N) head output.
    for h in range(num_heads):
        lo, hi = h * head_dim, (h + 1) * head_dim
        qh = q_bf[lo:hi, :]             # (d, N) bf16
        kh = k_bf[lo:hi, :]             # (d, N) bf16
        vh = v_bf[lo:hi, :]             # (d, N) bf16

        # st[m, n] = sum_d k[d, m] * q[d, n]   -> (N_key, N_query), f32
        st = lax.dot_general(kh, qh, (((0,), (0,)), ((), ())),
                             preferred_element_type=f32)
        if padded:
            st = jnp.where(key_mask, st, -1e30)
        st = st - jnp.max(st, axis=0, keepdims=True)
        p = jnp.exp(st)                                                 # unnormalized
        inv = pl.reciprocal(jnp.sum(p, axis=0, keepdims=True), approx=True)  # (1, N)

        oh = jnp.dot(vh, p.astype(bf16), preferred_element_type=f32)   # (d, N)
        o_acc_ref[lo:hi, :] = oh * inv                                  # deferred norm

    # --- single K=F merge matmul over all heads (no per-head merges).
    message = (jnp.dot(wm_ref[...], o_acc_ref[...].astype(bf16),
                       preferred_element_type=f32) + bm_ref[...])       # (F, N)

    # --- MLP([2F, 2F, F]) on cat([x, message]); concat folded into two matmuls
    # by splitting W1 column-wise in the wrapper.
    y1 = (jnp.dot(w1a_ref[...], x_bf, preferred_element_type=f32)
          + jnp.dot(w1b_ref[...], message.astype(bf16), preferred_element_type=f32)
          + b1_ref[...])                                                # (2F, N)

    # --- single-pass InstanceNorm1d (eps=1e-5, no affine) + fused ReLU.
    # Statistics use the true sequence length only.
    y1v = jnp.where(lane_mask, y1, 0.0) if padded else y1
    inv_n = 1.0 / n_valid
    mean = jnp.sum(y1v, axis=-1, keepdims=True) * inv_n
    ex2 = jnp.sum(y1v * y1v, axis=-1, keepdims=True) * inv_n
    var = ex2 - mean * mean
    y1n = jnp.maximum((y1 - mean) * lax.rsqrt(var + 1e-5), 0.0)

    y2 = jnp.dot(w2_ref[...], y1n.astype(bf16),
                 preferred_element_type=f32) + b2_ref[...]              # (F, N)
    out_ref[...] = y2.astype(out_ref.dtype)


def _vmem_limit_bytes():
    """Generation-aware VMEM limit (85% of capacity; v7x has only 64 MiB)."""
    try:
        cap = getattr(pltpu.get_tpu_info(), "vmem_capacity_bytes", None)
        if cap:
            return int(cap * 0.85)
    except Exception:
        pass
    return 48 * 1024 * 1024


def attentional_propagation(x_ncw, src_ncw, params, num_heads):
    """x_ncw, src_ncw: (B, F, N), exactly the PyTorch Conv1d layout. Returns (B, F, N)."""
    B, F, N = x_ncw.shape
    head_dim = F // num_heads

    # Lane-dense sequence axis: pad N up to a multiple of 128.
    n_pad = ((N + 127) // 128) * 128
    if n_pad != N:
        pad = ((0, 0), (0, 0), (0, n_pad - N))
        x_p = jnp.pad(x_ncw, pad)
        src_p = jnp.pad(src_ncw, pad)
    else:
        x_p, src_p = x_ncw, src_ncw

    # torch: view(B, dim, heads, N) => torch channel c = d*H + h.
    # The kernel uses head-major channels i = h*head_dim + d, so
    # perm[i] = (i % head_dim) * H + (i // head_dim).
    idx = np.arange(F)
    perm = (idx % head_dim) * num_heads + (idx // head_dim)
    scale = 1.0 / math.sqrt(head_dim)
    bf16 = jnp.bfloat16

    wq = (jnp.asarray(params['wq'])[perm, :] * scale).astype(bf16)        # (F, F)
    bq = (jnp.asarray(params['bq'])[perm] * scale)[:, None]               # (F, 1) f32
    wkv = jnp.concatenate([jnp.asarray(params['wk'])[perm, :],
                           jnp.asarray(params['wv'])[perm, :]],
                          axis=0).astype(bf16)                            # (2F, F)
    bkv = jnp.concatenate([jnp.asarray(params['bk'])[perm],
                           jnp.asarray(params['bv'])[perm]])[:, None]     # (2F, 1)
    wm = jnp.asarray(params['wm'])[:, perm].astype(bf16)                  # (F, F)
    bm = jnp.asarray(params['bm'])[:, None]                               # (F, 1)
    w1 = jnp.asarray(params['w1'])
    w1a = w1[:, :F].astype(bf16)                                          # (2F, F)
    w1b = w1[:, F:].astype(bf16)                                          # (2F, F)
    b1 = jnp.asarray(params['b1'])[:, None]                               # (2F, 1)
    w2 = jnp.asarray(params['w2']).astype(bf16)                           # (F, 2F)
    b2 = jnp.asarray(params['b2'])[:, None]                               # (F, 1)

    weights = (wq, bq, wkv, bkv, wm, bm, w1a, w1b, b1, w2, b2)
    kernel = functools.partial(attn_prop_kernel, num_heads=num_heads, n_valid=N)

    batch_spec = pl.BlockSpec((pl.Squeezed(), F, n_pad), lambda b: (b, 0, 0))

    # Advisory cost estimate (matmuls: q, kv, merge, w1a, w1b, w2 = 10*F^2 MACs/col).
    mm_flops = 2 * B * n_pad * F * F * 10
    attn_flops = 4 * B * num_heads * n_pad * n_pad * head_dim
    cost = pl.CostEstimate(
        flops=int(mm_flops + attn_flops),
        transcendentals=int(B * num_heads * n_pad * n_pad),
        bytes_accessed=int(3 * B * F * n_pad * 4
                           + sum(int(w.size) * w.dtype.itemsize for w in weights)),
    )

    vmem_limit = _vmem_limit_bytes()

    def run(single_buffer_weights):
        def wspec(arr):
            kwargs = {}
            if single_buffer_weights:
                # Constant-index weights: no need for double-buffered VMEM.
                kwargs["pipeline_mode"] = pl.Buffered(1)
            return pl.BlockSpec(arr.shape, lambda b: (0,) * arr.ndim, **kwargs)

        out_p = pl.pallas_call(
            kernel,
            out_shape=jax.ShapeDtypeStruct((B, F, n_pad), x_ncw.dtype),
            grid=(B,),
            in_specs=[batch_spec, batch_spec] + [wspec(w) for w in weights],
            out_specs=batch_spec,
            scratch_shapes=[pltpu.VMEM((F, n_pad), jnp.float32)],   # per-head output slab
            compiler_params=pltpu.CompilerParams(
                dimension_semantics=("parallel",),
                vmem_limit_bytes=vmem_limit),
            cost_estimate=cost,
        )(x_p, src_p, *weights)
        return jax.block_until_ready(out_p)

    try:
        out_p = run(True)
    except Exception:
        # Fallback if single-buffered pipeline_mode is unsupported by this jax.
        out_p = run(False)

    return out_p[:, :, :N] if n_pad != N else out_p


def reference_forward(x, src, p, num_heads):
    """Pure-JAX (f32) mirror of the PyTorch forward, for correctness checking."""
    B, F, N = x.shape
    dim = F // num_heads

    def conv1d(inp, w, b):  # inp (B, Cin, N), w (Cout, Cin), b (Cout,)
        return jnp.einsum('oc,bcn->bon', w, inp) + b[None, :, None]

    q = conv1d(x, p['wq'], p['bq']).reshape(B, dim, num_heads, N)
    k = conv1d(src, p['wk'], p['bk']).reshape(B, dim, num_heads, N)
    v = conv1d(src, p['wv'], p['bv']).reshape(B, dim, num_heads, N)
    scores = jnp.einsum('bdhn,bdhm->bhnm', q, k) / dim ** 0.5
    prob = jax.nn.softmax(scores, axis=-1)
    res = jnp.einsum('bhnm,bdhm->bdhn', prob, v).reshape(B, F, N)
    msg = conv1d(res, p['wm'], p['bm'])
    cat = jnp.concatenate([x, msg], axis=1)
    y1 = conv1d(cat, p['w1'], p['b1'])
    mean = jnp.mean(y1, axis=2, keepdims=True)
    var = jnp.mean((y1 - mean) ** 2, axis=2, keepdims=True)
    y1 = jnp.maximum((y1 - mean) / jnp.sqrt(var + 1e-5), 0.0)
    return conv1d(y1, p['w2'], p['b2'])


if __name__ == "__main__":
    B, F, N, H = 2, 32, 16, 4     # batch, feature_dim, seq length, num_heads
    key = jax.random.PRNGKey(0)
    keys = jax.random.split(key, 16)

    def init_w(k, shape):
        fan_in = shape[1]
        bound = 1.0 / math.sqrt(fan_in)
        return jax.random.uniform(k, shape, jnp.float32, -bound, bound)

    def init_b(k, n, fan_in):
        bound = 1.0 / math.sqrt(fan_in)
        return jax.random.uniform(k, (n,), jnp.float32, -bound, bound)

    params = {
        'wq': init_w(keys[0], (F, F)),  'bq': init_b(keys[1], F, F),
        'wk': init_w(keys[2], (F, F)),  'bk': init_b(keys[3], F, F),
        'wv': init_w(keys[4], (F, F)),  'bv': init_b(keys[5], F, F),
        'wm': init_w(keys[6], (F, F)),  'bm': init_b(keys[7], F, F),
        'w1': init_w(keys[8], (2 * F, 2 * F)), 'b1': init_b(keys[9], 2 * F, 2 * F),
        'w2': init_w(keys[10], (F, 2 * F)),
        'b2': jnp.zeros((F,), jnp.float32),   # nn.init.constant_(mlp[-1].bias, 0.0)
    }

    x = jax.random.normal(keys[11], (B, F, N), jnp.float32)
    source = jax.random.normal(keys[12], (B, F, N), jnp.float32)

    out = attentional_propagation(x, source, params, H)
    out = jax.block_until_ready(out)

    ref = reference_forward(x, source, params, H)
    # bf16 matmul operands (f32 accumulation) => loosened tolerance vs f32 reference.
    np.testing.assert_allclose(np.asarray(out), np.asarray(ref), rtol=2e-2, atol=2e-2)
    print("KERNEL_OK")
</pallas_src>

<mosaic_0001>
module attributes {stable_mosaic.version = 11 : i64} {
  func.func @attn_prop_kernel(%arg0: i32, %arg1: memref<1x32x128xf32, #tpu.memory_space<vmem>>, %arg2: memref<1x32x128xf32, #tpu.memory_space<vmem>>, %arg3: memref<32x32xbf16, #tpu.memory_space<vmem>>, %arg4: memref<32x1xf32, #tpu.memory_space<vmem>>, %arg5: memref<64x32xbf16, #tpu.memory_space<vmem>>, %arg6: memref<64x1xf32, #tpu.memory_space<vmem>>, %arg7: memref<32x32xbf16, #tpu.memory_space<vmem>>, %arg8: memref<32x1xf32, #tpu.memory_space<vmem>>, %arg9: memref<64x32xbf16, #tpu.memory_space<vmem>>, %arg10: memref<64x32xbf16, #tpu.memory_space<vmem>>, %arg11: memref<64x1xf32, #tpu.memory_space<vmem>>, %arg12: memref<32x64xbf16, #tpu.memory_space<vmem>>, %arg13: memref<32x1xf32, #tpu.memory_space<vmem>>, %arg14: memref<1x32x128xf32, #tpu.memory_space<vmem>>, %arg15: memref<32x128xf32, #tpu.memory_space<vmem>>) attributes {dimension_semantics = [#tpu.dimension_semantics<parallel>], iteration_bounds = array<i64: 2>, scalar_prefetch = 0 : i64, scratch_operands = 1 : i64, tpu.core_type = #tpu.core_type<tc>, window_params = [{transform_indices = @transform_0, window_bounds = array<i64: 1, 32, 128>}, {transform_indices = @transform_1, window_bounds = array<i64: 1, 32, 128>}, {pipeline_mode = #tpu.pipeline_mode<synchronous>, transform_indices = @transform_2, window_bounds = array<i64: 32, 32>}, {pipeline_mode = #tpu.pipeline_mode<synchronous>, transform_indices = @transform_3, window_bounds = array<i64: 32, 1>}, {pipeline_mode = #tpu.pipeline_mode<synchronous>, transform_indices = @transform_4, window_bounds = array<i64: 64, 32>}, {pipeline_mode = #tpu.pipeline_mode<synchronous>, transform_indices = @transform_5, window_bounds = array<i64: 64, 1>}, {pipeline_mode = #tpu.pipeline_mode<synchronous>, transform_indices = @transform_6, window_bounds = array<i64: 32, 32>}, {pipeline_mode = #tpu.pipeline_mode<synchronous>, transform_indices = @transform_7, window_bounds = array<i64: 32, 1>}, {pipeline_mode = #tpu.pipeline_mode<synchronous>, transform_indices = @transform_8, window_bounds = array<i64: 64, 32>}, {pipeline_mode = #tpu.pipeline_mode<synchronous>, transform_indices = @transform_9, window_bounds = array<i64: 64, 32>}, {pipeline_mode = #tpu.pipeline_mode<synchronous>, transform_indices = @transform_10, window_bounds = array<i64: 64, 1>}, {pipeline_mode = #tpu.pipeline_mode<synchronous>, transform_indices = @transform_11, window_bounds = array<i64: 32, 64>}, {pipeline_mode = #tpu.pipeline_mode<synchronous>, transform_indices = @transform_12, window_bounds = array<i64: 32, 1>}, {transform_indices = @transform_13, window_bounds = array<i64: 1, 32, 128>}]} {
    %c0 = arith.constant 0 : index
    %c0_0 = arith.constant 0 : index
    %c0_1 = arith.constant 0 : index
    %0 = vector.load %arg1[%c0, %c0_0, %c0_1] : memref<1x32x128xf32, #tpu.memory_space<vmem>>, vector<1x32x128xf32>
    %1 = vector.shape_cast %0 : vector<1x32x128xf32> to vector<32x128xf32>
    %2 = arith.truncf %1 : vector<32x128xf32> to vector<32x128xbf16>
    %c0_2 = arith.constant 0 : index
    %c0_3 = arith.constant 0 : index
    %c0_4 = arith.constant 0 : index
    %3 = vector.load %arg2[%c0_2, %c0_3, %c0_4] : memref<1x32x128xf32, #tpu.memory_space<vmem>>, vector<1x32x128xf32>
    %4 = vector.shape_cast %3 : vector<1x32x128xf32> to vector<32x128xf32>
    %5 = arith.truncf %4 : vector<32x128xf32> to vector<32x128xbf16>
    %c0_5 = arith.constant 0 : index
    %c0_6 = arith.constant 0 : index
    %6 = vector.load %arg3[%c0_5, %c0_6] : memref<32x32xbf16, #tpu.memory_space<vmem>>, vector<32x32xbf16>
    %cst = arith.constant dense<0.000000e+00> : vector<32x128xf32>
    %7 = tpu.matmul %6, %2, %cst {dimension_numbers = #tpu.dot_dimension_numbers<[1], [0], [0], [1], [0, 0, 1, 1], [], []>} : vector<32x32xbf16>, vector<32x128xbf16>, vector<32x128xf32> -> vector<32x128xf32>
    %c0_7 = arith.constant 0 : index
    %c0_8 = arith.constant 0 : index
    %8 = vector.load %arg4[%c0_7, %c0_8] : memref<32x1xf32, #tpu.memory_space<vmem>>, vector<32x1xf32>
    %9 = vector.broadcast %8 : vector<32x1xf32> to vector<32x128xf32>
    %10 = arith.addf %7, %9 : vector<32x128xf32>
    %c0_9 = arith.constant 0 : index
    %c0_10 = arith.constant 0 : index
    %11 = vector.load %arg5[%c0_9, %c0_10] : memref<64x32xbf16, #tpu.memory_space<vmem>>, vector<64x32xbf16>
    %cst_11 = arith.constant dense<0.000000e+00> : vector<64x128xf32>
    %12 = tpu.matmul %11, %5, %cst_11 {dimension_numbers = #tpu.dot_dimension_numbers<[1], [0], [0], [1], [0, 0, 1, 1], [], []>} : vector<64x32xbf16>, vector<32x128xbf16>, vector<64x128xf32> -> vector<64x128xf32>
    %c0_12 = arith.constant 0 : index
    %c0_13 = arith.constant 0 : index
    %13 = vector.load %arg6[%c0_12, %c0_13] : memref<64x1xf32, #tpu.memory_space<vmem>>, vector<64x1xf32>
    %14 = vector.broadcast %13 : vector<64x1xf32> to vector<64x128xf32>
    %15 = arith.addf %12, %14 : vector<64x128xf32>
    %16 = arith.truncf %10 : vector<32x128xf32> to vector<32x128xbf16>
    %17 = arith.truncf %15 : vector<64x128xf32> to vector<64x128xbf16>
    %18 = vector.extract_strided_slice %17 {offsets = [0, 0], sizes = [32, 128], strides = [1, 1]} : vector<64x128xbf16> to vector<32x128xbf16>
    %19 = vector.extract_strided_slice %17 {offsets = [32, 0], sizes = [32, 128], strides = [1, 1]} : vector<64x128xbf16> to vector<32x128xbf16>
    %20 = tpu.iota {dimensions = array<i32: 0>} : vector<128x1xi32>
    %c16_i32 = arith.constant 16 : i32
    %21 = vector.broadcast %c16_i32 : i32 to vector<128x1xi32>
    %22 = arith.cmpi slt, %20, %21 : vector<128x1xi32>
    %23 = tpu.iota {dimensions = array<i32: 1>} : vector<1x128xi32>
    %c16_i32_14 = arith.constant 16 : i32
    %24 = vector.broadcast %c16_i32_14 : i32 to vector<1x128xi32>
    %25 = arith.cmpi slt, %23, %24 : vector<1x128xi32>
    %26 = vector.extract_strided_slice %16 {offsets = [0, 0], sizes = [8, 128], strides = [1, 1]} : vector<32x128xbf16> to vector<8x128xbf16>
    %27 = vector.extract_strided_slice %18 {offsets = [0, 0], sizes = [8, 128], strides = [1, 1]} : vector<32x128xbf16> to vector<8x128xbf16>
    %28 = vector.extract_strided_slice %19 {offsets = [0, 0], sizes = [8, 128], strides = [1, 1]} : vector<32x128xbf16> to vector<8x128xbf16>
    %cst_15 = arith.constant dense<0.000000e+00> : vector<128x128xf32>
    %29 = tpu.matmul %27, %26, %cst_15 {dimension_numbers = #tpu.dot_dimension_numbers<[0], [0], [1], [1], [0, 1, 1, 1], [], []>} : vector<8x128xbf16>, vector<8x128xbf16>, vector<128x128xf32> -> vector<128x128xf32>
    %cst_16 = arith.constant -1.000000e+30 : f32
    %30 = vector.shape_cast %22 : vector<128x1xi1> to vector<128x1xi1>
    %31 = vector.broadcast %30 : vector<128x1xi1> to vector<128x128xi1>
    %32 = vector.broadcast %cst_16 : f32 to vector<128x128xf32>
    %33 = arith.select %31, %29, %32 : vector<128x128xi1>, vector<128x128xf32>
    %cst_17 = arith.constant dense<0xFF800000> : vector<128xf32>
    %34 = vector.multi_reduction <maximumf>, %33, %cst_17 [0] : vector<128x128xf32> to vector<128xf32>
    %35 = vector.shape_cast %34 : vector<128xf32> to vector<1x128xf32>
    %36 = vector.broadcast %35 : vector<1x128xf32> to vector<128x128xf32>
    %37 = arith.subf %33, %36 : vector<128x128xf32>
    %38 = math.exp %37 : vector<128x128xf32>
    %cst_18 = arith.constant dense<0.000000e+00> : vector<128xf32>
    %39 = vector.multi_reduction <add>, %38, %cst_18 [0] : vector<128x128xf32> to vector<128xf32>
    %40 = vector.shape_cast %39 : vector<128xf32> to vector<1x128xf32>
    %41 = tpu.reciprocal %40 {approx = true} : vector<1x128xf32> -> vector<1x128xf32>
    %42 = arith.truncf %38 : vector<128x128xf32> to vector<128x128xbf16>
    %cst_19 = arith.constant dense<0.000000e+00> : vector<8x128xf32>
    %43 = tpu.matmul %28, %42, %cst_19 {dimension_numbers = #tpu.dot_dimension_numbers<[1], [0], [0], [1], [0, 0, 1, 1], [], []>} : vector<8x128xbf16>, vector<128x128xbf16>, vector<8x128xf32> -> vector<8x128xf32>
    %44 = vector.broadcast %41 : vector<1x128xf32> to vector<8x128xf32>
    %45 = arith.mulf %43, %44 : vector<8x128xf32>
    %c0_20 = arith.constant 0 : index
    %c0_21 = arith.constant 0 : index
    %46 = vector.load %arg15[%c0_20, %c0_21] : memref<32x128xf32, #tpu.memory_space<vmem>>, vector<8x128xf32>
    tpu.vector_store %arg15[%c0_20, %c0_21], %45 {strides = array<i32>} : memref<32x128xf32, #tpu.memory_space<vmem>>, vector<8x128xf32>,
    %47 = vector.extract_strided_slice %16 {offsets = [8, 0], sizes = [8, 128], strides = [1, 1]} : vector<32x128xbf16> to vector<8x128xbf16>
    %48 = vector.extract_strided_slice %18 {offsets = [8, 0], sizes = [8, 128], strides = [1, 1]} : vector<32x128xbf16> to vector<8x128xbf16>
    %49 = vector.extract_strided_slice %19 {offsets = [8, 0], sizes = [8, 128], strides = [1, 1]} : vector<32x128xbf16> to vector<8x128xbf16>
    %cst_22 = arith.constant dense<0.000000e+00> : vector<128x128xf32>
    %50 = tpu.matmul %48, %47, %cst_22 {dimension_numbers = #tpu.dot_dimension_numbers<[0], [0], [1], [1], [0, 1, 1, 1], [], []>} : vector<8x128xbf16>, vector<8x128xbf16>, vector<128x128xf32> -> vector<128x128xf32>
    %cst_23 = arith.constant -1.000000e+30 : f32
    %51 = vector.shape_cast %22 : vector<128x1xi1> to vector<128x1xi1>
    %52 = vector.broadcast %51 : vector<128x1xi1> to vector<128x128xi1>
    %53 = vector.broadcast %cst_23 : f32 to vector<128x128xf32>
    %54 = arith.select %52, %50, %53 : vector<128x128xi1>, vector<128x128xf32>
    %cst_24 = arith.constant dense<0xFF800000> : vector<128xf32>
    %55 = vector.multi_reduction <maximumf>, %54, %cst_24 [0] : vector<128x128xf32> to vector<128xf32>
    %56 = vector.shape_cast %55 : vector<128xf32> to vector<1x128xf32>
    %57 = vector.broadcast %56 : vector<1x128xf32> to vector<128x128xf32>
    %58 = arith.subf %54, %57 : vector<128x128xf32>
    %59 = math.exp %58 : vector<128x128xf32>
    %cst_25 = arith.constant dense<0.000000e+00> : vector<128xf32>
    %60 = vector.multi_reduction <add>, %59, %cst_25 [0] : vector<128x128xf32> to vector<128xf32>
    %61 = vector.shape_cast %60 : vector<128xf32> to vector<1x128xf32>
    %62 = tpu.reciprocal %61 {approx = true} : vector<1x128xf32> -> vector<1x128xf32>
    %63 = arith.truncf %59 : vector<128x128xf32> to vector<128x128xbf16>
    %cst_26 = arith.constant dense<0.000000e+00> : vector<8x128xf32>
    %64 = tpu.matmul %49, %63, %cst_26 {dimension_numbers = #tpu.dot_dimension_numbers<[1], [0], [0], [1], [0, 0, 1, 1], [], []>} : vector<8x128xbf16>, vector<128x128xbf16>, vector<8x128xf32> -> vector<8x128xf32>
    %65 = vector.broadcast %62 : vector<1x128xf32> to vector<8x128xf32>
    %66 = arith.mulf %64, %65 : vector<8x128xf32>
    %c8 = arith.constant 8 : index
    %c0_27 = arith.constant 0 : index
    %67 = vector.load %arg15[%c8, %c0_27] : memref<32x128xf32, #tpu.memory_space<vmem>>, vector<8x128xf32>
    tpu.vector_store %arg15[%c8, %c0_27], %66 {strides = array<i32>} : memref<32x128xf32, #tpu.memory_space<vmem>>, vector<8x128xf32>,
    %68 = vector.extract_strided_slice %16 {offsets = [16, 0], sizes = [8, 128], strides = [1, 1]} : vector<32x128xbf16> to vector<8x128xbf16>
    %69 = vector.extract_strided_slice %18 {offsets = [16, 0], sizes = [8, 128], strides = [1, 1]} : vector<32x128xbf16> to vector<8x128xbf16>
    %70 = vector.extract_strided_slice %19 {offsets = [16, 0], sizes = [8, 128], strides = [1, 1]} : vector<32x128xbf16> to vector<8x128xbf16>
    %cst_28 = arith.constant dense<0.000000e+00> : vector<128x128xf32>
    %71 = tpu.matmul %69, %68, %cst_28 {dimension_numbers = #tpu.dot_dimension_numbers<[0], [0], [1], [1], [0, 1, 1, 1], [], []>} : vector<8x128xbf16>, vector<8x128xbf16>, vector<128x128xf32> -> vector<128x128xf32>
    %cst_29 = arith.constant -1.000000e+30 : f32
    %72 = vector.shape_cast %22 : vector<128x1xi1> to vector<128x1xi1>
    %73 = vector.broadcast %72 : vector<128x1xi1> to vector<128x128xi1>
    %74 = vector.broadcast %cst_29 : f32 to vector<128x128xf32>
    %75 = arith.select %73, %71, %74 : vector<128x128xi1>, vector<128x128xf32>
    %cst_30 = arith.constant dense<0xFF800000> : vector<128xf32>
    %76 = vector.multi_reduction <maximumf>, %75, %cst_30 [0] : vector<128x128xf32> to vector<128xf32>
    %77 = vector.shape_cast %76 : vector<128xf32> to vector<1x128xf32>
    %78 = vector.broadcast %77 : vector<1x128xf32> to vector<128x128xf32>
    %79 = arith.subf %75, %78 : vector<128x128xf32>
    %80 = math.exp %79 : vector<128x128xf32>
    %cst_31 = arith.constant dense<0.000000e+00> : vector<128xf32>
    %81 = vector.multi_reduction <add>, %80, %cst_31 [0] : vector<128x128xf32> to vector<128xf32>
    %82 = vector.shape_cast %81 : vector<128xf32> to vector<1x128xf32>
    %83 = tpu.reciprocal %82 {approx = true} : vector<1x128xf32> -> vector<1x128xf32>
    %84 = arith.truncf %80 : vector<128x128xf32> to vector<128x128xbf16>
    %cst_32 = arith.constant dense<0.000000e+00> : vector<8x128xf32>
    %85 = tpu.matmul %70, %84, %cst_32 {dimension_numbers = #tpu.dot_dimension_numbers<[1], [0], [0], [1], [0, 0, 1, 1], [], []>} : vector<8x128xbf16>, vector<128x128xbf16>, vector<8x128xf32> -> vector<8x128xf32>
    %86 = vector.broadcast %83 : vector<1x128xf32> to vector<8x128xf32>
    %87 = arith.mulf %85, %86 : vector<8x128xf32>
    %c16 = arith.constant 16 : index
    %c0_33 = arith.constant 0 : index
    %88 = vector.load %arg15[%c16, %c0_33] : memref<32x128xf32, #tpu.memory_space<vmem>>, vector<8x128xf32>
    tpu.vector_store %arg15[%c16, %c0_33], %87 {strides = array<i32>} : memref<32x128xf32, #tpu.memory_space<vmem>>, vector<8x128xf32>,
    %89 = vector.extract_strided_slice %16 {offsets = [24, 0], sizes = [8, 128], strides = [1, 1]} : vector<32x128xbf16> to vector<8x128xbf16>
    %90 = vector.extract_strided_slice %18 {offsets = [24, 0], sizes = [8, 128], strides = [1, 1]} : vector<32x128xbf16> to vector<8x128xbf16>
    %91 = vector.extract_strided_slice %19 {offsets = [24, 0], sizes = [8, 128], strides = [1, 1]} : vector<32x128xbf16> to vector<8x128xbf16>
    %cst_34 = arith.constant dense<0.000000e+00> : vector<128x128xf32>
    %92 = tpu.matmul %90, %89, %cst_34 {dimension_numbers = #tpu.dot_dimension_numbers<[0], [0], [1], [1], [0, 1, 1, 1], [], []>} : vector<8x128xbf16>, vector<8x128xbf16>, vector<128x128xf32> -> vector<128x128xf32>
    %cst_35 = arith.constant -1.000000e+30 : f32
    %93 = vector.shape_cast %22 : vector<128x1xi1> to vector<128x1xi1>
    %94 = vector.broadcast %93 : vector<128x1xi1> to vector<128x128xi1>
    %95 = vector.broadcast %cst_35 : f32 to vector<128x128xf32>
    %96 = arith.select %94, %92, %95 : vector<128x128xi1>, vector<128x128xf32>
    %cst_36 = arith.constant dense<0xFF800000> : vector<128xf32>
    %97 = vector.multi_reduction <maximumf>, %96, %cst_36 [0] : vector<128x128xf32> to vector<128xf32>
    %98 = vector.shape_cast %97 : vector<128xf32> to vector<1x128xf32>
    %99 = vector.broadcast %98 : vector<1x128xf32> to vector<128x128xf32>
    %100 = arith.subf %96, %99 : vector<128x128xf32>
    %101 = math.exp %100 : vector<128x128xf32>
    %cst_37 = arith.constant dense<0.000000e+00> : vector<128xf32>
    %102 = vector.multi_reduction <add>, %101, %cst_37 [0] : vector<128x128xf32> to vector<128xf32>
    %103 = vector.shape_cast %102 : vector<128xf32> to vector<1x128xf32>
    %104 = tpu.reciprocal %103 {approx = true} : vector<1x128xf32> -> vector<1x128xf32>
    %105 = arith.truncf %101 : vector<128x128xf32> to vector<128x128xbf16>
    %cst_38 = arith.constant dense<0.000000e+00> : vector<8x128xf32>
    %106 = tpu.matmul %91, %105, %cst_38 {dimension_numbers = #tpu.dot_dimension_numbers<[1], [0], [0], [1], [0, 0, 1, 1], [], []>} : vector<8x128xbf16>, vector<128x128xbf16>, vector<8x128xf32> -> vector<8x128xf32>
    %107 = vector.broadcast %104 : vector<1x128xf32> to vector<8x128xf32>
    %108 = arith.mulf %106, %107 : vector<8x128xf32>
    %c24 = arith.constant 24 : index
    %c0_39 = arith.constant 0 : index
    %109 = vector.load %arg15[%c24, %c0_39] : memref<32x128xf32, #tpu.memory_space<vmem>>, vector<8x128xf32>
    tpu.vector_store %arg15[%c24, %c0_39], %108 {strides = array<i32>} : memref<32x128xf32, #tpu.memory_space<vmem>>, vector<8x128xf32>,
    %c0_40 = arith.constant 0 : index
    %c0_41 = arith.constant 0 : index
    %110 = vector.load %arg7[%c0_40, %c0_41] : memref<32x32xbf16, #tpu.memory_space<vmem>>, vector<32x32xbf16>
    %c0_42 = arith.constant 0 : index
    %c0_43 = arith.constant 0 : index
    %111 = vector.load %arg15[%c0_42, %c0_43] : memref<32x128xf32, #tpu.memory_space<vmem>>, vector<32x128xf32>
    %112 = arith.truncf %111 : vector<32x128xf32> to vector<32x128xbf16>
    %cst_44 = arith.constant dense<0.000000e+00> : vector<32x128xf32>
    %113 = tpu.matmul %110, %112, %cst_44 {dimension_numbers = #tpu.dot_dimension_numbers<[1], [0], [0], [1], [0, 0, 1, 1], [], []>} : vector<32x32xbf16>, vector<32x128xbf16>, vector<32x128xf32> -> vector<32x128xf32>
    %c0_45 = arith.constant 0 : index
    %c0_46 = arith.constant 0 : index
    %114 = vector.load %arg8[%c0_45, %c0_46] : memref<32x1xf32, #tpu.memory_space<vmem>>, vector<32x1xf32>
    %115 = vector.broadcast %114 : vector<32x1xf32> to vector<32x128xf32>
    %116 = arith.addf %113, %115 : vector<32x128xf32>
    %c0_47 = arith.constant 0 : index
    %c0_48 = arith.constant 0 : index
    %117 = vector.load %arg9[%c0_47, %c0_48] : memref<64x32xbf16, #tpu.memory_space<vmem>>, vector<64x32xbf16>
    %cst_49 = arith.constant dense<0.000000e+00> : vector<64x128xf32>
    %118 = tpu.matmul %117, %2, %cst_49 {dimension_numbers = #tpu.dot_dimension_numbers<[1], [0], [0], [1], [0, 0, 1, 1], [], []>} : vector<64x32xbf16>, vector<32x128xbf16>, vector<64x128xf32> -> vector<64x128xf32>
    %c0_50 = arith.constant 0 : index
    %c0_51 = arith.constant 0 : index
    %119 = vector.load %arg10[%c0_50, %c0_51] : memref<64x32xbf16, #tpu.memory_space<vmem>>, vector<64x32xbf16>
    %120 = arith.truncf %116 : vector<32x128xf32> to vector<32x128xbf16>
    %cst_52 = arith.constant dense<0.000000e+00> : vector<64x128xf32>
    %121 = tpu.matmul %119, %120, %cst_52 {dimension_numbers = #tpu.dot_dimension_numbers<[1], [0], [0], [1], [0, 0, 1, 1], [], []>} : vector<64x32xbf16>, vector<32x128xbf16>, vector<64x128xf32> -> vector<64x128xf32>
    %122 = arith.addf %118, %121 : vector<64x128xf32>
    %c0_53 = arith.constant 0 : index
    %c0_54 = arith.constant 0 : index
    %123 = vector.load %arg11[%c0_53, %c0_54] : memref<64x1xf32, #tpu.memory_space<vmem>>, vector<64x1xf32>
    %124 = vector.broadcast %123 : vector<64x1xf32> to vector<64x128xf32>
    %125 = arith.addf %122, %124 : vector<64x128xf32>
    %cst_55 = arith.constant 0.000000e+00 : f32
    %126 = vector.shape_cast %25 : vector<1x128xi1> to vector<1x128xi1>
    %127 = vector.broadcast %126 : vector<1x128xi1> to vector<64x128xi1>
    %128 = vector.broadcast %cst_55 : f32 to vector<64x128xf32>
    %129 = arith.select %127, %125, %128 : vector<64x128xi1>, vector<64x128xf32>
    %cst_56 = arith.constant dense<0.000000e+00> : vector<64xf32>
    %130 = vector.multi_reduction <add>, %129, %cst_56 [1] : vector<64x128xf32> to vector<64xf32>
    %131 = vector.shape_cast %130 : vector<64xf32> to vector<64x1xf32>
    %cst_57 = arith.constant 6.250000e-02 : f32
    %132 = vector.broadcast %cst_57 : f32 to vector<64x1xf32>
    %133 = arith.mulf %131, %132 : vector<64x1xf32>
    %134 = arith.mulf %129, %129 : vector<64x128xf32>
    %cst_58 = arith.constant dense<0.000000e+00> : vector<64xf32>
    %135 = vector.multi_reduction <add>, %134, %cst_58 [1] : vector<64x128xf32> to vector<64xf32>
    %136 = vector.shape_cast %135 : vector<64xf32> to vector<64x1xf32>
    %cst_59 = arith.constant 6.250000e-02 : f32
    %137 = vector.broadcast %cst_59 : f32 to vector<64x1xf32>
    %138 = arith.mulf %136, %137 : vector<64x1xf32>
    %139 = arith.mulf %133, %133 : vector<64x1xf32>
    %140 = arith.subf %138, %139 : vector<64x1xf32>
    %141 = vector.broadcast %133 : vector<64x1xf32> to vector<64x128xf32>
    %142 = arith.subf %125, %141 : vector<64x128xf32>
    %cst_60 = arith.constant 9.99999974E-6 : f32
    %143 = vector.broadcast %cst_60 : f32 to vector<64x1xf32>
    %144 = arith.addf %140, %143 : vector<64x1xf32>
    %145 = math.rsqrt %144 : vector<64x1xf32>
    %146 = vector.broadcast %145 : vector<64x1xf32> to vector<64x128xf32>
    %147 = arith.mulf %142, %146 : vector<64x128xf32>
    %cst_61 = arith.constant 0.000000e+00 : f32
    %148 = vector.broadcast %cst_61 : f32 to vector<64x128xf32>
    %149 = arith.maximumf %147, %148 : vector<64x128xf32>
    %c0_62 = arith.constant 0 : index
    %c0_63 = arith.constant 0 : index
    %150 = vector.load %arg12[%c0_62, %c0_63] : memref<32x64xbf16, #tpu.memory_space<vmem>>, vector<32x64xbf16>
    %151 = arith.truncf %149 : vector<64x128xf32> to vector<64x128xbf16>
    %cst_64 = arith.constant dense<0.000000e+00> : vector<32x128xf32>
    %152 = tpu.matmul %150, %151, %cst_64 {dimension_numbers = #tpu.dot_dimension_numbers<[1], [0], [0], [1], [0, 0, 1, 1], [], []>} : vector<32x64xbf16>, vector<64x128xbf16>, vector<32x128xf32> -> vector<32x128xf32>
    %c0_65 = arith.constant 0 : index
    %c0_66 = arith.constant 0 : index
    %153 = vector.load %arg13[%c0_65, %c0_66] : memref<32x1xf32, #tpu.memory_space<vmem>>, vector<32x1xf32>
    %154 = vector.broadcast %153 : vector<32x1xf32> to vector<32x128xf32>
    %155 = arith.addf %152, %154 : vector<32x128xf32>
    %c0_67 = arith.constant 0 : index
    %c0_68 = arith.constant 0 : index
    %c0_69 = arith.constant 0 : index
    %156 = vector.load %arg14[%c0_67, %c0_68, %c0_69] : memref<1x32x128xf32, #tpu.memory_space<vmem>>, vector<1x32x128xf32>
    %157 = vector.shape_cast %156 : vector<1x32x128xf32> to vector<32x128xf32>
    %158 = vector.shape_cast %155 : vector<32x128xf32> to vector<1x32x128xf32>
    tpu.vector_store %arg14[%c0_67, %c0_68, %c0_69], %158 {strides = array<i32>} : memref<1x32x128xf32, #tpu.memory_space<vmem>>, vector<1x32x128xf32>,
    return
  }
  func.func @transform_0(%arg0: i32) -> (i32, i32, i32) {
    %c0_i32 = arith.constant 0 : i32
    %c0_i32_0 = arith.constant 0 : i32
    %c0_i32_1 = arith.constant 0 : i32
    return %arg0, %c0_i32, %c0_i32_0 : i32, i32, i32
  }
  func.func @transform_1(%arg0: i32) -> (i32, i32, i32) {
    %c0_i32 = arith.constant 0 : i32
    %c0_i32_0 = arith.constant 0 : i32
    %c0_i32_1 = arith.constant 0 : i32
    return %arg0, %c0_i32, %c0_i32_0 : i32, i32, i32
  }
  func.func @transform_2(%arg0: i32) -> (i32, i32) {
    %c0_i32 = arith.constant 0 : i32
    %c0_i32_0 = arith.constant 0 : i32
    %c0_i32_1 = arith.constant 0 : i32
    return %c0_i32, %c0_i32_0 : i32, i32
  }
  func.func @transform_3(%arg0: i32) -> (i32, i32) {
    %c0_i32 = arith.constant 0 : i32
    %c0_i32_0 = arith.constant 0 : i32
    %c0_i32_1 = arith.constant 0 : i32
    return %c0_i32, %c0_i32_0 : i32, i32
  }
  func.func @transform_4(%arg0: i32) -> (i32, i32) {
    %c0_i32 = arith.constant 0 : i32
    %c0_i32_0 = arith.constant 0 : i32
    %c0_i32_1 = arith.constant 0 : i32
    return %c0_i32, %c0_i32_0 : i32, i32
  }
  func.func @transform_5(%arg0: i32) -> (i32, i32) {
    %c0_i32 = arith.constant 0 : i32
    %c0_i32_0 = arith.constant 0 : i32
    %c0_i32_1 = arith.constant 0 : i32
    return %c0_i32, %c0_i32_0 : i32, i32
  }
  func.func @transform_6(%arg0: i32) -> (i32, i32) {
    %c0_i32 = arith.constant 0 : i32
    %c0_i32_0 = arith.constant 0 : i32
    %c0_i32_1 = arith.constant 0 : i32
    return %c0_i32, %c0_i32_0 : i32, i32
  }
  func.func @transform_7(%arg0: i32) -> (i32, i32) {
    %c0_i32 = arith.constant 0 : i32
    %c0_i32_0 = arith.constant 0 : i32
    %c0_i32_1 = arith.constant 0 : i32
    return %c0_i32, %c0_i32_0 : i32, i32
  }
  func.func @transform_8(%arg0: i32) -> (i32, i32) {
    %c0_i32 = arith.constant 0 : i32
    %c0_i32_0 = arith.constant 0 : i32
    %c0_i32_1 = arith.constant 0 : i32
    return %c0_i32, %c0_i32_0 : i32, i32
  }
  func.func @transform_9(%arg0: i32) -> (i32, i32) {
    %c0_i32 = arith.constant 0 : i32
    %c0_i32_0 = arith.constant 0 : i32
    %c0_i32_1 = arith.constant 0 : i32
    return %c0_i32, %c0_i32_0 : i32, i32
  }
  func.func @transform_10(%arg0: i32) -> (i32, i32) {
    %c0_i32 = arith.constant 0 : i32
    %c0_i32_0 = arith.constant 0 : i32
    %c0_i32_1 = arith.constant 0 : i32
    return %c0_i32, %c0_i32_0 : i32, i32
  }
  func.func @transform_11(%arg0: i32) -> (i32, i32) {
    %c0_i32 = arith.constant 0 : i32
    %c0_i32_0 = arith.constant 0 : i32
    %c0_i32_1 = arith.constant 0 : i32
    return %c0_i32, %c0_i32_0 : i32, i32
  }
  func.func @transform_12(%arg0: i32) -> (i32, i32) {
    %c0_i32 = arith.constant 0 : i32
    %c0_i32_0 = arith.constant 0 : i32
    %c0_i32_1 = arith.constant 0 : i32
    return %c0_i32, %c0_i32_0 : i32, i32
  }
  func.func @transform_13(%arg0: i32) -> (i32, i32, i32) {
    %c0_i32 = arith.constant 0 : i32
    %c0_i32_0 = arith.constant 0 : i32
    %c0_i32_1 = arith.constant 0 : i32
    return %arg0, %c0_i32, %c0_i32_0 : i32, i32, i32
  }
}

module attributes {stable_mosaic.version = 11 : i64} {
  func.func @attn_prop_kernel(%arg0: i32, %arg1: memref<1x32x128xf32, #tpu.memory_space<vmem>>, %arg2: memref<1x32x128xf32, #tpu.memory_space<vmem>>, %arg3: memref<32x32xbf16, #tpu.memory_space<vmem>>, %arg4: memref<32x1xf32, #tpu.memory_space<vmem>>, %arg5: memref<64x32xbf16, #tpu.memory_space<vmem>>, %arg6: memref<64x1xf32, #tpu.memory_space<vmem>>, %arg7: memref<32x32xbf16, #tpu.memory_space<vmem>>, %arg8: memref<32x1xf32, #tpu.memory_space<vmem>>, %arg9: memref<64x32xbf16, #tpu.memory_space<vmem>>, %arg10: memref<64x32xbf16, #tpu.memory_space<vmem>>, %arg11: memref<64x1xf32, #tpu.memory_space<vmem>>, %arg12: memref<32x64xbf16, #tpu.memory_space<vmem>>, %arg13: memref<32x1xf32, #tpu.memory_space<vmem>>, %arg14: memref<1x32x128xf32, #tpu.memory_space<vmem>>, %arg15: memref<32x128xf32, #tpu.memory_space<vmem>>) attributes {dimension_semantics = [#tpu.dimension_semantics<parallel>], iteration_bounds = array<i64: 2>, scalar_prefetch = 0 : i64, scratch_operands = 1 : i64, tpu.core_type = #tpu.core_type<tc>, window_params = [{transform_indices = @transform_0, window_bounds = array<i64: 1, 32, 128>}, {transform_indices = @transform_1, window_bounds = array<i64: 1, 32, 128>}, {pipeline_mode = #tpu.pipeline_mode<synchronous>, transform_indices = @transform_2, window_bounds = array<i64: 32, 32>}, {pipeline_mode = #tpu.pipeline_mode<synchronous>, transform_indices = @transform_3, window_bounds = array<i64: 32, 1>}, {pipeline_mode = #tpu.pipeline_mode<synchronous>, transform_indices = @transform_4, window_bounds = array<i64: 64, 32>}, {pipeline_mode = #tpu.pipeline_mode<synchronous>, transform_indices = @transform_5, window_bounds = array<i64: 64, 1>}, {pipeline_mode = #tpu.pipeline_mode<synchronous>, transform_indices = @transform_6, window_bounds = array<i64: 32, 32>}, {pipeline_mode = #tpu.pipeline_mode<synchronous>, transform_indices = @transform_7, window_bounds = array<i64: 32, 1>}, {pipeline_mode = #tpu.pipeline_mode<synchronous>, transform_indices = @transform_8, window_bounds = array<i64: 64, 32>}, {pipeline_mode = #tpu.pipeline_mode<synchronous>, transform_indices = @transform_9, window_bounds = array<i64: 64, 32>}, {pipeline_mode = #tpu.pipeline_mode<synchronous>, transform_indices = @transform_10, window_bounds = array<i64: 64, 1>}, {pipeline_mode = #tpu.pipeline_mode<synchronous>, transform_indices = @transform_11, window_bounds = array<i64: 32, 64>}, {pipeline_mode = #tpu.pipeline_mode<synchronous>, transform_indices = @transform_12, window_bounds = array<i64: 32, 1>}, {transform_indices = @transform_13, window_bounds = array<i64: 1, 32, 128>}]} {
    %c0 = arith.constant 0 : index
    %c0_0 = arith.constant 0 : index
    %c0_1 = arith.constant 0 : index
    %0 = vector.load %arg1[%c0, %c0_0, %c0_1] : memref<1x32x128xf32, #tpu.memory_space<vmem>>, vector<1x32x128xf32>
    %1 = vector.shape_cast %0 : vector<1x32x128xf32> to vector<32x128xf32>
    %2 = arith.truncf %1 : vector<32x128xf32> to vector<32x128xbf16>
    %c0_2 = arith.constant 0 : index
    %c0_3 = arith.constant 0 : index
    %c0_4 = arith.constant 0 : index
    %3 = vector.load %arg2[%c0_2, %c0_3, %c0_4] : memref<1x32x128xf32, #tpu.memory_space<vmem>>, vector<1x32x128xf32>
    %4 = vector.shape_cast %3 : vector<1x32x128xf32> to vector<32x128xf32>
    %5 = arith.truncf %4 : vector<32x128xf32> to vector<32x128xbf16>
    %c0_5 = arith.constant 0 : index
    %c0_6 = arith.constant 0 : index
    %6 = vector.load %arg3[%c0_5, %c0_6] : memref<32x32xbf16, #tpu.memory_space<vmem>>, vector<32x32xbf16>
    %cst = arith.constant dense<0.000000e+00> : vector<32x128xf32>
    %7 = tpu.matmul %6, %2, %cst {dimension_numbers = #tpu.dot_dimension_numbers<[1], [0], [0], [1], [0, 0, 1, 1], [], []>} : vector<32x32xbf16>, vector<32x128xbf16>, vector<32x128xf32> -> vector<32x128xf32>
    %c0_7 = arith.constant 0 : index
    %c0_8 = arith.constant 0 : index
    %8 = vector.load %arg4[%c0_7, %c0_8] : memref<32x1xf32, #tpu.memory_space<vmem>>, vector<32x1xf32>
    %9 = vector.broadcast %8 : vector<32x1xf32> to vector<32x128xf32>
    %10 = arith.addf %7, %9 : vector<32x128xf32>
    %c0_9 = arith.constant 0 : index
    %c0_10 = arith.constant 0 : index
    %11 = vector.load %arg5[%c0_9, %c0_10] : memref<64x32xbf16, #tpu.memory_space<vmem>>, vector<64x32xbf16>
    %cst_11 = arith.constant dense<0.000000e+00> : vector<64x128xf32>
    %12 = tpu.matmul %11, %5, %cst_11 {dimension_numbers = #tpu.dot_dimension_numbers<[1], [0], [0], [1], [0, 0, 1, 1], [], []>} : vector<64x32xbf16>, vector<32x128xbf16>, vector<64x128xf32> -> vector<64x128xf32>
    %c0_12 = arith.constant 0 : index
    %c0_13 = arith.constant 0 : index
    %13 = vector.load %arg6[%c0_12, %c0_13] : memref<64x1xf32, #tpu.memory_space<vmem>>, vector<64x1xf32>
    %14 = vector.broadcast %13 : vector<64x1xf32> to vector<64x128xf32>
    %15 = arith.addf %12, %14 : vector<64x128xf32>
    %16 = arith.truncf %10 : vector<32x128xf32> to vector<32x128xbf16>
    %17 = arith.truncf %15 : vector<64x128xf32> to vector<64x128xbf16>
    %18 = vector.extract_strided_slice %17 {offsets = [0, 0], sizes = [32, 128], strides = [1, 1]} : vector<64x128xbf16> to vector<32x128xbf16>
    %19 = vector.extract_strided_slice %17 {offsets = [32, 0], sizes = [32, 128], strides = [1, 1]} : vector<64x128xbf16> to vector<32x128xbf16>
    %20 = tpu.iota {dimensions = array<i32: 0>} : vector<128x1xi32>
    %c16_i32 = arith.constant 16 : i32
    %21 = vector.broadcast %c16_i32 : i32 to vector<128x1xi32>
    %22 = arith.cmpi slt, %20, %21 : vector<128x1xi32>
    %23 = tpu.iota {dimensions = array<i32: 1>} : vector<1x128xi32>
    %c16_i32_14 = arith.constant 16 : i32
    %24 = vector.broadcast %c16_i32_14 : i32 to vector<1x128xi32>
    %25 = arith.cmpi slt, %23, %24 : vector<1x128xi32>
    %26 = vector.extract_strided_slice %16 {offsets = [0, 0], sizes = [8, 128], strides = [1, 1]} : vector<32x128xbf16> to vector<8x128xbf16>
    %27 = vector.extract_strided_slice %18 {offsets = [0, 0], sizes = [8, 128], strides = [1, 1]} : vector<32x128xbf16> to vector<8x128xbf16>
    %28 = vector.extract_strided_slice %19 {offsets = [0, 0], sizes = [8, 128], strides = [1, 1]} : vector<32x128xbf16> to vector<8x128xbf16>
    %cst_15 = arith.constant dense<0.000000e+00> : vector<128x128xf32>
    %29 = tpu.matmul %27, %26, %cst_15 {dimension_numbers = #tpu.dot_dimension_numbers<[0], [0], [1], [1], [0, 1, 1, 1], [], []>} : vector<8x128xbf16>, vector<8x128xbf16>, vector<128x128xf32> -> vector<128x128xf32>
    %cst_16 = arith.constant -1.000000e+30 : f32
    %30 = vector.shape_cast %22 : vector<128x1xi1> to vector<128x1xi1>
    %31 = vector.broadcast %30 : vector<128x1xi1> to vector<128x128xi1>
    %32 = vector.broadcast %cst_16 : f32 to vector<128x128xf32>
    %33 = arith.select %31, %29, %32 : vector<128x128xi1>, vector<128x128xf32>
    %cst_17 = arith.constant dense<0xFF800000> : vector<128xf32>
    %34 = vector.multi_reduction <maximumf>, %33, %cst_17 [0] : vector<128x128xf32> to vector<128xf32>
    %35 = vector.shape_cast %34 : vector<128xf32> to vector<1x128xf32>
    %36 = vector.broadcast %35 : vector<1x128xf32> to vector<128x128xf32>
    %37 = arith.subf %33, %36 : vector<128x128xf32>
    %38 = math.exp %37 : vector<128x128xf32>
    %cst_18 = arith.constant dense<0.000000e+00> : vector<128xf32>
    %39 = vector.multi_reduction <add>, %38, %cst_18 [0] : vector<128x128xf32> to vector<128xf32>
    %40 = vector.shape_cast %39 : vector<128xf32> to vector<1x128xf32>
    %41 = tpu.reciprocal %40 {approx = true} : vector<1x128xf32> -> vector<1x128xf32>
    %42 = arith.truncf %38 : vector<128x128xf32> to vector<128x128xbf16>
    %cst_19 = arith.constant dense<0.000000e+00> : vector<8x128xf32>
    %43 = tpu.matmul %28, %42, %cst_19 {dimension_numbers = #tpu.dot_dimension_numbers<[1], [0], [0], [1], [0, 0, 1, 1], [], []>} : vector<8x128xbf16>, vector<128x128xbf16>, vector<8x128xf32> -> vector<8x128xf32>
    %44 = vector.broadcast %41 : vector<1x128xf32> to vector<8x128xf32>
    %45 = arith.mulf %43, %44 : vector<8x128xf32>
    %c0_20 = arith.constant 0 : index
    %c0_21 = arith.constant 0 : index
    %46 = vector.load %arg15[%c0_20, %c0_21] : memref<32x128xf32, #tpu.memory_space<vmem>>, vector<8x128xf32>
    tpu.vector_store %arg15[%c0_20, %c0_21], %45 {strides = array<i32>} : memref<32x128xf32, #tpu.memory_space<vmem>>, vector<8x128xf32>,
    %47 = vector.extract_strided_slice %16 {offsets = [8, 0], sizes = [8, 128], strides = [1, 1]} : vector<32x128xbf16> to vector<8x128xbf16>
    %48 = vector.extract_strided_slice %18 {offsets = [8, 0], sizes = [8, 128], strides = [1, 1]} : vector<32x128xbf16> to vector<8x128xbf16>
    %49 = vector.extract_strided_slice %19 {offsets = [8, 0], sizes = [8, 128], strides = [1, 1]} : vector<32x128xbf16> to vector<8x128xbf16>
    %cst_22 = arith.constant dense<0.000000e+00> : vector<128x128xf32>
    %50 = tpu.matmul %48, %47, %cst_22 {dimension_numbers = #tpu.dot_dimension_numbers<[0], [0], [1], [1], [0, 1, 1, 1], [], []>} : vector<8x128xbf16>, vector<8x128xbf16>, vector<128x128xf32> -> vector<128x128xf32>
    %cst_23 = arith.constant -1.000000e+30 : f32
    %51 = vector.shape_cast %22 : vector<128x1xi1> to vector<128x1xi1>
    %52 = vector.broadcast %51 : vector<128x1xi1> to vector<128x128xi1>
    %53 = vector.broadcast %cst_23 : f32 to vector<128x128xf32>
    %54 = arith.select %52, %50, %53 : vector<128x128xi1>, vector<128x128xf32>
    %cst_24 = arith.constant dense<0xFF800000> : vector<128xf32>
    %55 = vector.multi_reduction <maximumf>, %54, %cst_24 [0] : vector<128x128xf32> to vector<128xf32>
    %56 = vector.shape_cast %55 : vector<128xf32> to vector<1x128xf32>
    %57 = vector.broadcast %56 : vector<1x128xf32> to vector<128x128xf32>
    %58 = arith.subf %54, %57 : vector<128x128xf32>
    %59 = math.exp %58 : vector<128x128xf32>
    %cst_25 = arith.constant dense<0.000000e+00> : vector<128xf32>
    %60 = vector.multi_reduction <add>, %59, %cst_25 [0] : vector<128x128xf32> to vector<128xf32>
    %61 = vector.shape_cast %60 : vector<128xf32> to vector<1x128xf32>
    %62 = tpu.reciprocal %61 {approx = true} : vector<1x128xf32> -> vector<1x128xf32>
    %63 = arith.truncf %59 : vector<128x128xf32> to vector<128x128xbf16>
    %cst_26 = arith.constant dense<0.000000e+00> : vector<8x128xf32>
    %64 = tpu.matmul %49, %63, %cst_26 {dimension_numbers = #tpu.dot_dimension_numbers<[1], [0], [0], [1], [0, 0, 1, 1], [], []>} : vector<8x128xbf16>, vector<128x128xbf16>, vector<8x128xf32> -> vector<8x128xf32>
    %65 = vector.broadcast %62 : vector<1x128xf32> to vector<8x128xf32>
    %66 = arith.mulf %64, %65 : vector<8x128xf32>
    %c8 = arith.constant 8 : index
    %c0_27 = arith.constant 0 : index
    %67 = vector.load %arg15[%c8, %c0_27] : memref<32x128xf32, #tpu.memory_space<vmem>>, vector<8x128xf32>
    tpu.vector_store %arg15[%c8, %c0_27], %66 {strides = array<i32>} : memref<32x128xf32, #tpu.memory_space<vmem>>, vector<8x128xf32>,
    %68 = vector.extract_strided_slice %16 {offsets = [16, 0], sizes = [8, 128], strides = [1, 1]} : vector<32x128xbf16> to vector<8x128xbf16>
    %69 = vector.extract_strided_slice %18 {offsets = [16, 0], sizes = [8, 128], strides = [1, 1]} : vector<32x128xbf16> to vector<8x128xbf16>
    %70 = vector.extract_strided_slice %19 {offsets = [16, 0], sizes = [8, 128], strides = [1, 1]} : vector<32x128xbf16> to vector<8x128xbf16>
    %cst_28 = arith.constant dense<0.000000e+00> : vector<128x128xf32>
    %71 = tpu.matmul %69, %68, %cst_28 {dimension_numbers = #tpu.dot_dimension_numbers<[0], [0], [1], [1], [0, 1, 1, 1], [], []>} : vector<8x128xbf16>, vector<8x128xbf16>, vector<128x128xf32> -> vector<128x128xf32>
    %cst_29 = arith.constant -1.000000e+30 : f32
    %72 = vector.shape_cast %22 : vector<128x1xi1> to vector<128x1xi1>
    %73 = vector.broadcast %72 : vector<128x1xi1> to vector<128x128xi1>
    %74 = vector.broadcast %cst_29 : f32 to vector<128x128xf32>
    %75 = arith.select %73, %71, %74 : vector<128x128xi1>, vector<128x128xf32>
    %cst_30 = arith.constant dense<0xFF800000> : vector<128xf32>
    %76 = vector.multi_reduction <maximumf>, %75, %cst_30 [0] : vector<128x128xf32> to vector<128xf32>
    %77 = vector.shape_cast %76 : vector<128xf32> to vector<1x128xf32>
    %78 = vector.broadcast %77 : vector<1x128xf32> to vector<128x128xf32>
    %79 = arith.subf %75, %78 : vector<128x128xf32>
    %80 = math.exp %79 : vector<128x128xf32>
    %cst_31 = arith.constant dense<0.000000e+00> : vector<128xf32>
    %81 = vector.multi_reduction <add>, %80, %cst_31 [0] : vector<128x128xf32> to vector<128xf32>
    %82 = vector.shape_cast %81 : vector<128xf32> to vector<1x128xf32>
    %83 = tpu.reciprocal %82 {approx = true} : vector<1x128xf32> -> vector<1x128xf32>
    %84 = arith.truncf %80 : vector<128x128xf32> to vector<128x128xbf16>
    %cst_32 = arith.constant dense<0.000000e+00> : vector<8x128xf32>
    %85 = tpu.matmul %70, %84, %cst_32 {dimension_numbers = #tpu.dot_dimension_numbers<[1], [0], [0], [1], [0, 0, 1, 1], [], []>} : vector<8x128xbf16>, vector<128x128xbf16>, vector<8x128xf32> -> vector<8x128xf32>
    %86 = vector.broadcast %83 : vector<1x128xf32> to vector<8x128xf32>
    %87 = arith.mulf %85, %86 : vector<8x128xf32>
    %c16 = arith.constant 16 : index
    %c0_33 = arith.constant 0 : index
    %88 = vector.load %arg15[%c16, %c0_33] : memref<32x128xf32, #tpu.memory_space<vmem>>, vector<8x128xf32>
    tpu.vector_store %arg15[%c16, %c0_33], %87 {strides = array<i32>} : memref<32x128xf32, #tpu.memory_space<vmem>>, vector<8x128xf32>,
    %89 = vector.extract_strided_slice %16 {offsets = [24, 0], sizes = [8, 128], strides = [1, 1]} : vector<32x128xbf16> to vector<8x128xbf16>
    %90 = vector.extract_strided_slice %18 {offsets = [24, 0], sizes = [8, 128], strides = [1, 1]} : vector<32x128xbf16> to vector<8x128xbf16>
    %91 = vector.extract_strided_slice %19 {offsets = [24, 0], sizes = [8, 128], strides = [1, 1]} : vector<32x128xbf16> to vector<8x128xbf16>
    %cst_34 = arith.constant dense<0.000000e+00> : vector<128x128xf32>
    %92 = tpu.matmul %90, %89, %cst_34 {dimension_numbers = #tpu.dot_dimension_numbers<[0], [0], [1], [1], [0, 1, 1, 1], [], []>} : vector<8x128xbf16>, vector<8x128xbf16>, vector<128x128xf32> -> vector<128x128xf32>
    %cst_35 = arith.constant -1.000000e+30 : f32
    %93 = vector.shape_cast %22 : vector<128x1xi1> to vector<128x1xi1>
    %94 = vector.broadcast %93 : vector<128x1xi1> to vector<128x128xi1>
    %95 = vector.broadcast %cst_35 : f32 to vector<128x128xf32>
    %96 = arith.select %94, %92, %95 : vector<128x128xi1>, vector<128x128xf32>
    %cst_36 = arith.constant dense<0xFF800000> : vector<128xf32>
    %97 = vector.multi_reduction <maximumf>, %96, %cst_36 [0] : vector<128x128xf32> to vector<128xf32>
    %98 = vector.shape_cast %97 : vector<128xf32> to vector<1x128xf32>
    %99 = vector.broadcast %98 : vector<1x128xf32> to vector<128x128xf32>
    %100 = arith.subf %96, %99 : vector<128x128xf32>
    %101 = math.exp %100 : vector<128x128xf32>
    %cst_37 = arith.constant dense<0.000000e+00> : vector<128xf32>
    %102 = vector.multi_reduction <add>, %101, %cst_37 [0] : vector<128x128xf32> to vector<128xf32>
    %103 = vector.shape_cast %102 : vector<128xf32> to vector<1x128xf32>
    %104 = tpu.reciprocal %103 {approx = true} : vector<1x128xf32> -> vector<1x128xf32>
    %105 = arith.truncf %101 : vector<128x128xf32> to vector<128x128xbf16>
    %cst_38 = arith.constant dense<0.000000e+00> : vector<8x128xf32>
    %106 = tpu.matmul %91, %105, %cst_38 {dimension_numbers = #tpu.dot_dimension_numbers<[1], [0], [0], [1], [0, 0, 1, 1], [], []>} : vector<8x128xbf16>, vector<128x128xbf16>, vector<8x128xf32> -> vector<8x128xf32>
    %107 = vector.broadcast %104 : vector<1x128xf32> to vector<8x128xf32>
    %108 = arith.mulf %106, %107 : vector<8x128xf32>
    %c24 = arith.constant 24 : index
    %c0_39 = arith.constant 0 : index
    %109 = vector.load %arg15[%c24, %c0_39] : memref<32x128xf32, #tpu.memory_space<vmem>>, vector<8x128xf32>
    tpu.vector_store %arg15[%c24, %c0_39], %108 {strides = array<i32>} : memref<32x128xf32, #tpu.memory_space<vmem>>, vector<8x128xf32>,
    %c0_40 = arith.constant 0 : index
    %c0_41 = arith.constant 0 : index
    %110 = vector.load %arg7[%c0_40, %c0_41] : memref<32x32xbf16, #tpu.memory_space<vmem>>, vector<32x32xbf16>
    %c0_42 = arith.constant 0 : index
    %c0_43 = arith.constant 0 : index
    %111 = vector.load %arg15[%c0_42, %c0_43] : memref<32x128xf32, #tpu.memory_space<vmem>>, vector<32x128xf32>
    %112 = arith.truncf %111 : vector<32x128xf32> to vector<32x128xbf16>
    %cst_44 = arith.constant dense<0.000000e+00> : vector<32x128xf32>
    %113 = tpu.matmul %110, %112, %cst_44 {dimension_numbers = #tpu.dot_dimension_numbers<[1], [0], [0], [1], [0, 0, 1, 1], [], []>} : vector<32x32xbf16>, vector<32x128xbf16>, vector<32x128xf32> -> vector<32x128xf32>
    %c0_45 = arith.constant 0 : index
    %c0_46 = arith.constant 0 : index
    %114 = vector.load %arg8[%c0_45, %c0_46] : memref<32x1xf32, #tpu.memory_space<vmem>>, vector<32x1xf32>
    %115 = vector.broadcast %114 : vector<32x1xf32> to vector<32x128xf32>
    %116 = arith.addf %113, %115 : vector<32x128xf32>
    %c0_47 = arith.constant 0 : index
    %c0_48 = arith.constant 0 : index
    %117 = vector.load %arg9[%c0_47, %c0_48] : memref<64x32xbf16, #tpu.memory_space<vmem>>, vector<64x32xbf16>
    %cst_49 = arith.constant dense<0.000000e+00> : vector<64x128xf32>
    %118 = tpu.matmul %117, %2, %cst_49 {dimension_numbers = #tpu.dot_dimension_numbers<[1], [0], [0], [1], [0, 0, 1, 1], [], []>} : vector<64x32xbf16>, vector<32x128xbf16>, vector<64x128xf32> -> vector<64x128xf32>
    %c0_50 = arith.constant 0 : index
    %c0_51 = arith.constant 0 : index
    %119 = vector.load %arg10[%c0_50, %c0_51] : memref<64x32xbf16, #tpu.memory_space<vmem>>, vector<64x32xbf16>
    %120 = arith.truncf %116 : vector<32x128xf32> to vector<32x128xbf16>
    %cst_52 = arith.constant dense<0.000000e+00> : vector<64x128xf32>
    %121 = tpu.matmul %119, %120, %cst_52 {dimension_numbers = #tpu.dot_dimension_numbers<[1], [0], [0], [1], [0, 0, 1, 1], [], []>} : vector<64x32xbf16>, vector<32x128xbf16>, vector<64x128xf32> -> vector<64x128xf32>
    %122 = arith.addf %118, %121 : vector<64x128xf32>
    %c0_53 = arith.constant 0 : index
    %c0_54 = arith.constant 0 : index
    %123 = vector.load %arg11[%c0_53, %c0_54] : memref<64x1xf32, #tpu.memory_space<vmem>>, vector<64x1xf32>
    %124 = vector.broadcast %123 : vector<64x1xf32> to vector<64x128xf32>
    %125 = arith.addf %122, %124 : vector<64x128xf32>
    %cst_55 = arith.constant 0.000000e+00 : f32
    %126 = vector.shape_cast %25 : vector<1x128xi1> to vector<1x128xi1>
    %127 = vector.broadcast %126 : vector<1x128xi1> to vector<64x128xi1>
    %128 = vector.broadcast %cst_55 : f32 to vector<64x128xf32>
    %129 = arith.select %127, %125, %128 : vector<64x128xi1>, vector<64x128xf32>
    %cst_56 = arith.constant dense<0.000000e+00> : vector<64xf32>
    %130 = vector.multi_reduction <add>, %129, %cst_56 [1] : vector<64x128xf32> to vector<64xf32>
    %131 = vector.shape_cast %130 : vector<64xf32> to vector<64x1xf32>
    %cst_57 = arith.constant 6.250000e-02 : f32
    %132 = vector.broadcast %cst_57 : f32 to vector<64x1xf32>
    %133 = arith.mulf %131, %132 : vector<64x1xf32>
    %134 = arith.mulf %129, %129 : vector<64x128xf32>
    %cst_58 = arith.constant dense<0.000000e+00> : vector<64xf32>
    %135 = vector.multi_reduction <add>, %134, %cst_58 [1] : vector<64x128xf32> to vector<64xf32>
    %136 = vector.shape_cast %135 : vector<64xf32> to vector<64x1xf32>
    %cst_59 = arith.constant 6.250000e-02 : f32
    %137 = vector.broadcast %cst_59 : f32 to vector<64x1xf32>
    %138 = arith.mulf %136, %137 : vector<64x1xf32>
    %139 = arith.mulf %133, %133 : vector<64x1xf32>
    %140 = arith.subf %138, %139 : vector<64x1xf32>
    %141 = vector.broadcast %133 : vector<64x1xf32> to vector<64x128xf32>
    %142 = arith.subf %125, %141 : vector<64x128xf32>
    %cst_60 = arith.constant 9.99999974E-6 : f32
    %143 = vector.broadcast %cst_60 : f32 to vector<64x1xf32>
    %144 = arith.addf %140, %143 : vector<64x1xf32>
    %145 = math.rsqrt %144 : vector<64x1xf32>
    %146 = vector.broadcast %145 : vector<64x1xf32> to vector<64x128xf32>
    %147 = arith.mulf %142, %146 : vector<64x128xf32>
    %cst_61 = arith.constant 0.000000e+00 : f32
    %148 = vector.broadcast %cst_61 : f32 to vector<64x128xf32>
    %149 = arith.maximumf %147, %148 : vector<64x128xf32>
    %c0_62 = arith.constant 0 : index
    %c0_63 = arith.constant 0 : index
    %150 = vector.load %arg12[%c0_62, %c0_63] : memref<32x64xbf16, #tpu.memory_space<vmem>>, vector<32x64xbf16>
    %151 = arith.truncf %149 : vector<64x128xf32> to vector<64x128xbf16>
    %cst_64 = arith.constant dense<0.000000e+00> : vector<32x128xf32>
    %152 = tpu.matmul %150, %151, %cst_64 {dimension_numbers = #tpu.dot_dimension_numbers<[1], [0], [0], [1], [0, 0, 1, 1], [], []>} : vector<32x64xbf16>, vector<64x128xbf16>, vector<32x128xf32> -> vector<32x128xf32>
    %c0_65 = arith.constant 0 : index
    %c0_66 = arith.constant 0 : index
    %153 = vector.load %arg13[%c0_65, %c0_66] : memref<32x1xf32, #tpu.memory_space<vmem>>, vector<32x1xf32>
    %154 = vector.broadcast %153 : vector<32x1xf32> to vector<32x128xf32>
    %155 = arith.addf %152, %154 : vector<32x128xf32>
    %c0_67 = arith.constant 0 : index
    %c0_68 = arith.constant 0 : index
    %c0_69 = arith.constant 0 : index
    %156 = vector.load %arg14[%c0_67, %c0_68, %c0_69] : memref<1x32x128xf32, #tpu.memory_space<vmem>>, vector<1x32x128xf32>
    %157 = vector.shape_cast %156 : vector<1x32x128xf32> to vector<32x128xf32>
    %158 = vector.shape_cast %155 : vector<32x128xf32> to vector<1x32x128xf32>
    tpu.vector_store %arg14[%c0_67, %c0_68, %c0_69], %158 {strides = array<i32>} : memref<1x32x128xf32, #tpu.memory_space<vmem>>, vector<1x32x128xf32>,
    return
  }
  func.func @transform_0(%arg0: i32) -> (i32, i32, i32) {
    %c0_i32 = arith.constant 0 : i32
    %c0_i32_0 = arith.constant 0 : i32
    %c0_i32_1 = arith.constant 0 : i32
    return %arg0, %c0_i32, %c0_i32_0 : i32, i32, i32
  }
  func.func @transform_1(%arg0: i32) -> (i32, i32, i32) {
    %c0_i32 = arith.constant 0 : i32
    %c0_i32_0 = arith.constant 0 : i32
    %c0_i32_1 = arith.constant 0 : i32
    return %arg0, %c0_i32, %c0_i32_0 : i32, i32, i32
  }
  func.func @transform_2(%arg0: i32) -> (i32, i32) {
    %c0_i32 = arith.constant 0 : i32
    %c0_i32_0 = arith.constant 0 : i32
    %c0_i32_1 = arith.constant 0 : i32
    return %c0_i32, %c0_i32_0 : i32, i32
  }
  func.func @transform_3(%arg0: i32) -> (i32, i32) {
    %c0_i32 = arith.constant 0 : i32
    %c0_i32_0 = arith.constant 0 : i32
    %c0_i32_1 = arith.constant 0 : i32
    return %c0_i32, %c0_i32_0 : i32, i32
  }
  func.func @transform_4(%arg0: i32) -> (i32, i32) {
    %c0_i32 = arith.constant 0 : i32
    %c0_i32_0 = arith.constant 0 : i32
    %c0_i32_1 = arith.constant 0 : i32
    return %c0_i32, %c0_i32_0 : i32, i32
  }
  func.func @transform_5(%arg0: i32) -> (i32, i32) {
    %c0_i32 = arith.constant 0 : i32
    %c0_i32_0 = arith.constant 0 : i32
    %c0_i32_1 = arith.constant 0 : i32
    return %c0_i32, %c0_i32_0 : i32, i32
  }
  func.func @transform_6(%arg0: i32) -> (i32, i32) {
    %c0_i32 = arith.constant 0 : i32
    %c0_i32_0 = arith.constant 0 : i32
    %c0_i32_1 = arith.constant 0 : i32
    return %c0_i32, %c0_i32_0 : i32, i32
  }
  func.func @transform_7(%arg0: i32) -> (i32, i32) {
    %c0_i32 = arith.constant 0 : i32
    %c0_i32_0 = arith.constant 0 : i32
    %c0_i32_1 = arith.constant 0 : i32
    return %c0_i32, %c0_i32_0 : i32, i32
  }
  func.func @transform_8(%arg0: i32) -> (i32, i32) {
    %c0_i32 = arith.constant 0 : i32
    %c0_i32_0 = arith.constant 0 : i32
    %c0_i32_1 = arith.constant 0 : i32
    return %c0_i32, %c0_i32_0 : i32, i32
  }
  func.func @transform_9(%arg0: i32) -> (i32, i32) {
    %c0_i32 = arith.constant 0 : i32
    %c0_i32_0 = arith.constant 0 : i32
    %c0_i32_1 = arith.constant 0 : i32
    return %c0_i32, %c0_i32_0 : i32, i32
  }
  func.func @transform_10(%arg0: i32) -> (i32, i32) {
    %c0_i32 = arith.constant 0 : i32
    %c0_i32_0 = arith.constant 0 : i32
    %c0_i32_1 = arith.constant 0 : i32
    return %c0_i32, %c0_i32_0 : i32, i32
  }
  func.func @transform_11(%arg0: i32) -> (i32, i32) {
    %c0_i32 = arith.constant 0 : i32
    %c0_i32_0 = arith.constant 0 : i32
    %c0_i32_1 = arith.constant 0 : i32
    return %c0_i32, %c0_i32_0 : i32, i32
  }
  func.func @transform_12(%arg0: i32) -> (i32, i32) {
    %c0_i32 = arith.constant 0 : i32
    %c0_i32_0 = arith.constant 0 : i32
    %c0_i32_1 = arith.constant 0 : i32
    return %c0_i32, %c0_i32_0 : i32, i32
  }
  func.func @transform_13(%arg0: i32) -> (i32, i32, i32) {
    %c0_i32 = arith.constant 0 : i32
    %c0_i32_0 = arith.constant 0 : i32
    %c0_i32_1 = arith.constant 0 : i32
    return %arg0, %c0_i32, %c0_i32_0 : i32, i32, i32
  }
}

</mosaic_0001>

<bundles_post_ra>
// kernel: tpu_custom_call.1
= control target key start
LH: loop header
LB: loop body
LE: loop exit
PB: predicated region body
PF: predicated region fallthrough
CT: control target
= control target key end

     0   :  { %18 = vsyncpa [#allocation4], 0  ;;  %s3260_s0 = inlined_call_operand.vmem [shape: f32[2,32,128], index: 0, kind: input, shape index: {}]   ;;  %s3261_s1 = inlined_call_operand.vmem [shape: f32[2,32,128], index: 1, kind: input, shape index: {}]   ;;  %s3262_s2 = inlined_call_operand.vmem [shape: bf16[32,32], index: 2, kind: input, shape index: {}]   ;;  %s3263_s3 = inlined_call_operand.vmem [shape: f32[32,1], index: 3, kind: input, shape index: {}]   ;;  %s3264_s4 = inlined_call_operand.vmem [shape: bf16[64,32], index: 4, kind: input, shape index: {}]   ;;  %s3265_s5 = inlined_call_operand.vmem [shape: f32[64,1], index: 5, kind: input, shape index: {}]   ;;  %s3266_s6 = inlined_call_operand.vmem [shape: bf16[32,32], index: 6, kind: input, shape index: {}]   ;;  %s3267_s7 = inlined_call_operand.vmem [shape: f32[32,1], index: 7, kind: input, shape index: {}]   ;;  %s3268_s8 = inlined_call_operand.vmem [shape: bf16[64,32], index: 8, kind: input, shape index: {}]   ;;  %s3269_s9 = inlined_call_operand.vmem [shape: bf16[64,32], index: 9, kind: input, shape index: {}]   ;;  %s3270_s10 = inlined_call_operand.vmem [shape: f32[64,1], index: 10, kind: input, shape index: {}]   ;;  %s3271_s11 = inlined_call_operand.vmem [shape: bf16[32,64], index: 11, kind: input, shape index: {}]   ;;  %s3272_s12 = inlined_call_operand.vmem [shape: f32[32,1], index: 12, kind: input, shape index: {}]   ;;  %s3273_s13 = inlined_call_operand.hbm [shape: f32[2,32,128], index: 13, kind: output, shape index: {}]  }
   0x1   :  { %20 = vsyncpa [#allocation4 + $0x1], 0  ;;  %s2648_s25 = smov 0   ;;  %s2650_s26 = smov 0  }
   0x2   :  { %s2652_s27 = smov 0   ;;  %s2654_s28 = smov 0  }
   0x3 LB: > { %3278 = sst [smem:[#allocation6_spill]] %s2569_s27  ;;  %s2669_s29 = sadd.s32 4294967295, %s2573_s28   ;;  %s2573_s28 = sphi %s2654_s28, %s3295_s28   ;;  %s2569_s27 = sphi %s2652_s27, %s3297_s27   ;;  %s2565_s26 = sphi %s2650_s26, %s3299_s26   ;;  %s2561_s25 = sphi %s2648_s25, %s3298_s25  }
   0x4   : > { %s2244_s30 = sadd.s32 4294967294, %s2573_s28   ;;  %s2673_s14 = sadd.s32 1, %s2573_s28  }
   0x5   : > { %3279 = sst [smem:[#allocation7_spill]] %s2673_s14  ;;  %s316_s15 = sadd.s32 1, %s2569_s27 }
   0x6   : > { %s313_s16 = ssub.s32 %s2573_s28, %s2673_s14  ;;  %p326_p0 = scmp.ne.s32.totalorder %s2569_s27, %s2565_s26 }
   0x7   : > { %p314_p1 = scmp.eq.s32.totalorder %s313_s16, 0  ;;  %p327_p2 = scmp.eq.s32.totalorder %s2669_s29, 1 }
   0x8   : > { %p332_p3 = scmp.ne.s32.totalorder %s2565_s26, %s2561_s25  ;;  %p333_p4 = scmp.eq.s32.totalorder %s2244_s30, 1 }
   0x9   : > { %s2684_s17 = scalar_select %p314_p1, %s2569_s27, %s316_s15  }
   0xa   : > { %p2686_p5 = por %p327_p2, %p326_p0  ;;  %p2690_p6 = por %p333_p4, %p332_p3 }
   0xb   : > { %3280 = sst [smem:[#allocation8_spill]] %s2684_s17  ;;  %p2247_p7 = scmp.ge.s32.totalorder %s2573_s28, 1 }
   0xc   : > { %s3282_s19 = scalar_select %p2690_p6, 1, 0 }
   0xd   : > { %p400_p8 = scmp.lt.s32.totalorder %s2573_s28, 3 }
   0xe   : > { %3283 = sst [smem:[#allocation9_spill]] %s3282_s19 }
   0xf   : > { %p401_p9 = pnand %p2247_p7, %p400_p8 }
  0x10   : > { %p449_p10 = scmp.lt.s32.totalorder (!%p401_p9), %s2669_s29, 1  ;;  %s446_s14 = sand.u32 (!%p401_p9), 1, %s2565_s26  }
  0x11   : > { %404 = sbr.rel (%p401_p9) target bundleno = 1657 (0x679), region = 72  ;;  %s2248_s17 = sshll.u32 (!%p401_p9), %s446_s14, 5 }
  0x12   : > { %s2400_s19 = sshll.u32 (!%p401_p9), %s2669_s29, 5  ;;  %s2155_s21 = scalar_lea.sflag (!%p401_p9), [#allocation4], %s446_s14 }
  0x13   : > { %s2166_s15 = scalar_lea.hbm (!%p401_p9), %s3273_s13, %s2400_s19  ;;  %s2531_s19 = scalar_lea.hbm (!%p401_p9), %s3273_s13, 64 }
  0x16   : > { %v544_v0 = vld [vmem:[%s3265_s5] sm:$0xff]  ;;  %v2575_v1 = vmov 0   ;;  %s450_s22 = scalar_select %p449_p10, %s2669_s29, 1  ;;  %v545_v2 = vld [vmem:[%s3265_s5 + $0x8] sm:$0xff]  ;;  %v546_v14 = vld [vmem:[%s3265_s5 + $0x10] sm:$0xff]  ;;  %vm510_vm0 = vcmask 261120  }
  0x17   : > { %2443 = vset.pattern.permute.xlu0 %v2575_v1  ;;  %2444 = vset.pattern.permute.xlu1 %v2575_v1  ;;  %v476_v3 = vld [vmem:[%s3263_s3] sm:$0xff]  ;;  %v478_v19 = vld [vmem:[%s3263_s3 + $0x10] sm:$0xff]  ;;  %v2383_v21 = vld [vmem:[%s3262_s2 + $0x8] sm:$0xff]  ;;  %vm742_vm1 = vcmask 1043456   ;;  %vm717_vm2 = vcmask 64512  }
  0x18   : > { %554 = vperm.xlu0 %2443, %v544_v0   ;;  %2445 = vset.pattern.permute.xlu2 %v2575_v1  ;;  %s2380_s30 = sshll.u32 %s450_s22, 5  ;;  %v2382_v17 = vld [vmem:[%s3262_s2] sm:$0xff]  ;;  %v2385_v22 = vld [vmem:[%s3264_s4 + $0x8] sm:$0xff]  ;;  %v547_v24 = vld [vmem:[%s3265_s5 + $0x18] sm:$0xff] }
  0x19   : > { %559 = vperm.xlu1 %2444, %v545_v2   ;;  %s453_s20 = scalar_lea.vmem %s3260_s0, %s2380_s30  ;;  %s458_s27 = scalar_lea.vmem %s3261_s1, %s2380_s30  ;;  %v2384_v18 = vld [vmem:[%s3264_s4] sm:$0xff]  ;;  %v549_v23 = vld [vmem:[%s3265_s5 + $0x28] sm:$0xff]  ;;  %v2386_v25 = vld [vmem:[%s3264_s4 + $0x10] sm:$0xff] }
  0x1a   : > { %v462_v4 = vld [vmem:[%s453_s20 + $0x10] sm:$0xff]  ;;  %v463_v5 = vld [vmem:[%s453_s20 + $0x18] sm:$0xff]  ;;  %v460_v9 = vld [vmem:[%s453_s20] sm:$0xff] }
  0x1b   : > { %v468_v6 = vld [vmem:[%s458_s27 + $0x10] sm:$0xff]  ;;  %v2713_v7 = vpack.c.bf16 %v463_v5, %v462_v4  ;;  %v469_v8 = vld [vmem:[%s458_s27 + $0x18] sm:$0xff]  ;;  %v461_v10 = vld [vmem:[%s453_s20 + $0x8] sm:$0xff]  ;;  %s2169_s20 = sshll.u32 %s2166_s15, 4  ;;  %s2170_s20 = int_to_ptr.hbm [resolvable:$true] %s2169_s20 }
  0x1c   : > { %v471_v11 = vpack.c.bf16 %v469_v8, %v468_v6  ;;  %v466_v12 = vld [vmem:[%s458_s27] sm:$0xff]  ;;  %v467_v13 = vld [vmem:[%s458_s27 + $0x8] sm:$0xff]  ;;  %v2719_v15 = vpack.c.bf16 %v461_v10, %v460_v9  ;;  %v479_v26 = vld [vmem:[%s3263_s3 + $0x18] sm:$0xff]  ;;  %s448_s27 = scalar_lea.vmem [#allocation3], %s2248_s17  ;;  %s2525_s22 = sshra.s32 %s2170_s20, 4  ;;  %s2526_s22 = int_to_ptr.hbm [resolvable:$true] %s2525_s22 }
  0x1d   : > { %523 = vmatpush.bf16.msra.mxu0 %v2713_v7  ;;  %v470_v16 = vpack.c.bf16 %v467_v13, %v466_v12  ;;  %v548_v20 = vld [vmem:[%s3265_s5 + $0x20] sm:$0xff]  ;;  %v477_v27 = vld [vmem:[%s3263_s3 + $0x8] sm:$0xff]  ;;  %v2387_v61 = vld [vmem:[%s3264_s4 + $0x18] sm:$0xff]  ;;  %s2167_s16 = sshll.u32 %s448_s27, 4  ;;  %s2527_s23 = scalar_lea.hbm %s2526_s22, 32  ;;  %s2168_s16 = int_to_ptr.vmem [resolvable:$true] %s2167_s16 }
  0x1e   : > { %630 = vmatpush.bf16.msra.mxu1 %v471_v11  ;;  %487 = vperm.xlu2 %2445, %v477_v27   ;;  %v551_v5 = vld [vmem:[%s3265_s5 + $0x38] sm:$0xff]  ;;  %v550_v8 = vld [vmem:[%s3265_s5 + $0x30] sm:$0xff]  ;;  %v1633_v9 = vld [vmem:[%s3267_s7] sm:$0xff]  ;;  %p2528_p11 = scmp.ne.s32.totalorder %s2526_s22, %s2527_s23  ;;  %p2532_p0 = scmp.lt.s32.totalorder %s2526_s22, %s3273_s13 }
  0x1f   : > { %v1636_v11 = vld [vmem:[%s3267_s7 + $0x18] sm:$0xff]  ;;  %v1838_v12 = vld [vmem:[%s3270_s10 + $0x30] sm:$0xff]  ;;  %p2533_p1 = scmp.lt.s32.totalorder %s2531_s19, %s2527_s23 }
  0x20   : > { %482 = vperm.xlu0 %2443, %v476_v3   ;;  %v1835_v27 = vld [vmem:[%s3270_s10 + $0x18] sm:$0xff]  ;;  %p2529_p12 = pnand %p2528_p11, %p2686_p5 }
  0x21   : > { %564 = vperm.xlu1 %2444, %v546_v14   ;;  %524 = vmatpush.bf16.msra.mxu0 %v2719_v15  ;;  %v1634_v14 = vld [vmem:[%s3267_s7 + $0x8] sm:$0xff]  ;;  %p2534_p2 = por %p2533_p1, %p2532_p0 }
  0x22   : > { %631 = vmatpush.bf16.msra.mxu1 %v470_v16  ;;  %v1836_v16 = vld [vmem:[%s3270_s10 + $0x20] sm:$0xff]  ;;  %p2530_p13 = pneg %p2529_p12 }
  0x24   : > { %2261 = vmatmul.msk.bf16.vlgmr.msra.gmra.mxu0 %vm510_vm0, %v2382_v17  ;;  %p2535_p3 = pnand %p2534_p2, %p2530_p13 }
  0x25   : > { %2279 = vmatmul.msk.bf16.vlgmr.msra.gmra.mxu1 %vm510_vm0, %v2384_v18 }
  0x28   : > { %492 = vperm.xlu0 %2443, %v478_v19   ;;  %v1635_v19 = vld [vmem:[%s3267_s7 + $0x10] sm:$0xff] }
  0x30   : > { %574 = vperm.xlu0 %2443, %v548_v20   ;;  %v1839_v20 = vld [vmem:[%s3270_s10 + $0x38] sm:$0xff] }
  0x34   : > { %2262 = vmatmul.msk.bf16.gmra.mxu0 %vm510_vm0, %v2383_v21  ;;  %v1834_v21 = vld [vmem:[%s3270_s10 + $0x10] sm:$0xff] }
  0x35   : > { %2280 = vmatmul.msk.bf16.gmra.mxu1 %vm510_vm0, %v2385_v22 }
  0x38   : > { %579 = vperm.xlu0 %2443, %v549_v23   ;;  %v1837_v23 = vld [vmem:[%s3270_s10 + $0x28] sm:$0xff] }
  0x40   : > { %569 = vperm.xlu0 %2443, %v547_v24   ;;  %v1832_v24 = vld [vmem:[%s3270_s10] sm:$0xff] }
  0x45   : > { %2281 = vmatmul.msk.bf16.gmra.mxu1 %vm510_vm0, %v2386_v25 }
  0x48   : > { %497 = vperm.xlu0 %2443, %v479_v26  }
  0x55   : > { %2282 = vmatmul.msk.bf16.gmra.mxu1 %vm510_vm0, %v2387_v61 }
  0x78   : > { %v488_v57 = vpop.permute.xlu2 %487 }
  0x8a   : > { %v555_v28 = vpop.permute.xlu0 %554 }
  0x8b   : > { %v560_v37 = vpop.permute.xlu1 %559 }
  0x92   : > { %v483_v29 = vpop.permute.xlu0 %482 }
  0x93   : > { %v565_v46 = vpop.permute.xlu1 %564 }
  0x9a   : > { %v493_v30 = vpop.permute.xlu0 %492 }
  0xa1   : > { %v526_v31 = vpop.f32.mrf.mxu0 }
  0xa2   : > { %v527_v32 = vadd.f32 %v526_v31, %v483_v29  ;;  %v633_v33 = vpop.f32.mrf.mxu1  ;;  %v2760_v35 = vpop.permute.xlu0 %574  ;;  %v1833_v29 = vld [vmem:[%s3270_s10 + $0x8] sm:$0xff] }
  0xa3   : > { %v634_v38 = vadd.f32 %v633_v33, %v555_v28 }
  0xa4   : > { %v653_v34 = vpack.c.bf16 %v527_v32, %v527_v32 }
  0xa5   : > { %v657_v42 = vpack.c.bf16 %v634_v38, %v634_v38 }
  0xa6   : > { %v744_v36 = vsel %vm742_vm1, %v653_v34, 0 }
  0xa7   : > { %753 = vmatpush.bf16.msra.mxu2 %v744_v36 }
  0xa9   : > { %v528_v39 = vpop.f32.mrf.mxu0 }
  0xaa   : > { %v635_v40 = vpop.f32.mrf.mxu1  ;;  %v2763_v44 = vpop.permute.xlu0 %579  ;;  %v529_v58 = vadd.f32 %v528_v39, %v488_v57 }
  0xab   : > { %v636_v41 = vadd.f32 %v635_v40, %v560_v37 }
  0xac   : > { %v654_v59 = vpack.c.bf16 %v529_v58, %v529_v58 }
  0xad   : > { %v658_v43 = vpack.c.bf16 %v636_v41, %v636_v41 }
  0xae   : > { %v998_v60 = vsel %vm742_vm1, %v654_v59, 0 }
  0xaf   : > { %2446 = vxpose.binary.xlu2.c.b16.start.end [1/2] (short) %v658_v43, %v657_v42, 128 }
  0xb0   : > { %1007 = vmatpush.bf16.msrb.mxu0 %v998_v60 }
  0xb1   : > { %v531_v45 = vpop.f32.mrf.mxu0 }
  0xb2   : > { %v532_v47 = vadd.f32 %v531_v45, %v493_v30  ;;  %v638_v48 = vpop.f32.mrf.mxu1  ;;  %v570_v53 = vpop.permute.xlu0 %569 }
  0xb3   : > { %v639_v49 = vadd.f32 %v638_v48, %v565_v46 }
  0xb4   : > { %v655_v50 = vpack.c.bf16 %v532_v47, %v532_v47 }
  0xb5   : > { %v659_v51 = vpack.c.bf16 %v639_v49, %v639_v49 }
  0xb6   : > { %v1220_v52 = vsel %vm742_vm1, %v655_v50, 0 }
  0xb7   : > { %1179 = vxpose.xlu1.c.b16.start.end [1/1] (short) %v659_v51, 128  ;;  %1229 = vmatpush.bf16.msrb.mxu1 %v1220_v52 }
  0xb9   : > { %v2840_v39 = vpop.f32.mrf.mxu0 }
  0xba   : > { %v640_v54 = vpop.f32.mrf.mxu1 }
  0xbb   : > { %v641_v55 = vadd.f32 %v640_v54, %v570_v53 }
  0xbd   : > { %v660_v56 = vpack.c.bf16 %v641_v55, %v641_v55 }
  0xbf   : > { %1401 = vxpose.xlu0.c.b16.start.end [1/1] (short) %v660_v56, 128 }
  0xc2   : > { %v2831_v32 = vpop.f32.mrf.mxu1 }
  0xca   : > { %v2834_v34 = vpop.f32.mrf.mxu1 }
  0xd2   : > { %v2838_v38 = vpop.f32.mrf.mxu1 }
  0xda   : > { %v2846_v42 = vpop.f32.mrf.mxu1 }
 0x150   : > { %v2447_v62 = vpop.trf.xlu2 }
 0x151   : > { %2283 = vmatmul.msk.bf16.vlgmr.msra.gmra.mxu2 %vm717_vm2, %v2447_v62 }
 0x158   : > { %v2448_v63 = vpop.trf.xlu2 }
 0x159   : > { %2291 = vmatmul.msk.bf16.vlgmr.msrb.gmra.mxu0 %vm717_vm2, %v2448_v63 }
 0x160   : > { %v2449_v0 = vpop.trf.xlu2 }
 0x161   : > { %2284 = vmatmul.msk.bf16.gmra.mxu2 %vm717_vm2, %v2449_v0 }
 0x163   : > { %v1187_v1 = vpop.trf.xlu1 }
 0x164   : > { %2299 = vmatmul.msk.bf16.vlgmr.msrb.gmra.mxu1 %vm717_vm2, %v1187_v1 }
 0x168   : > { %v2450_v2 = vpop.trf.xlu2 }
 0x169   : > { %2292 = vmatmul.msk.bf16.gmra.mxu0 %vm717_vm2, %v2450_v2 }
 0x170   : > { %v2451_v3 = vpop.trf.xlu2 }
 0x171   : > { %2285 = vmatmul.msk.bf16.gmra.mxu2 %vm717_vm2, %v2451_v3 }
 0x173   : > { %v1188_v18 = vpop.trf.xlu1 }
 0x174   : > { %2300 = vmatmul.msk.bf16.gmra.mxu1 %vm717_vm2, %v1188_v18 }
 0x178   : > { %v2452_v4 = vpop.trf.xlu2 }
 0x179   : > { %2293 = vmatmul.msk.bf16.gmra.mxu0 %vm717_vm2, %v2452_v4 }
 0x180   : > { %v2453_v6 = vpop.trf.xlu2 }
 0x181   : > { %589 = vperm.xlu1 %2444, %v551_v5   ;;  %2286 = vmatmul.msk.bf16.gmra.mxu2 %vm717_vm2, %v2453_v6 }
 0x183   : > { %v1189_v26 = vpop.trf.xlu1 }
 0x184   : > { %2301 = vmatmul.msk.bf16.gmra.mxu1 %vm717_vm2, %v1189_v26 }
 0x188   : > { %584 = vperm.xlu2 %2445, %v550_v8   ;;  %v2454_v10 = vpop.trf.xlu2 }
 0x189   : > { %1639 = vperm.xlu1 %2444, %v1633_v9   ;;  %2294 = vmatmul.msk.bf16.gmra.mxu0 %vm717_vm2, %v2454_v10 }
 0x190   : > { %1654 = vperm.xlu2 %2445, %v1636_v11   ;;  %v2455_v13 = vpop.trf.xlu2 }
 0x191   : > { %1872 = vperm.xlu1 %2444, %v1838_v12   ;;  %2287 = vmatmul.msk.bf16.gmra.mxu2 %vm717_vm2, %v2455_v13 }
 0x193   : > { %v1190_v31 = vpop.trf.xlu1 }
 0x194   : > { %2302 = vmatmul.msk.bf16.gmra.mxu1 %vm717_vm2, %v1190_v31 }
 0x198   : > { %1644 = vperm.xlu2 %2445, %v1634_v14   ;;  %v2456_v17 = vpop.trf.xlu2 }
 0x199   : > { %1862 = vperm.xlu1 %2444, %v1836_v16   ;;  %2295 = vmatmul.msk.bf16.gmra.mxu0 %vm717_vm2, %v2456_v17 }
 0x19d   : > { %1649 = vperm.xlu0 %2443, %v1635_v19  }
 0x1a0   : > { %1877 = vperm.xlu2 %2445, %v1839_v20   ;;  %v2457_v22 = vpop.trf.xlu2 }
 0x1a1   : > { %1852 = vperm.xlu1 %2444, %v1834_v21   ;;  %2288 = vmatmul.msk.bf16.gmra.mxu2 %vm717_vm2, %v2457_v22 }
 0x1a3   : > { %v1191_v37 = vpop.trf.xlu1 }
 0x1a4   : > { %2303 = vmatmul.msk.bf16.gmra.mxu1 %vm717_vm2, %v1191_v37 }
 0x1a8   : > { %1867 = vperm.xlu2 %2445, %v1837_v23   ;;  %v2458_v25 = vpop.trf.xlu2 }
 0x1a9   : > { %1842 = vperm.xlu1 %2444, %v1832_v24   ;;  %2296 = vmatmul.msk.bf16.gmra.mxu0 %vm717_vm2, %v2458_v25 }
 0x1b0   : > { %1857 = vperm.xlu2 %2445, %v1835_v27   ;;  %v2459_v28 = vpop.trf.xlu2 }
 0x1b1   : > { %2289 = vmatmul.msk.bf16.gmra.mxu2 %vm717_vm2, %v2459_v28 }
 0x1b3   : > { %v1192_v46 = vpop.trf.xlu1 }
 0x1b4   : > { %2304 = vmatmul.msk.bf16.gmra.mxu1 %vm717_vm2, %v1192_v46 }
 0x1b8   : > { %1847 = vperm.xlu2 %2445, %v1833_v29   ;;  %v2460_v30 = vpop.trf.xlu2 }
 0x1b9   : > { %2297 = vmatmul.msk.bf16.gmra.mxu0 %vm717_vm2, %v2460_v30 }
 0x1c0   : > { %v2461_v33 = vpop.trf.xlu2 }
 0x1c1   : > { %2290 = vmatmul.msk.bf16.gmra.mxu2 %vm717_vm2, %v2461_v33 }
 0x1c3   : > { %v1193_v8 = vpop.trf.xlu1 }
 0x1c4   : > { %2305 = vmatmul.msk.bf16.gmra.mxu1 %vm717_vm2, %v1193_v8 }
 0x1c8   : > { %v2462_v36 = vpop.trf.xlu2 }
 0x1c9   : > { %2298 = vmatmul.msk.bf16.gmra.mxu0 %vm717_vm2, %v2462_v36 }
 0x1d4   : > { %v2842_v40 = vpop.f32.mrf.mxu2 }
 0x1d5   : > { %v843_v43 = vmax.f32 %v2842_v40, -1e+30 }
 0x1d6   : > { %v2844_v41 = vpop.f32.mrf.mxu0 }
 0x1d7   : > { %v1065_v45 = vmax.f32 %v2844_v41, -1e+30  ;;  %v847_v47 = vmax.f32 %v843_v43, -1e+30 }
 0x1d9   : > { %v1069_v49 = vmax.f32 %v1065_v45, -1e+30  ;;  %v851_v54 = vmax.f32 %v847_v47, -1e+30 }
 0x1db   : > { %v1073_v55 = vmax.f32 %v1069_v49, -1e+30 }
 0x1dc   : > { %v757_v48 = vpop.f32.mrf.mxu2 }
 0x1dd   : > { %v844_v50 = vmax.f32 %v757_v48, -1e+30 }
 0x1de   : > { %v1011_v51 = vpop.f32.mrf.mxu0 }
 0x1df   : > { %v848_v52 = vmax.f32 %v844_v50, -1e+30  ;;  %v1066_v53 = vmax.f32 %v1011_v51, -1e+30 }
 0x1e1   : > { %v852_v56 = vmax.f32 %v848_v52, -1e+30  ;;  %v1070_v57 = vmax.f32 %v1066_v53, -1e+30  ;;  %v2851_v58 = vpop.f32.mrf.mxu1 }
 0x1e2   : > { %v1287_v61 = vmax.f32 %v2851_v58, -1e+30 }
 0x1e3   : > { %v855_v59 = vmax.f32 %v851_v54, %v852_v56  ;;  %v1074_v60 = vmax.f32 %v1070_v57, -1e+30 }
 0x1e4   : > { %v760_v62 = vpop.f32.mrf.mxu2  ;;  %v1291_v4 = vmax.f32 %v1287_v61, -1e+30 }
 0x1e5   : > { %v857_v63 = vmax.f32 %v855_v59, -1e+30  ;;  %v1077_v0 = vmax.f32 %v1073_v55, %v1074_v60  ;;  %v1194_v55 = vpop.trf.xlu1 }
 0x1e6   : > { %v1014_v1 = vpop.f32.mrf.mxu0  ;;  %v1295_v13 = vmax.f32 %v1291_v4, -1e+30  ;;  %2306 = vmatmul.msk.bf16.gmra.mxu1 %vm717_vm2, %v1194_v55 }
 0x1e7   : > { %v858_v2 = vrot.slane %v857_v63, 4  ;;  %v1079_v3 = vmax.f32 %v1077_v0, -1e+30 }
 0x1e9   : > { %v859_v5 = vmax.f32 %v857_v63, %v858_v2  ;;  %v1080_v6 = vrot.slane %v1079_v3, 4  ;;  %v1233_v9 = vpop.f32.mrf.mxu1 }
 0x1ea   : > { %v1288_v10 = vmax.f32 %v1233_v9, -1e+30 }
 0x1eb   : > { %v860_v11 = vrot.slane %v859_v5, 2  ;;  %v1081_v12 = vmax.f32 %v1079_v3, %v1080_v6 }
 0x1ec   : > { %v1292_v14 = vmax.f32 %v1288_v10, -1e+30  ;;  %v762_v16 = vpop.f32.mrf.mxu2 }
 0x1ed   : > { %v861_v17 = vmax.f32 %v859_v5, %v860_v11  ;;  %v1082_v18 = vrot.slane %v1081_v12, 2 }
 0x1ee   : > { %v1296_v19 = vmax.f32 %v1292_v14, -1e+30  ;;  %v1016_v20 = vpop.f32.mrf.mxu0 }
 0x1ef   : > { %v862_v21 = vrot.slane %v861_v17, 1  ;;  %v1083_v22 = vmax.f32 %v1081_v12, %v1082_v18 }
 0x1f0   : > { %v1299_v23 = vmax.f32 %v1295_v13, %v1296_v19 }
 0x1f1   : > { %v863_v24 = vmax.f32 %v861_v17, %v862_v21  ;;  %v1084_v25 = vrot.slane %v1083_v22, 1 }
 0x1f2   : > { %v1301_v26 = vmax.f32 %v1299_v23, -1e+30 }
 0x1f3   : > { %v865_v27 = vsub.f32 %v757_v48, %v863_v24  ;;  %v866_v28 = vsub.f32 -1e+30, %v863_v24  ;;  %v1085_v29 = vmax.f32 %v1083_v22, %v1084_v25  ;;  %v864_v30 = vsub.f32 %v2842_v40, %v863_v24 }
 0x1f4   : > { %v1302_v31 = vrot.slane %v1301_v26, 4  ;;  %v765_v33 = vpop.f32.mrf.mxu2 }
 0x1f5   : > { %v882_v36 = vmul.f32 1.442695, %v865_v27  ;;  %v884_v37 = vmul.f32 1.442695, %v866_v28  ;;  %v1087_v43 = vsub.f32 %v1011_v51, %v1085_v29  ;;  %v1088_v45 = vsub.f32 -1e+30, %v1085_v29 }
 0x1f6   : > { %v1303_v46 = vmax.f32 %v1301_v26, %v1302_v31  ;;  %v1086_v47 = vsub.f32 %v2844_v41, %v1085_v29  ;;  %v1019_v49 = vpop.f32.mrf.mxu0  ;;  %v880_v53 = vmul.f32 1.442695, %v864_v30 }
 0x1f7   : > { %2463 = vpow2.f32 %v882_v36  ;;  %v1104_v50 = vmul.f32 1.442695, %v1087_v43  ;;  %v1106_v52 = vmul.f32 1.442695, %v1088_v45 }
 0x1f8   : > { %2465 = vpow2.f32 %v884_v37  ;;  %v1304_v48 = vrot.slane %v1303_v46, 2  ;;  %v1102_v54 = vmul.f32 1.442695, %v1086_v47 }
 0x1f9   : > { %2467 = vpow2.f32 %v1104_v50 }
 0x1fa   : > { %2469 = vpow2.f32 %v1106_v52  ;;  %v1305_v40 = vmax.f32 %v1303_v46, %v1304_v48 }
 0x1fb   : > { %2471 = vpow2.f32 %v880_v53 }
 0x1fc   : > { %v1306_v51 = vrot.slane %v1305_v40, 1  ;;  %2473 = vpow2.f32 %v1102_v54  ;;  %v767_v56 = vpop.f32.mrf.mxu2 }
 0x1fd   : > { %v2858_v57 = vpop.eup %2463 }
 0x1fe   : > { %v2860_v41 = vpop.eup %2465  ;;  %v1307_v59 = vmax.f32 %v1305_v40, %v1306_v51  ;;  %v1021_v60 = vpop.f32.mrf.mxu0 }
 0x1ff   : > { %v2862_v61 = vpop.eup %2467  ;;  %v935_v62 = vpack.c.bf16 %v2860_v41, %v2860_v41  ;;  %v1236_v51 = vpop.f32.mrf.mxu1 }
 0x200   : > { %v2866_v63 = vpop.eup %2469  ;;  %v1308_v0 = vsub.f32 %v2851_v58, %v1307_v59  ;;  %v1309_v1 = vsub.f32 %v1233_v9, %v1307_v59  ;;  %v1310_v2 = vsub.f32 -1e+30, %v1307_v59 }
 0x201   : > { %v2869_v3 = vpop.eup %2471  ;;  %942 = vmatpush.bf16.msra.mxu3 %v935_v62 }
 0x202   : > { %v2871_v4 = vpop.eup %2473  ;;  %v1324_v5 = vmul.f32 1.442695, %v1308_v0  ;;  %v1326_v6 = vmul.f32 1.442695, %v1309_v1  ;;  %v1328_v8 = vmul.f32 1.442695, %v1310_v2  ;;  %v912_v10 = vadd.f32 %v2869_v3, %v2858_v57 }
 0x203   : > { %v1134_v11 = vadd.f32 %v2871_v4, %v2862_v61  ;;  %v1156_v12 = vpack.c.bf16 %v2862_v61, %v2871_v4  ;;  %v644_v0 = vadd.f32 %v2831_v32, %v2760_v35  ;;  %v585_v4 = vpop.permute.xlu2 %584 }
 0x204   : > { %2475 = vpow2.f32 %v1324_v5  ;;  %v913_v58 = vadd.f32 %v2860_v41, %v912_v10  ;;  %v770_v9 = vpop.f32.mrf.mxu2  ;;  %v934_v5 = vpack.c.bf16 %v2858_v57, %v2869_v3  ;;  %v1157_v10 = vpack.c.bf16 %v2866_v63, %v2866_v63 }
 0x205   : > { %2477 = vpow2.f32 %v1326_v6  ;;  %943 = vmatpush.bf16.msra.mxu3 %v935_v62  ;;  %v1135_v13 = vadd.f32 %v2866_v63, %v1134_v11  ;;  %v661_v32 = vpack.c.bf16 %v644_v0, %v644_v0 }
 0x206   : > { %2479 = vpow2.f32 %v1328_v8  ;;  %v914_v14 = vadd.f32 %v2860_v41, %v913_v58  ;;  %v1024_v16 = vpop.f32.mrf.mxu0 }
 0x207   : > { %v1136_v17 = vadd.f32 %v2866_v63, %v1135_v13  ;;  %v1238_v13 = vpop.f32.mrf.mxu1 }
 0x208   : > { %v915_v18 = vadd.f32 %v2860_v41, %v914_v14 }
 0x209   : > { %944 = vmatpush.bf16.msra.mxu3 %v935_v62  ;;  %v1137_v19 = vadd.f32 %v2866_v63, %v1136_v17 }
 0x20a   : > { %v2885_v20 = vpop.eup %2475  ;;  %v916_v21 = vadd.f32 %v2860_v41, %v915_v18 }
 0x20b   : > { %v2888_v22 = vpop.eup %2477  ;;  %v1138_v23 = vadd.f32 %v2866_v63, %v1137_v19 }
 0x20c   : > { %v2891_v24 = vpop.eup %2479  ;;  %v1356_v25 = vadd.f32 %v2888_v22, %v2885_v20  ;;  %v917_v26 = vadd.f32 %v2860_v41, %v916_v21  ;;  %v772_v27 = vpop.f32.mrf.mxu2 }
 0x20d   : > { %945 = vmatpush.bf16.msra.mxu3 %v935_v62  ;;  %v1139_v28 = vadd.f32 %v2866_v63, %v1138_v23 }
 0x20e   : > { %v1357_v29 = vadd.f32 %v2891_v24, %v1356_v25  ;;  %v918_v30 = vadd.f32 %v2860_v41, %v917_v26  ;;  %v1026_v31 = vpop.f32.mrf.mxu0 }
 0x20f   : > { %v1140_v33 = vadd.f32 %v2866_v63, %v1139_v28  ;;  %v1241_v21 = vpop.f32.mrf.mxu1  ;;  %v1379_v31 = vpack.c.bf16 %v2891_v24, %v2891_v24 }
 0x210   : > { %v1358_v36 = vadd.f32 %v2891_v24, %v1357_v29  ;;  %v919_v37 = vadd.f32 %v2860_v41, %v918_v30  ;;  %v646_v29 = vadd.f32 %v2834_v34, %v2763_v44  ;;  %v498_v34 = vpop.permute.xlu0 %497 }
 0x211   : > { %946 = vmatpush.bf16.msra.mxu3 %v935_v62  ;;  %v1141_v43 = vadd.f32 %v2866_v63, %v1140_v33 }
 0x212   : > { %v1359_v45 = vadd.f32 %v2891_v24, %v1358_v36  ;;  %v920_v46 = vadd.f32 %v2860_v41, %v919_v37  ;;  %v662_v33 = vpack.c.bf16 %v646_v29, %v646_v29 }
 0x213   : > { %v1142_v47 = vadd.f32 %v2866_v63, %v1141_v43 }
 0x214   : > { %v1360_v49 = vadd.f32 %v2891_v24, %v1359_v45  ;;  %v775_v50 = vpop.f32.mrf.mxu2  ;;  %v921_v52 = vadd.f32 %v2860_v41, %v920_v46 }
 0x215   : > { %947 = vmatpush.bf16.msra.mxu3 %v935_v62  ;;  %v1143_v53 = vadd.f32 %v2866_v63, %v1142_v47  ;;  %v649_v50 = vadd.f32 %v2838_v38, %v585_v4 }
 0x216   : > { %v1361_v48 = vadd.f32 %v2891_v24, %v1360_v49  ;;  %v1029_v54 = vpop.f32.mrf.mxu0  ;;  %v922_v55 = vadd.f32 %v2860_v41, %v921_v52  ;;  %v534_v49 = vadd.f32 %v2840_v39, %v498_v34  ;;  %v1378_v52 = vpack.c.bf16 %v2888_v22, %v2885_v20 }
 0x217   : > { %v1144_v40 = vadd.f32 %v2866_v63, %v1143_v53  ;;  %v1243_v26 = vpop.f32.mrf.mxu1  ;;  %v663_v54 = vpack.c.bf16 %v649_v50, %v649_v50 }
 0x218   : > { %v1362_v56 = vadd.f32 %v2891_v24, %v1361_v48  ;;  %v923_v59 = vadd.f32 %v2860_v41, %v922_v55  ;;  %v1409_v39 = vpop.trf.xlu0 }
 0x219   : > { %948 = vmatpush.bf16.msra.mxu3 %v935_v62  ;;  %v1145_v60 = vadd.f32 %v2866_v63, %v1144_v40 }
 0x21a   : > { %v1363_v1 = vadd.f32 %v2891_v24, %v1362_v56  ;;  %v924_v2 = vadd.f32 %v2860_v41, %v923_v59 }
 0x21b   : > { %v1146_v6 = vadd.f32 %v2866_v63, %v1145_v60 }
 0x21c   : > { %v1364_v8 = vadd.f32 %v2891_v24, %v1363_v1  ;;  %v777_v62 = vpop.f32.mrf.mxu2  ;;  %v925_v11 = vadd.f32 %v2860_v41, %v924_v2 }
 0x21d   : > { %949 = vmatpush.bf16.msra.mxu3 %v934_v5  ;;  %v1147_v35 = vadd.f32 %v2866_v63, %v1146_v6 }
 0x21e   : > { %v1031_v58 = vpop.f32.mrf.mxu0  ;;  %v2928_v9 = vadd.f32 %v2860_v41, %v925_v11  ;;  %v1365_v57 = vadd.f32 %v2891_v24, %v1364_v8 }
 0x21f   : > { %v2932_v3 = vadd.f32 %v2866_v63, %v1147_v35  ;;  %v1246_v30 = vpop.f32.mrf.mxu1 }
 0x220   : > { %950 = vmatmul.bf16.vlgmr.msra.gmra.mxu3 %v661_v32  ;;  %v1366_v14 = vadd.f32 %v2891_v24, %v1365_v57  ;;  %v1410_v59 = vpop.trf.xlu0  ;;  %v927_v20 = vrot.slane %v2928_v9, 4 }
 0x221   : > { %1164 = vmatpush.bf16.msrb.mxu3 %v1157_v10  ;;  %v1149_v8 = vrot.slane %v2932_v3, 4 }
 0x222   : > { %v1367_v16 = vadd.f32 %v2891_v24, %v1366_v14  ;;  %v928_v60 = vadd.f32 %v927_v20, %v2928_v9 }
 0x223   : > { %v1150_v35 = vadd.f32 %v1149_v8, %v2932_v3 }
 0x224   : > { %v780_v17 = vpop.f32.mrf.mxu2  ;;  %v1368_v18 = vadd.f32 %v2891_v24, %v1367_v16  ;;  %v929_v0 = vrot.slane %v928_v60, 2 }
 0x225   : > { %1165 = vmatpush.bf16.msrb.mxu3 %v1157_v10  ;;  %v1151_v58 = vrot.slane %v1150_v35, 2 }
 0x226   : > { %v1034_v19 = vpop.f32.mrf.mxu0  ;;  %v1369_v41 = vadd.f32 %v2891_v24, %v1368_v18  ;;  %v930_v1 = vadd.f32 %v929_v0, %v928_v60 }
 0x227   : > { %v1248_v43 = vpop.f32.mrf.mxu1  ;;  %v1152_v57 = vadd.f32 %v1151_v58, %v1150_v35 }
 0x228   : > { %v2939_v23 = vadd.f32 %v2891_v24, %v1369_v41  ;;  %v1411_v22 = vpop.trf.xlu0  ;;  %v931_v2 = vrot.slane %v930_v1, 1 }
 0x229   : > { %1166 = vmatpush.bf16.msrb.mxu3 %v1157_v10  ;;  %v1153_v13 = vrot.slane %v1152_v57, 1 }
 0x22a   : > { %v932_v6 = vadd.f32 %v931_v2, %v930_v1  ;;  %v1371_v17 = vrot.slane %v2939_v23, 4 }
 0x22b   : > { %v1154_v14 = vadd.f32 %v1153_v13, %v1152_v57 }
 0x22c   : > { %v782_v63 = vpop.f32.mrf.mxu2  ;;  %2481 = vrcp.f32 %v932_v6  ;;  %v1372_v21 = vadd.f32 %v1371_v17, %v2939_v23 }
 0x22d   : > { %1167 = vmatpush.bf16.msrb.mxu3 %v1157_v10  ;;  %2483 = vrcp.f32 %v1154_v14 }
 0x22e   : > { %v1036_v25 = vpop.f32.mrf.mxu0  ;;  %v1373_v63 = vrot.slane %v1372_v21, 2 }
 0x22f   : > { %v1251_v44 = vpop.f32.mrf.mxu1 }
 0x230   : > { %v1412_v5 = vpop.trf.xlu0 }
 0x231   : > { %1168 = vmatpush.bf16.msrb.mxu3 %v1157_v10 }
 0x234   : > { %v785_v27 = vpop.f32.mrf.mxu2 }
 0x235   : > { %1169 = vmatpush.bf16.msrb.mxu3 %v1157_v10  ;;  %v1374_v27 = vadd.f32 %v1373_v63, %v1372_v21 }
 0x236   : > { %v1039_v28 = vpop.f32.mrf.mxu0 }
 0x237   : > { %v1253_v61 = vpop.f32.mrf.mxu1  ;;  %v1375_v28 = vrot.slane %v1374_v27, 1 }
 0x238   : > { %v1413_v32 = vpop.trf.xlu0 }
 0x239   : > { %1170 = vmatpush.bf16.msrb.mxu3 %v1157_v10  ;;  %v2482_v10 = vpop.eup %2481  ;;  %v1376_v29 = vadd.f32 %v1375_v28, %v1374_v27 }
 0x23a   : > { %v2484_v18 = vpop.eup %2483 }
 0x23b   : > { %2485 = vrcp.f32 %v1376_v29 }
 0x23c   : > { %v787_v36 = vpop.f32.mrf.mxu2 }
 0x23d   : > { %1171 = vmatpush.bf16.msrb.mxu3 %v1156_v12  ;;  %v656_v12 = vpack.c.bf16 %v534_v49, %v534_v49 }
 0x23e   : > { %v1041_v37 = vpop.f32.mrf.mxu0 }
 0x23f   : > { %v1442_v53 = vsel %vm742_vm1, %v656_v12, 0  ;;  %v1256_v48 = vpop.f32.mrf.mxu1 }
 0x240   : > { %1172 = vmatmul.bf16.vlgmr.msrb.gmra.mxu3 %v662_v33  ;;  %v1414_v16 = vpop.trf.xlu0 }
 0x241   : > { %1386 = vmatpush.bf16.msra.mxu3 %v1379_v31 }
 0x244   : > { %v790_v45 = vpop.f32.mrf.mxu2 }
 0x245   : > { %1387 = vmatpush.bf16.msra.mxu3 %v1379_v31 }
 0x246   : > { %v1044_v46 = vpop.f32.mrf.mxu0 }
 0x247   : > { %v1258_v55 = vpop.f32.mrf.mxu1 }
 0x248   : > { %v1415_v26 = vpop.trf.xlu0 }
 0x249   : > { %1388 = vmatpush.bf16.msra.mxu3 %v1379_v31 }
 0x24c   : > { %v792_v47 = vpop.f32.mrf.mxu2 }
 0x24d   : > { %1389 = vmatpush.bf16.msra.mxu3 %v1379_v31 }
 0x24e   : > { %v1046_v24 = vpop.f32.mrf.mxu0 }
 0x24f   : > { %v1261_v40 = vpop.f32.mrf.mxu1 }
 0x250   : > { %v1416_v30 = vpop.trf.xlu0 }
 0x251   : > { %1390 = vmatpush.bf16.msra.mxu3 %v1379_v31 }
 0x255   : > { %1391 = vmatpush.bf16.msra.mxu3 %v1379_v31 }
 0x257   : > { %v1263_v51 = vpop.f32.mrf.mxu1 }
 0x259   : > { %1392 = vmatpush.bf16.msra.mxu3 %v1379_v31  ;;  %v2486_v31 = vpop.eup %2485 }
 0x25d   : > { %1393 = vmatpush.bf16.msra.mxu3 %v1378_v52 }
 0x260   : > { %1394 = vmatmul.bf16.vlgmr.msra.gmra.mxu3 %v663_v54 }
 0x261   : > { %1451 = vmatpush.bf16.msrb.mxu3 %v1442_v53 }
 0x263   : > { %v1266_v56 = vpop.f32.mrf.mxu1 }
 0x26b   : > { %v1268_v38 = vpop.f32.mrf.mxu1 }
 0x270   : > { %2307 = vmatmul.msk.bf16.vlgmr.msrb.gmra.mxu3 %vm717_vm2, %v1409_v39 }
 0x280   : > { %2308 = vmatmul.msk.bf16.gmra.mxu3 %vm717_vm2, %v1410_v59 }
 0x290   : > { %2309 = vmatmul.msk.bf16.gmra.mxu3 %vm717_vm2, %v1411_v22 }
 0x2a0   : > { %2310 = vmatmul.msk.bf16.gmra.mxu3 %vm717_vm2, %v1412_v5 }
 0x2a3   : > { %v951_v62 = vpop.f32.mrf.mxu3 }
 0x2a4   : > { %v2960_v11 = vmul.f32 %v2482_v10, %v951_v62 }
 0x2ab   : > { %v953_v9 = vpop.f32.mrf.mxu3 }
 0x2b0   : > { %2311 = vmatmul.msk.bf16.gmra.mxu3 %vm717_vm2, %v1413_v32 }
 0x2c0   : > { %2312 = vmatmul.msk.bf16.gmra.mxu3 %vm717_vm2, %v1414_v16 }
 0x2c3   : > { %v1173_v19 = vpop.f32.mrf.mxu3 }
 0x2c4   : > { %v2966_v41 = vmul.f32 %v2484_v18, %v1173_v19  ;;  %v590_v19 = vpop.permute.xlu1 %589 }
 0x2c5   : > { %v651_v63 = vadd.f32 %v2846_v42, %v590_v19 }
 0x2c6   : > { %v1631_v3 = vpack.c.bf16 %v2966_v41, %v2960_v11 }
 0x2c7   : > { %v664_v29 = vpack.c.bf16 %v651_v63, %v651_v63 }
 0x2cb   : > { %v1175_v25 = vpop.f32.mrf.mxu3 }
 0x2d0   : > { %2313 = vmatmul.msk.bf16.gmra.mxu3 %vm717_vm2, %v1415_v26 }
 0x2e0   : > { %2314 = vmatmul.msk.bf16.gmra.mxu3 %vm717_vm2, %v1416_v30 }
 0x2e3   : > { %v1395_v33 = vpop.f32.mrf.mxu3 }
 0x2e4   : > { %v2973_v36 = vmul.f32 %v2486_v31, %v1395_v33 }
 0x2eb   : > { %v1397_v37 = vpop.f32.mrf.mxu3 }
 0x2f3   : > { %v1453_v43 = vpop.f32.mrf.mxu3 }
 0x2f4   : > { %v1509_v45 = vmax.f32 %v1453_v43, -1e+30 }
 0x2f6   : > { %v1513_v46 = vmax.f32 %v1509_v45, -1e+30 }
 0x2f8   : > { %v1517_v47 = vmax.f32 %v1513_v46, -1e+30 }
 0x2fb   : > { %v1455_v23 = vpop.f32.mrf.mxu3 }
 0x2fc   : > { %v1510_v44 = vmax.f32 %v1455_v23, -1e+30 }
 0x2fe   : > { %v1514_v34 = vmax.f32 %v1510_v44, -1e+30 }
 0x300   : > { %v1518_v24 = vmax.f32 %v1514_v34, -1e+30 }
 0x302   : > { %v1521_v49 = vmax.f32 %v1517_v47, %v1518_v24 }
 0x303   : > { %v1458_v61 = vpop.f32.mrf.mxu3 }
 0x304   : > { %v1523_v4 = vmax.f32 %v1521_v49, -1e+30 }
 0x306   : > { %v1524_v12 = vrot.slane %v1523_v4, 4 }
 0x308   : > { %v1525_v50 = vmax.f32 %v1523_v4, %v1524_v12 }
 0x30a   : > { %v1526_v52 = vrot.slane %v1525_v50, 2 }
 0x30b   : > { %v1460_v53 = vpop.f32.mrf.mxu3 }
 0x30c   : > { %v1527_v48 = vmax.f32 %v1525_v50, %v1526_v52  ;;  %v2388_v50 = vld [vmem:[%s3266_s6] sm:$0xff]  ;;  %v2392_v53 = vld [vmem:[%s3268_s8 + $0x10] sm:$0xff] }
 0x30d   : > { %v2390_v52 = vld [vmem:[%s3268_s8] sm:$0xff] }
 0x30e   : > { %v1528_v54 = vrot.slane %v1527_v48, 1 }
 0x310   : > { %v1529_v55 = vmax.f32 %v1527_v48, %v1528_v54  ;;  %v1650_v48 = vpop.permute.xlu0 %1649 }
 0x312   : > { %v1531_v40 = vsub.f32 %v1455_v23, %v1529_v55  ;;  %v1532_v39 = vsub.f32 -1e+30, %v1529_v55  ;;  %v1530_v51 = vsub.f32 %v1453_v43, %v1529_v55 }
 0x313   : > { %v1463_v56 = vpop.f32.mrf.mxu3 }
 0x314   : > { %v1548_v59 = vmul.f32 1.442695, %v1531_v40  ;;  %v1550_v38 = vmul.f32 1.442695, %v1532_v39  ;;  %v1546_v20 = vmul.f32 1.442695, %v1530_v51 }
 0x316   : > { %2487 = vpow2.f32 %v1548_v59  ;;  %v1640_v59 = vpop.permute.xlu1 %1639 }
 0x317   : > { %2489 = vpow2.f32 %v1550_v38 }
 0x318   : > { %2491 = vpow2.f32 %v1546_v20 }
 0x31b   : > { %v1465_v22 = vpop.f32.mrf.mxu3 }
 0x31c   : > { %v2488_v60 = vpop.eup %2487  ;;  %v2394_v22 = vld [vmem:[%s3269_s9] sm:$0xff] }
 0x31d   : > { %v2490_v0 = vpop.eup %2489 }
 0x31e   : > { %v2492_v1 = vpop.eup %2491  ;;  %v1601_v2 = vpack.c.bf16 %v2490_v0, %v2490_v0 }
 0x31f   : > { %v1578_v5 = vadd.f32 %v2492_v1, %v2488_v60  ;;  %v1600_v26 = vpack.c.bf16 %v2488_v60, %v2492_v1  ;;  %v2393_v60 = vld [vmem:[%s3268_s8 + $0x18] sm:$0xff]  ;;  %v2396_v1 = vld [vmem:[%s3269_s9 + $0x10] sm:$0xff] }
 0x320   : > { %1608 = vmatpush.bf16.msrb.mxu2 %v1601_v2 }
 0x321   : > { %v1579_v6 = vadd.f32 %v2490_v0, %v1578_v5 }
 0x323   : > { %v1580_v8 = vadd.f32 %v2490_v0, %v1579_v6  ;;  %v1468_v10 = vpop.f32.mrf.mxu3 }
 0x324   : > { %1609 = vmatpush.bf16.msrb.mxu2 %v1601_v2 }
 0x325   : > { %v1581_v62 = vadd.f32 %v2490_v0, %v1580_v8  ;;  %v1873_v8 = vpop.permute.xlu1 %1872 }
 0x327   : > { %v1582_v35 = vadd.f32 %v2490_v0, %v1581_v62 }
 0x328   : > { %1610 = vmatpush.bf16.msrb.mxu2 %v1601_v2 }
 0x329   : > { %v1583_v32 = vadd.f32 %v2490_v0, %v1582_v35 }
 0x32b   : > { %v1584_v58 = vadd.f32 %v2490_v0, %v1583_v32  ;;  %v1470_v9 = vpop.f32.mrf.mxu3 }
 0x32c   : > { %1611 = vmatpush.bf16.msrb.mxu2 %v1601_v2 }
 0x32d   : > { %v1585_v57 = vadd.f32 %v2490_v0, %v1584_v58  ;;  %v1863_v58 = vpop.permute.xlu1 %1862 }
 0x32f   : > { %v1586_v13 = vadd.f32 %v2490_v0, %v1585_v57  ;;  %v698_v57 = vlaneseq }
 0x330   : > { %1612 = vmatpush.bf16.msrb.mxu2 %v1601_v2 }
 0x331   : > { %v1587_v14 = vadd.f32 %v2490_v0, %v1586_v13 }
 0x333   : > { %v1588_v16 = vadd.f32 %v2490_v0, %v1587_v14  ;;  %v1473_v17 = vpop.f32.mrf.mxu3 }
 0x334   : > { %1613 = vmatpush.bf16.msrb.mxu2 %v1601_v2 }
 0x335   : > { %v1589_v18 = vadd.f32 %v2490_v0, %v1588_v16  ;;  %v699_v16 = vand.u32 127, %v698_v57  ;;  %v1853_v19 = vpop.permute.xlu1 %1852 }
 0x337   : > { %v1590_v21 = vadd.f32 %v2490_v0, %v1589_v18  ;;  %vm700_vm3 = vcmp.lt.s32.totalorder %v699_v16, 16 }
 0x338   : > { %1614 = vmatpush.bf16.msrb.mxu2 %v1601_v2  ;;  %v2397_v2 = vld [vmem:[%s3269_s9 + $0x18] sm:$0xff] }
 0x339   : > { %v1591_v25 = vadd.f32 %v2490_v0, %v1590_v21 }
 0x33b   : > { %v1592_v27 = vadd.f32 %v2490_v0, %v1591_v25  ;;  %v1475_v28 = vpop.f32.mrf.mxu3  ;;  %v2395_v0 = vld [vmem:[%s3269_s9 + $0x8] sm:$0xff] }
 0x33c   : > { %1615 = vmatpush.bf16.msrb.mxu2 %v1600_v26 }
 0x33d   : > { %v1593_v23 = vrot.slane %v1592_v27, 4 }
 0x33f   : > { %1616 = vmatmul.bf16.vlgmr.msrb.gmra.mxu2 %v664_v29  ;;  %v1594_v46 = vadd.f32 %v1593_v23, %v1592_v27 }
 0x341   : > { %v1595_v44 = vrot.slane %v1594_v46, 2 }
 0x343   : > { %v1478_v30 = vpop.f32.mrf.mxu3  ;;  %v1596_v34 = vadd.f32 %v1595_v44, %v1594_v46 }
 0x345   : > { %v1597_v47 = vrot.slane %v1596_v34, 1 }
 0x347   : > { %v1598_v24 = vadd.f32 %v1597_v47, %v1596_v34 }
 0x349   : > { %2493 = vrcp.f32 %v1598_v24 }
 0x34b   : > { %v1480_v31 = vpop.f32.mrf.mxu3 }
 0x34f   : > { %v2494_v42 = vpop.eup %2493 }
 0x353   : > { %v1483_v33 = vpop.f32.mrf.mxu3 }
 0x35b   : > { %v1485_v37 = vpop.f32.mrf.mxu3 }
 0x363   : > { %v1488_v43 = vpop.f32.mrf.mxu3 }
 0x36b   : > { %v1490_v45 = vpop.f32.mrf.mxu3 }
 0x3c2   : > { %v1617_v49 = vpop.f32.mrf.mxu2 }
 0x3c3   : > { %v1621_v61 = vmul.f32 %v2494_v42, %v1617_v49 }
 0x3c5   : > { %v1632_v4 = vpack.c.bf16 %v1621_v61, %v2973_v36  ;;  %v2389_v36 = vld [vmem:[%s3266_s6 + $0x8] sm:$0xff] }
 0x3c7   : > { %1679 = vmatpush.bf16.msra.mxu2 %v1632_v4 }
 0x3ca   : > { %v1619_v12 = vpop.f32.mrf.mxu2 }
 0x3cb   : > { %1680 = vmatpush.bf16.msra.mxu2 %v1631_v3 }
 0x3ce   : > { %2323 = vmatmul.msk.bf16.vlgmr.msra.gmra.mxu2 %vm510_vm0, %v2388_v50 }
 0x3cf   : > { %1809 = vmatpush.bf16.msrb.mxu2 %v2713_v7  ;;  %v2391_v7 = vld [vmem:[%s3268_s8 + $0x8] sm:$0xff] }
 0x3d3   : > { %1810 = vmatpush.bf16.msrb.mxu2 %v2719_v15  ;;  %v1655_v15 = vpop.permute.xlu2 %1654 }
 0x3db   : > { %v1645_v39 = vpop.permute.xlu2 %1644 }
 0x3de   : > { %2324 = vmatmul.msk.bf16.gmra.mxu2 %vm510_vm0, %v2389_v36 }
 0x3e3   : > { %v1878_v35 = vpop.permute.xlu2 %1877 }
 0x3eb   : > { %v1868_v13 = vpop.permute.xlu2 %1867 }
 0x3ee   : > { %2361 = vmatmul.msk.bf16.vlgmr.msrb.gmra.mxu2 %vm510_vm0, %v2390_v52 }
 0x3f3   : > { %v1858_v27 = vpop.permute.xlu2 %1857 }
 0x3fe   : > { %2362 = vmatmul.msk.bf16.gmra.mxu2 %vm510_vm0, %v2391_v7 }
 0x40e   : > { %2363 = vmatmul.msk.bf16.gmra.mxu2 %vm510_vm0, %v2392_v53 }
 0x41e   : > { %2364 = vmatmul.msk.bf16.gmra.mxu2 %vm510_vm0, %v2393_v60  ;;  %v2093_v60 = vld [vmem:[%s3272_s12 + $0x18] sm:$0xff] }
 0x451   : > { %v1682_v11 = vpop.f32.mrf.mxu2 }
 0x452   : > { %v1683_v38 = vadd.f32 %v1682_v11, %v1640_v59 }
 0x459   : > { %v1684_v41 = vpop.f32.mrf.mxu2 }
 0x45a   : > { %v1685_v51 = vadd.f32 %v1684_v41, %v1645_v39 }
 0x45c   : > { %v1708_v20 = vpack.c.bf16 %v1685_v51, %v1683_v38 }
 0x461   : > { %v1687_v3 = vpop.f32.mrf.mxu2 }
 0x462   : > { %v1688_v55 = vadd.f32 %v1687_v3, %v1650_v48 }
 0x469   : > { %v1689_v54 = vpop.f32.mrf.mxu2 }
 0x46a   : > { %v1690_v40 = vadd.f32 %v1689_v54, %v1655_v15  ;;  %v1843_v15 = vpop.permute.xlu1 %1842 }
 0x46c   : > { %v1709_v56 = vpack.c.bf16 %v1690_v40, %v1688_v55  ;;  %v1848_v55 = vpop.permute.xlu2 %1847 }
 0x46e   : > { %1748 = vmatpush.bf16.msra.mxu0 %v1709_v56 }
 0x471   : > { %v1812_v5 = vpop.f32.mrf.mxu2 }
 0x472   : > { %1749 = vmatpush.bf16.msra.mxu0 %v1708_v20  ;;  %v2091_v20 = vld [vmem:[%s3272_s12 + $0x8] sm:$0xff] }
 0x475   : > { %2341 = vmatmul.msk.bf16.vlgmr.msra.gmra.mxu0 %vm510_vm0, %v2394_v22  ;;  %v2090_v22 = vld [vmem:[%s3272_s12] sm:$0xff] }
 0x479   : > { %v1814_v6 = vpop.f32.mrf.mxu2 }
 0x481   : > { %v1817_v32 = vpop.f32.mrf.mxu2 }
 0x485   : > { %2342 = vmatmul.msk.bf16.gmra.mxu0 %vm510_vm0, %v2395_v0  ;;  %v2092_v0 = vld [vmem:[%s3272_s12 + $0x10] sm:$0xff] }
 0x489   : > { %v1819_v17 = vpop.f32.mrf.mxu2 }
 0x491   : > { %v1822_v28 = vpop.f32.mrf.mxu2 }
 0x495   : > { %2343 = vmatmul.msk.bf16.gmra.mxu0 %vm510_vm0, %v2396_v1 }
 0x499   : > { %v1824_v43 = vpop.f32.mrf.mxu2 }
 0x4a1   : > { %v1827_v24 = vpop.f32.mrf.mxu2 }
 0x4a5   : > { %2344 = vmatmul.msk.bf16.gmra.mxu0 %vm510_vm0, %v2397_v2 }
 0x4a9   : > { %v1829_v36 = vpop.f32.mrf.mxu2 }
 0x4f2   : > { %v1751_v10 = vpop.f32.mrf.mxu0 }
 0x4f3   : > { %v1813_v62 = vadd.f32 %v1812_v5, %v1751_v10 }
 0x4f5   : > { %v3046_v48 = vadd.f32 %v1843_v15, %v1813_v62 }
 0x4f7   : > { %v1890_v39 = vsel %vm700_vm3, %v3046_v48, 0.0 }
 0x4f8   : > { %v1922_v56 = vmul.f32 %v1890_v39, %v1890_v39 }
 0x4fa   : > { %v1753_v9 = vpop.f32.mrf.mxu0 }
 0x4fb   : > { %v1815_v54 = vadd.f32 %v1814_v6, %v1753_v9 }
 0x4fd   : > { %v3048_v40 = vadd.f32 %v1848_v55, %v1815_v54 }
 0x4ff   : > { %v1891_v59 = vsel %vm700_vm3, %v3048_v40, 0.0 }
 0x500   : > { %v1923_v38 = vmul.f32 %v1891_v59, %v1891_v59 }
 0x502   : > { %v1756_v14 = vpop.f32.mrf.mxu0 }
 0x503   : > { %v1818_v18 = vadd.f32 %v1817_v32, %v1756_v14 }
 0x505   : > { %v3022_v21 = vadd.f32 %v1853_v19, %v1818_v18 }
 0x507   : > { %v1892_v63 = vsel %vm700_vm3, %v3022_v21, 0.0 }
 0x508   : > { %1902 = vadd.xlane.f32.xlu0 %v1892_v63  ;;  %v1924_v3 = vmul.f32 %v1892_v63, %v1892_v63 }
 0x50a   : > { %v1758_v25 = vpop.f32.mrf.mxu0 }
 0x50b   : > { %v1820_v26 = vadd.f32 %v1819_v17, %v1758_v25 }
 0x50d   : > { %v3026_v29 = vadd.f32 %v1858_v27, %v1820_v26 }
 0x50f   : > { %v1893_v30 = vsel %vm700_vm3, %v3026_v29, 0.0 }
 0x510   : > { %1904 = vadd.xlane.f32.xlu2 %v1893_v30  ;;  %v1925_v53 = vmul.f32 %v1893_v30, %v1893_v30 }
 0x512   : > { %v1761_v31 = vpop.f32.mrf.mxu0 }
 0x513   : > { %v1823_v33 = vadd.f32 %v1822_v28, %v1761_v31 }
 0x515   : > { %v3030_v37 = vadd.f32 %v1863_v58, %v1823_v33 }
 0x517   : > { %v1894_v45 = vsel %vm700_vm3, %v3030_v37, 0.0 }
 0x518   : > { %1906 = vadd.xlane.f32.xlu1 %v1894_v45  ;;  %v1926_v23 = vmul.f32 %v1894_v45, %v1894_v45 }
 0x51a   : > { %1938 = vadd.xlane.f32.xlu2 %v1926_v23  ;;  %v1763_v46 = vpop.f32.mrf.mxu0 }
 0x51b   : > { %v1825_v44 = vadd.f32 %v1824_v43, %v1763_v46 }
 0x51d   : > { %v3034_v34 = vadd.f32 %v1868_v13, %v1825_v44 }
 0x51f   : > { %v1895_v47 = vsel %vm700_vm3, %v3034_v34, 0.0 }
 0x520   : > { %1908 = vadd.xlane.f32.xlu0 %v1895_v47  ;;  %v1927_v42 = vmul.f32 %v1895_v47, %v1895_v47 }
 0x522   : > { %1940 = vadd.xlane.f32.xlu1 %v1927_v42  ;;  %v1766_v49 = vpop.f32.mrf.mxu0 }
 0x523   : > { %v1828_v61 = vadd.f32 %v1827_v24, %v1766_v49 }
 0x525   : > { %v3038_v4 = vadd.f32 %v1873_v8, %v1828_v61 }
 0x527   : > { %v1896_v12 = vsel %vm700_vm3, %v3038_v4, 0.0 }
 0x528   : > { %v1928_v50 = vmul.f32 %v1896_v12, %v1896_v12 }
 0x52a   : > { %1910 = vadd.xlane.f32.xlu1 %v1896_v12  ;;  %1942 = vadd.xlane.f32.xlu0 %v1928_v50  ;;  %v1768_v52 = vpop.f32.mrf.mxu0 }
 0x52b   : > { %v1830_v11 = vadd.f32 %v1829_v36, %v1768_v52 }
 0x52d   : > { %v3042_v7 = vadd.f32 %v1878_v35, %v1830_v11 }
 0x52f   : > { %v1897_v41 = vsel %vm700_vm3, %v3042_v7, 0.0 }
 0x530   : > { %1912 = vadd.xlane.f32.xlu2 %v1897_v41  ;;  %v1929_v51 = vmul.f32 %v1897_v41, %v1897_v41 }
 0x532   : > { %1934 = vadd.xlane.f32.xlu1 %v1924_v3  ;;  %1936 = vadd.xlane.f32.xlu0 %v1925_v53 }
 0x538   : > { %1944 = vadd.xlane.f32.xlu2 %v1929_v51 }
 0x53a   : > { %1900 = vadd.xlane.f32.xlu1 %v1891_v59  ;;  %1930 = vadd.xlane.f32.xlu0 %v1922_v56 }
 0x540   : > { %1898 = vadd.xlane.f32.xlu2 %v1890_v39 }
 0x548   : > { %1932 = vadd.xlane.f32.xlu2 %v1923_v38 }
 0x54e   : > { %2101 = vperm.xlu0 %2443, %v2091_v20  }
 0x553   : > { %2096 = vperm.xlu1 %2444, %v2090_v22  }
 0x556   : > { %2111 = vperm.xlu0 %2443, %v2093_v60  }
 0x560   : > { %2106 = vperm.xlu2 %2445, %v2092_v0  }
 0x57b   : > { %v1903_v1 = vpop.xlane.xlu0 %1902 }
 0x57c   : > { %v3082_v28 = vmul.f32 0.0625, %v1903_v1 }
 0x57e   : > { %v1956_v23 = vmul.f32 %v3082_v28, %v3082_v28 }
 0x583   : > { %v1905_v5 = vpop.xlane.xlu2 %1904 }
 0x584   : > { %v3084_v30 = vmul.f32 0.0625, %v1905_v5 }
 0x586   : > { %v1957_v46 = vmul.f32 %v3084_v30, %v3084_v30 }
 0x58b   : > { %v1907_v2 = vpop.xlane.xlu1 %1906 }
 0x58c   : > { %v3068_v10 = vmul.f32 0.0625, %v1907_v2 }
 0x58d   : > { %v1939_v35 = vpop.xlane.xlu2 %1938 }
 0x58e   : > { %v1958_v9 = vmul.f32 %v3068_v10, %v3068_v10  ;;  %v1950_v57 = vmul.f32 0.0625, %v1939_v35 }
 0x590   : > { %v1966_v14 = vsub.f32 %v1950_v57, %v1958_v9 }
 0x592   : > { %v3080_v26 = vadd.f32 1e-05, %v1966_v14 }
 0x593   : > { %v1909_v6 = vpop.xlane.xlu0 %1908 }
 0x594   : > { %v3066_v8 = vmul.f32 0.0625, %v1909_v6  ;;  %vm2032_vm4 = vweird.f32 %v3080_v26 }
 0x595   : > { %v1941_v62 = vpop.xlane.xlu1 %1940 }
 0x596   : > { %v1959_v32 = vmul.f32 %v3066_v8, %v3066_v8  ;;  %v1951_v58 = vmul.f32 0.0625, %v1941_v62 }
 0x598   : > { %v1967_v13 = vsub.f32 %v1951_v58, %v1959_v32 }
 0x59a   : > { %v3076_v19 = vadd.f32 1e-05, %v1967_v13 }
 0x59c   : > { %2495 = vrsqrt.f32 %v3076_v19  ;;  %vm2042_vm9 = vweird.f32 %v3076_v19 }
 0x59d   : > { %v1911_v16 = vpop.xlane.xlu1 %1910  ;;  %v1943_v17 = vpop.xlane.xlu0 %1942  ;;  %2497 = vrsqrt.f32 %v3080_v26 }
 0x59e   : > { %v3074_v18 = vmul.f32 0.0625, %v1911_v16  ;;  %v1952_v25 = vmul.f32 0.0625, %v1943_v17 }
 0x5a0   : > { %v1960_v63 = vmul.f32 %v3074_v18, %v3074_v18 }
 0x5a2   : > { %v1968_v27 = vsub.f32 %v1952_v25, %v1960_v63  ;;  %v3097_v42 = vpop.eup %2495 }
 0x5a3   : > { %v1913_v31 = vpop.xlane.xlu2 %1912  ;;  %v3099_v12 = vpop.eup %2497  ;;  %v2037_v41 = vmul.f32 %v3097_v42, %v3076_v19  ;;  %vm2043_vm5 = vweird.f32 %v3097_v42 }
 0x5a4   : > { %v3087_v33 = vadd.f32 1e-05, %v1968_v27  ;;  %v3095_v24 = vmul.f32 0.0625, %v1913_v31  ;;  %v2027_v54 = vmul.f32 %v3099_v12, %v3080_v26  ;;  %vm2033_vm8 = vweird.f32 %v3099_v12  ;;  %vm3163_vm11 = vmor %vm2042_vm9, %vm2043_vm5 }
 0x5a5   : > { %v1935_v43 = vpop.xlane.xlu1 %1934  ;;  %v1937_v45 = vpop.xlane.xlu0 %1936  ;;  %v2038_v51 = vmul.f32 %v3097_v42, %v2037_v41  ;;  %vm3178_vm15 = vmor %vm2032_vm4, %vm2033_vm8 }
 0x5a6   : > { %2499 = vrsqrt.f32 %v3087_v33  ;;  %v1948_v44 = vmul.f32 0.0625, %v1935_v43  ;;  %v1949_v47 = vmul.f32 0.0625, %v1937_v45  ;;  %v1961_v15 = vmul.f32 %v3095_v24, %v3095_v24 }
 0x5a7   : > { %v2028_v59 = vmul.f32 %v3099_v12, %v2027_v54  ;;  %v2039_v1 = vmul.f32 0.5, %v2038_v51  ;;  %v1975_v45 = vsub.f32 %v3034_v34, %v3066_v8  ;;  %vm2052_vm7 = vweird.f32 %v3087_v33 }
 0x5a8   : > { %v1964_v49 = vsub.f32 %v1948_v44, %v1956_v23  ;;  %v1965_v61 = vsub.f32 %v1949_v47, %v1957_v46 }
 0x5a9   : > { %v2029_v35 = vmul.f32 0.5, %v2028_v59  ;;  %v2040_v16 = vsub.f32 1.5, %v2039_v1 }
 0x5aa   : > { %v3101_v50 = vadd.f32 1e-05, %v1964_v49  ;;  %v3103_v36 = vadd.f32 1e-05, %v1965_v61 }
 0x5ab   : > { %v1945_v52 = vpop.xlane.xlu2 %1944  ;;  %v2030_v43 = vsub.f32 1.5, %v2029_v35 }
 0x5ac   : > { %v3105_v11 = vpop.eup %2499  ;;  %v1953_v3 = vmul.f32 0.0625, %v1945_v52  ;;  %2501 = vrsqrt.f32 %v3101_v50  ;;  %v2041_v52 = vmul.f32 %v3097_v42, %v2040_v16  ;;  %vm2012_vm1 = vweird.f32 %v3101_v50 }
 0x5ad   : > { %v2047_v53 = vmul.f32 %v3105_v11, %v3087_v33  ;;  %2503 = vrsqrt.f32 %v3103_v36  ;;  %v1931_v22 = vpop.xlane.xlu0 %1930  ;;  %v1901_v62 = vpop.xlane.xlu1 %1900  ;;  %vm2053_vm6 = vweird.f32 %v3105_v11  ;;  %v2031_v19 = vmul.f32 %v3099_v12, %v2030_v43 }
 0x5ae   : > { %v1969_v55 = vsub.f32 %v1953_v3, %v1961_v15  ;;  %v1946_v58 = vmul.f32 0.0625, %v1931_v22  ;;  %v3137_v17 = vmul.f32 0.0625, %v1901_v62  ;;  %v1976_v15 = vsub.f32 %v3038_v4, %v3074_v18  ;;  %vm3157_vm10 = vmor %vm2052_vm7, %vm2053_vm6 }
 0x5af   : > { %v2048_v39 = vmul.f32 %v3105_v11, %v2047_v53  ;;  %v2045_v18 = vsel %vm3163_vm11, %v3097_v42, %v2041_v52  ;;  %vm2022_vm4 = vweird.f32 %v3103_v36 }
 0x5b0   : > { %v3119_v56 = vadd.f32 1e-05, %v1969_v55  ;;  %v1955_v49 = vmul.f32 %v3137_v17, %v3137_v17 }
 0x5b1   : > { %v2049_v20 = vmul.f32 0.5, %v2048_v39 }
 0x5b2   : > { %2505 = vrsqrt.f32 %v3119_v56  ;;  %v3123_v38 = vpop.eup %2501  ;;  %vm2062_vm14 = vweird.f32 %v3119_v56 }
 0x5b3   : > { %v1899_v60 = vpop.xlane.xlu2 %1898  ;;  %v3125_v0 = vpop.eup %2503  ;;  %v2007_v2 = vmul.f32 %v3123_v38, %v3101_v50  ;;  %v2050_v57 = vsub.f32 1.5, %v2049_v20  ;;  %vm2013_vm13 = vweird.f32 %v3123_v38 }
 0x5b4   : > { %v3129_v5 = vmul.f32 0.0625, %v1899_v60  ;;  %v2017_v6 = vmul.f32 %v3125_v0, %v3103_v36  ;;  %vm2023_vm0 = vweird.f32 %v3125_v0  ;;  %vm3190_vm3 = vmor %vm2012_vm1, %vm2013_vm13  ;;  %v1972_v36 = vsub.f32 %v3022_v21, %v3082_v28 }
 0x5b5   : > { %v2008_v32 = vmul.f32 %v3123_v38, %v2007_v2  ;;  %v2051_v46 = vmul.f32 %v3105_v11, %v2050_v57  ;;  %vm3203_vm5 = vmor %vm2022_vm4, %vm2023_vm0  ;;  %v2071_v2 = vmul.f32 %v2045_v18, %v1975_v45 }
 0x5b6   : > { %v1954_v9 = vmul.f32 %v3129_v5, %v3129_v5  ;;  %v2018_v13 = vmul.f32 %v3125_v0, %v2017_v6  ;;  %v1970_v45 = vsub.f32 %v3046_v48, %v3129_v5  ;;  %v2399_v48 = vld [vmem:[%s3271_s11 + $0x8] sm:$0xff] }
 0x5b7   : > { %v2009_v25 = vmul.f32 0.5, %v2008_v32  ;;  %v2055_v33 = vsel %vm3157_vm10, %v3105_v11, %v2051_v46 }
 0x5b8   : > { %v2506_v14 = vpop.eup %2505  ;;  %v1962_v63 = vsub.f32 %v1946_v58, %v1954_v9  ;;  %v2019_v27 = vmul.f32 0.5, %v2018_v13  ;;  %v2072_v26 = vmul.f32 %v2055_v33, %v1976_v15  ;;  %v2079_v13 = vmax.f32 %v2071_v2, 0.0 }
 0x5b9   : > { %v2057_v31 = vmul.f32 %v2506_v14, %v3119_v56  ;;  %v2010_v34 = vsub.f32 1.5, %v2009_v25  ;;  %vm2063_vm12 = vweird.f32 %v2506_v14  ;;  %v1977_v56 = vsub.f32 %v3042_v7, %v3095_v24 }
 0x5ba   : > { %v3143_v23 = vadd.f32 1e-05, %v1962_v63  ;;  %v2020_v8 = vsub.f32 1.5, %v2019_v27  ;;  %vm2064_vm2 = vmor %vm2062_vm14, %vm2063_vm12  ;;  %v2035_v7 = vsel %vm3178_vm15, %v3099_v12, %v2031_v19  ;;  %v1974_v24 = vsub.f32 %v3030_v37, %v3068_v10 }
 0x5bb   : > { %v2058_v44 = vmul.f32 %v2506_v14, %v2057_v31  ;;  %v1933_v47 = vpop.xlane.xlu2 %1932  ;;  %v2011_v51 = vmul.f32 %v3123_v38, %v2010_v34  ;;  %v1973_v10 = vsub.f32 %v3026_v29, %v3084_v30  ;;  %v2080_v12 = vmax.f32 %v2072_v26, 0.0 }
 0x5bc   : > { %2507 = vrsqrt.f32 %v3143_v23  ;;  %v1947_v61 = vmul.f32 0.0625, %v1933_v47  ;;  %v2021_v59 = vmul.f32 %v3125_v0, %v2020_v8  ;;  %v2070_v32 = vmul.f32 %v2035_v7, %v1974_v24 }
 0x5bd   : > { %v2059_v41 = vmul.f32 0.5, %v2058_v44  ;;  %v2015_v62 = vsel %vm3190_vm3, %v3123_v38, %v2011_v51  ;;  %vm1992_vm7 = vweird.f32 %v3143_v23  ;;  %v1971_v47 = vsub.f32 %v3048_v40, %v3137_v17 }
 0x5be   : > { %v1963_v53 = vsub.f32 %v1947_v61, %v1955_v49  ;;  %v2025_v37 = vsel %vm3203_vm5, %v3125_v0, %v2021_v59  ;;  %v2068_v21 = vmul.f32 %v2015_v62, %v1972_v36  ;;  %v2078_v38 = vmax.f32 %v2070_v32, 0.0 }
 0x5bf   : > { %v2060_v55 = vsub.f32 1.5, %v2059_v41  ;;  %v2069_v28 = vmul.f32 %v2025_v37, %v1973_v10  ;;  %v2398_v41 = vld [vmem:[%s3271_s11] sm:$0xff]  ;;  %vm2124_vm12 = vcmask 523264  }
 0x5c0   : > { %v1979_v4 = vadd.f32 1e-05, %v1963_v53  ;;  %v2088_v0 = vpack.c.bf16 %v2079_v13, %v2078_v38  ;;  %v2076_v27 = vmax.f32 %v2068_v21, 0.0  ;;  %v2102_v15 = vpop.permute.xlu0 %2101 }
 0x5c1   : > { %v2061_v11 = vmul.f32 %v2506_v14, %v2060_v55  ;;  %v2077_v31 = vmax.f32 %v2069_v28, 0.0 }
 0x5c2   : > { %v2508_v20 = vpop.eup %2507  ;;  %2509 = vrsqrt.f32 %v1979_v4  ;;  %vm2002_vm10 = vweird.f32 %v1979_v4 }
 0x5c3   : > { %v2065_v22 = vsel %vm2064_vm2, %v2506_v14, %v2061_v11  ;;  %v1987_v60 = vmul.f32 %v2508_v20, %v3143_v23  ;;  %vm1993_vm6 = vweird.f32 %v2508_v20  ;;  %v2087_v46 = vpack.c.bf16 %v2077_v31, %v2076_v27  ;;  %v2107_v54 = vpop.permute.xlu2 %2106 }
 0x5c4   : > { %v2073_v1 = vmul.f32 %v2065_v22, %v1977_v56  ;;  %vm1994_vm8 = vmor %vm1992_vm7, %vm1993_vm6 }
 0x5c5   : > { %v1988_v6 = vmul.f32 %v2508_v20, %v1987_v60  ;;  %v2097_v40 = vpop.permute.xlu1 %2096 }
 0x5c6   : > { %v2081_v35 = vmax.f32 %v2073_v1, 0.0 }
 0x5c7   : > { %v1989_v58 = vmul.f32 0.5, %v1988_v6 }
 0x5c8   : > { %v2510_v9 = vpop.eup %2509  ;;  %v2089_v57 = vpack.c.bf16 %v2081_v35, %v2080_v12  ;;  %v2112_v19 = vpop.permute.xlu0 %2111 }
 0x5c9   : > { %v1990_v14 = vsub.f32 1.5, %v1989_v58  ;;  %v1997_v16 = vmul.f32 %v2510_v9, %v1979_v4  ;;  %vm2003_vm9 = vweird.f32 %v2510_v9 }
 0x5ca   : > { %2135 = vmatpush.bf16.msra.mxu1 %v2089_v57  ;;  %vm2004_vm11 = vmor %vm2002_vm10, %vm2003_vm9 }
 0x5cb   : > { %v1991_v63 = vmul.f32 %v2508_v20, %v1990_v14  ;;  %v1998_v25 = vmul.f32 %v2510_v9, %v1997_v16 }
 0x5cd   : > { %v1999_v29 = vmul.f32 0.5, %v1998_v25  ;;  %v1995_v30 = vsel %vm1994_vm8, %v2508_v20, %v1991_v63 }
 0x5ce   : > { %2136 = vmatpush.bf16.msra.mxu1 %v2088_v0  ;;  %v2066_v49 = vmul.f32 %v1995_v30, %v1970_v45 }
 0x5cf   : > { %v2000_v43 = vsub.f32 1.5, %v1999_v29 }
 0x5d0   : > { %v2074_v52 = vmax.f32 %v2066_v49, 0.0 }
 0x5d1   : > { %v2001_v44 = vmul.f32 %v2510_v9, %v2000_v43 }
 0x5d2   : > { %2137 = vmatpush.bf16.msra.mxu1 %v2087_v46 }
 0x5d3   : > { %v2005_v23 = vsel %vm2004_vm11, %v2510_v9, %v2001_v44 }
 0x5d4   : > { %v2067_v61 = vmul.f32 %v2005_v23, %v1971_v47 }
 0x5d6   : > { %v2075_v34 = vmax.f32 %v2067_v61, 0.0 }
 0x5d8   : > { %v2086_v8 = vpack.c.bf16 %v2075_v34, %v2074_v52 }
 0x5da   : > { %2138 = vmatpush.bf16.msra.mxu1 %v2086_v8 }
 0x5dd   : > { %2373 = vmatmul.msk.bf16.vlgmr.msra.gmra.mxu1 %vm2124_vm12, %v2398_v41 }
 0x5ed   : > { %2374 = vmatmul.msk.bf16.gmra.mxu1 %vm2124_vm12, %v2399_v48 }
 0x65a   : > { %v2140_v5 = vpop.f32.mrf.mxu1 }
 0x65b   : > { %v2141_v17 = vadd.f32 %v2140_v5, %v2097_v40 }
 0x65d   : > { %2150 = vst [vmem:[%s448_s27] sm:$0xff] %v2141_v17 }
 0x662   : > { %v2142_v3 = vpop.f32.mrf.mxu1 }
 0x663   : > { %v2143_v53 = vadd.f32 %v2142_v3, %v2102_v15 }
 0x665   : > { %2151 = vst [vmem:[%s448_s27 + $0x8] sm:$0xff] %v2143_v53 }
 0x66a   : > { %v2145_v33 = vpop.f32.mrf.mxu1 }
 0x66b   : > { %v2146_v55 = vadd.f32 %v2145_v33, %v2107_v54 }
 0x66d   : > { %2152 = vst [vmem:[%s448_s27 + $0x10] sm:$0xff] %v2146_v55 }
 0x672   : > { %v2147_v4 = vpop.f32.mrf.mxu1 }
 0x673   : > { %v2148_v18 = vadd.f32 %v2147_v4, %v2112_v19 }
 0x675   : > { %2153 = vst [vmem:[%s448_s27 + $0x18] sm:$0xff] %v2148_v18 }
 0x676   : > { %2538 = shalt.err (!%p2535_p3)
}
 0x677   : > { %s2576_s14 = smov 128   ;;  %s2577_s27 = smov 8  }
 0x678   : > { %2401 = dma.vmem_to_hbm [thread:$0]  (%p2686_p5), %s2168_s16, 512, %s2170_s20, %s2155_s21, %s2576_s14, %s2576_s14, %s2577_s27  }
 0x679 PF: > { %p2407_p4 = scmp.ge.s32.totalorder %s2573_s28, 2  ;;  %s2184_s29 = sand.u32 1, %s2561_s25  }
 0x67a   : > { %s2185_s17 = scalar_lea.sflag [#allocation4], %s2184_s29 }
 0x67b   : > { %p2404_p7 = pnand %p2407_p4, %p2690_p6 }
 0x67d   : > { %p2405_p8 = pneg %p2404_p7 }
 0x67f   : > { %2556 = dma.done.wait (%p2405_p8), %s2185_s17, 512  }
 0x680   : > { %2558 = vsyncadd (%p2405_p8), %s2185_s17, 4294966784  ;;  %s3295_s28 = sld [smem:[#allocation7_spill]]  ;;  %s3298_s25 = smov %s2565_s26 }
 0x681   : > { %s3296_s22 = sld [smem:[#allocation6_spill]] }
 0x682   : > { %s3297_s27 = sld [smem:[#allocation8_spill]] }
 0x686   : > { %p23_p9 = scmp.ge.s32.totalorder %s3295_s28, 4  }
 0x687   : > { %s3299_s26 = smov %s3296_s22 }
 0x688   :  { %25 = sbr.rel (!%p23_p9) target bundleno = 3 (0x3), region = 110 }
 0x68d   :  { %2191 = vsyncpa [#allocation4], 1 }
 0x68e   :  { %2193 = vsyncpa [#allocation4 + $0x1], 1 }

// kernel: tpu_custom_call.1
= control target key start
LH: loop header
LB: loop body
LE: loop exit
PB: predicated region body
PF: predicated region fallthrough
CT: control target
= control target key end

     0   :  { %18 = vsyncpa [#allocation4], 0  ;;  %s3260_s0 = inlined_call_operand.vmem [shape: f32[2,32,128], index: 0, kind: input, shape index: {}]   ;;  %s3261_s1 = inlined_call_operand.vmem [shape: f32[2,32,128], index: 1, kind: input, shape index: {}]   ;;  %s3262_s2 = inlined_call_operand.vmem [shape: bf16[32,32], index: 2, kind: input, shape index: {}]   ;;  %s3263_s3 = inlined_call_operand.vmem [shape: f32[32,1], index: 3, kind: input, shape index: {}]   ;;  %s3264_s4 = inlined_call_operand.vmem [shape: bf16[64,32], index: 4, kind: input, shape index: {}]   ;;  %s3265_s5 = inlined_call_operand.vmem [shape: f32[64,1], index: 5, kind: input, shape index: {}]   ;;  %s3266_s6 = inlined_call_operand.vmem [shape: bf16[32,32], index: 6, kind: input, shape index: {}]   ;;  %s3267_s7 = inlined_call_operand.vmem [shape: f32[32,1], index: 7, kind: input, shape index: {}]   ;;  %s3268_s8 = inlined_call_operand.vmem [shape: bf16[64,32], index: 8, kind: input, shape index: {}]   ;;  %s3269_s9 = inlined_call_operand.vmem [shape: bf16[64,32], index: 9, kind: input, shape index: {}]   ;;  %s3270_s10 = inlined_call_operand.vmem [shape: f32[64,1], index: 10, kind: input, shape index: {}]   ;;  %s3271_s11 = inlined_call_operand.vmem [shape: bf16[32,64], index: 11, kind: input, shape index: {}]   ;;  %s3272_s12 = inlined_call_operand.vmem [shape: f32[32,1], index: 12, kind: input, shape index: {}]   ;;  %s3273_s13 = inlined_call_operand.hbm [shape: f32[2,32,128], index: 13, kind: output, shape index: {}]  }
   0x1   :  { %20 = vsyncpa [#allocation4 + $0x1], 0  ;;  %s2648_s25 = smov 0   ;;  %s2650_s26 = smov 0  }
   0x2   :  { %s2652_s27 = smov 0   ;;  %s2654_s28 = smov 0  }
   0x3 LB: > { %3278 = sst [smem:[#allocation6_spill]] %s2569_s27  ;;  %s2669_s29 = sadd.s32 4294967295, %s2573_s28   ;;  %s2573_s28 = sphi %s2654_s28, %s3295_s28   ;;  %s2569_s27 = sphi %s2652_s27, %s3297_s27   ;;  %s2565_s26 = sphi %s2650_s26, %s3299_s26   ;;  %s2561_s25 = sphi %s2648_s25, %s3298_s25  }
   0x4   : > { %s2244_s30 = sadd.s32 4294967294, %s2573_s28   ;;  %s2673_s14 = sadd.s32 1, %s2573_s28  }
   0x5   : > { %3279 = sst [smem:[#allocation7_spill]] %s2673_s14  ;;  %s316_s15 = sadd.s32 1, %s2569_s27 }
   0x6   : > { %s313_s16 = ssub.s32 %s2573_s28, %s2673_s14  ;;  %p326_p0 = scmp.ne.s32.totalorder %s2569_s27, %s2565_s26 }
   0x7   : > { %p314_p1 = scmp.eq.s32.totalorder %s313_s16, 0  ;;  %p327_p2 = scmp.eq.s32.totalorder %s2669_s29, 1 }
   0x8   : > { %p332_p3 = scmp.ne.s32.totalorder %s2565_s26, %s2561_s25  ;;  %p333_p4 = scmp.eq.s32.totalorder %s2244_s30, 1 }
   0x9   : > { %s2684_s17 = scalar_select %p314_p1, %s2569_s27, %s316_s15  }
   0xa   : > { %p2686_p5 = por %p327_p2, %p326_p0  ;;  %p2690_p6 = por %p333_p4, %p332_p3 }
   0xb   : > { %3280 = sst [smem:[#allocation8_spill]] %s2684_s17  ;;  %p2247_p7 = scmp.ge.s32.totalorder %s2573_s28, 1 }
   0xc   : > { %s3282_s19 = scalar_select %p2690_p6, 1, 0 }
   0xd   : > { %p400_p8 = scmp.lt.s32.totalorder %s2573_s28, 3 }
   0xe   : > { %3283 = sst [smem:[#allocation9_spill]] %s3282_s19 }
   0xf   : > { %p401_p9 = pnand %p2247_p7, %p400_p8 }
  0x10   : > { %p449_p10 = scmp.lt.s32.totalorder (!%p401_p9), %s2669_s29, 1  ;;  %s446_s14 = sand.u32 (!%p401_p9), 1, %s2565_s26  }
  0x11   : > { %404 = sbr.rel (%p401_p9) target bundleno = 1657 (0x679), region = 72  ;;  %s2248_s17 = sshll.u32 (!%p401_p9), %s446_s14, 5 }
  0x12   : > { %s2400_s19 = sshll.u32 (!%p401_p9), %s2669_s29, 5  ;;  %s2155_s21 = scalar_lea.sflag (!%p401_p9), [#allocation4], %s446_s14 }
  0x13   : > { %s2166_s15 = scalar_lea.hbm (!%p401_p9), %s3273_s13, %s2400_s19  ;;  %s2531_s19 = scalar_lea.hbm (!%p401_p9), %s3273_s13, 64 }
  0x16   : > { %v544_v0 = vld [vmem:[%s3265_s5] sm:$0xff]  ;;  %v2575_v1 = vmov 0   ;;  %s450_s22 = scalar_select %p449_p10, %s2669_s29, 1  ;;  %v545_v2 = vld [vmem:[%s3265_s5 + $0x8] sm:$0xff]  ;;  %v546_v14 = vld [vmem:[%s3265_s5 + $0x10] sm:$0xff]  ;;  %vm510_vm0 = vcmask 261120  }
  0x17   : > { %2443 = vset.pattern.permute.xlu0 %v2575_v1  ;;  %2444 = vset.pattern.permute.xlu1 %v2575_v1  ;;  %v476_v3 = vld [vmem:[%s3263_s3] sm:$0xff]  ;;  %v478_v19 = vld [vmem:[%s3263_s3 + $0x10] sm:$0xff]  ;;  %v2383_v21 = vld [vmem:[%s3262_s2 + $0x8] sm:$0xff]  ;;  %vm742_vm1 = vcmask 1043456   ;;  %vm717_vm2 = vcmask 64512  }
  0x18   : > { %554 = vperm.xlu0 %2443, %v544_v0   ;;  %2445 = vset.pattern.permute.xlu2 %v2575_v1  ;;  %s2380_s30 = sshll.u32 %s450_s22, 5  ;;  %v2382_v17 = vld [vmem:[%s3262_s2] sm:$0xff]  ;;  %v2385_v22 = vld [vmem:[%s3264_s4 + $0x8] sm:$0xff]  ;;  %v547_v24 = vld [vmem:[%s3265_s5 + $0x18] sm:$0xff] }
  0x19   : > { %559 = vperm.xlu1 %2444, %v545_v2   ;;  %s453_s20 = scalar_lea.vmem %s3260_s0, %s2380_s30  ;;  %s458_s27 = scalar_lea.vmem %s3261_s1, %s2380_s30  ;;  %v2384_v18 = vld [vmem:[%s3264_s4] sm:$0xff]  ;;  %v549_v23 = vld [vmem:[%s3265_s5 + $0x28] sm:$0xff]  ;;  %v2386_v25 = vld [vmem:[%s3264_s4 + $0x10] sm:$0xff] }
  0x1a   : > { %v462_v4 = vld [vmem:[%s453_s20 + $0x10] sm:$0xff]  ;;  %v463_v5 = vld [vmem:[%s453_s20 + $0x18] sm:$0xff]  ;;  %v460_v9 = vld [vmem:[%s453_s20] sm:$0xff] }
  0x1b   : > { %v468_v6 = vld [vmem:[%s458_s27 + $0x10] sm:$0xff]  ;;  %v2713_v7 = vpack.c.bf16 %v463_v5, %v462_v4  ;;  %v469_v8 = vld [vmem:[%s458_s27 + $0x18] sm:$0xff]  ;;  %v461_v10 = vld [vmem:[%s453_s20 + $0x8] sm:$0xff]  ;;  %s2169_s20 = sshll.u32 %s2166_s15, 4  ;;  %s2170_s20 = int_to_ptr.hbm [resolvable:$true] %s2169_s20 }
  0x1c   : > { %v471_v11 = vpack.c.bf16 %v469_v8, %v468_v6  ;;  %v466_v12 = vld [vmem:[%s458_s27] sm:$0xff]  ;;  %v467_v13 = vld [vmem:[%s458_s27 + $0x8] sm:$0xff]  ;;  %v2719_v15 = vpack.c.bf16 %v461_v10, %v460_v9  ;;  %v479_v26 = vld [vmem:[%s3263_s3 + $0x18] sm:$0xff]  ;;  %s448_s27 = scalar_lea.vmem [#allocation3], %s2248_s17  ;;  %s2525_s22 = sshra.s32 %s2170_s20, 4  ;;  %s2526_s22 = int_to_ptr.hbm [resolvable:$true] %s2525_s22 }
  0x1d   : > { %523 = vmatpush.bf16.msra.mxu0 %v2713_v7  ;;  %v470_v16 = vpack.c.bf16 %v467_v13, %v466_v12  ;;  %v548_v20 = vld [vmem:[%s3265_s5 + $0x20] sm:$0xff]  ;;  %v477_v27 = vld [vmem:[%s3263_s3 + $0x8] sm:$0xff]  ;;  %v2387_v61 = vld [vmem:[%s3264_s4 + $0x18] sm:$0xff]  ;;  %s2167_s16 = sshll.u32 %s448_s27, 4  ;;  %s2527_s23 = scalar_lea.hbm %s2526_s22, 32  ;;  %s2168_s16 = int_to_ptr.vmem [resolvable:$true] %s2167_s16 }
  0x1e   : > { %630 = vmatpush.bf16.msra.mxu1 %v471_v11  ;;  %487 = vperm.xlu2 %2445, %v477_v27   ;;  %v551_v5 = vld [vmem:[%s3265_s5 + $0x38] sm:$0xff]  ;;  %v550_v8 = vld [vmem:[%s3265_s5 + $0x30] sm:$0xff]  ;;  %v1633_v9 = vld [vmem:[%s3267_s7] sm:$0xff]  ;;  %p2528_p11 = scmp.ne.s32.totalorder %s2526_s22, %s2527_s23  ;;  %p2532_p0 = scmp.lt.s32.totalorder %s2526_s22, %s3273_s13 }
  0x1f   : > { %v1636_v11 = vld [vmem:[%s3267_s7 + $0x18] sm:$0xff]  ;;  %v1838_v12 = vld [vmem:[%s3270_s10 + $0x30] sm:$0xff]  ;;  %p2533_p1 = scmp.lt.s32.totalorder %s2531_s19, %s2527_s23 }
  0x20   : > { %482 = vperm.xlu0 %2443, %v476_v3   ;;  %v1835_v27 = vld [vmem:[%s3270_s10 + $0x18] sm:$0xff]  ;;  %p2529_p12 = pnand %p2528_p11, %p2686_p5 }
  0x21   : > { %564 = vperm.xlu1 %2444, %v546_v14   ;;  %524 = vmatpush.bf16.msra.mxu0 %v2719_v15  ;;  %v1634_v14 = vld [vmem:[%s3267_s7 + $0x8] sm:$0xff]  ;;  %p2534_p2 = por %p2533_p1, %p2532_p0 }
  0x22   : > { %631 = vmatpush.bf16.msra.mxu1 %v470_v16  ;;  %v1836_v16 = vld [vmem:[%s3270_s10 + $0x20] sm:$0xff]  ;;  %p2530_p13 = pneg %p2529_p12 }
  0x24   : > { %2261 = vmatmul.msk.bf16.vlgmr.msra.gmra.mxu0 %vm510_vm0, %v2382_v17  ;;  %p2535_p3 = pnand %p2534_p2, %p2530_p13 }
  0x25   : > { %2279 = vmatmul.msk.bf16.vlgmr.msra.gmra.mxu1 %vm510_vm0, %v2384_v18 }
  0x28   : > { %492 = vperm.xlu0 %2443, %v478_v19   ;;  %v1635_v19 = vld [vmem:[%s3267_s7 + $0x10] sm:$0xff] }
  0x30   : > { %574 = vperm.xlu0 %2443, %v548_v20   ;;  %v1839_v20 = vld [vmem:[%s3270_s10 + $0x38] sm:$0xff] }
  0x34   : > { %2262 = vmatmul.msk.bf16.gmra.mxu0 %vm510_vm0, %v2383_v21  ;;  %v1834_v21 = vld [vmem:[%s3270_s10 + $0x10] sm:$0xff] }
  0x35   : > { %2280 = vmatmul.msk.bf16.gmra.mxu1 %vm510_vm0, %v2385_v22 }
  0x38   : > { %579 = vperm.xlu0 %2443, %v549_v23   ;;  %v1837_v23 = vld [vmem:[%s3270_s10 + $0x28] sm:$0xff] }
  0x40   : > { %569 = vperm.xlu0 %2443, %v547_v24   ;;  %v1832_v24 = vld [vmem:[%s3270_s10] sm:$0xff] }
  0x45   : > { %2281 = vmatmul.msk.bf16.gmra.mxu1 %vm510_vm0, %v2386_v25 }
  0x48   : > { %497 = vperm.xlu0 %2443, %v479_v26  }
  0x55   : > { %2282 = vmatmul.msk.bf16.gmra.mxu1 %vm510_vm0, %v2387_v61 }
  0x78   : > { %v488_v57 = vpop.permute.xlu2 %487 }
  0x8a   : > { %v555_v28 = vpop.permute.xlu0 %554 }
  0x8b   : > { %v560_v37 = vpop.permute.xlu1 %559 }
  0x92   : > { %v483_v29 = vpop.permute.xlu0 %482 }
  0x93   : > { %v565_v46 = vpop.permute.xlu1 %564 }
  0x9a   : > { %v493_v30 = vpop.permute.xlu0 %492 }
  0xa1   : > { %v526_v31 = vpop.f32.mrf.mxu0 }
  0xa2   : > { %v527_v32 = vadd.f32 %v526_v31, %v483_v29  ;;  %v633_v33 = vpop.f32.mrf.mxu1  ;;  %v2760_v35 = vpop.permute.xlu0 %574  ;;  %v1833_v29 = vld [vmem:[%s3270_s10 + $0x8] sm:$0xff] }
  0xa3   : > { %v634_v38 = vadd.f32 %v633_v33, %v555_v28 }
  0xa4   : > { %v653_v34 = vpack.c.bf16 %v527_v32, %v527_v32 }
  0xa5   : > { %v657_v42 = vpack.c.bf16 %v634_v38, %v634_v38 }
  0xa6   : > { %v744_v36 = vsel %vm742_vm1, %v653_v34, 0 }
  0xa7   : > { %753 = vmatpush.bf16.msra.mxu2 %v744_v36 }
  0xa9   : > { %v528_v39 = vpop.f32.mrf.mxu0 }
  0xaa   : > { %v635_v40 = vpop.f32.mrf.mxu1  ;;  %v2763_v44 = vpop.permute.xlu0 %579  ;;  %v529_v58 = vadd.f32 %v528_v39, %v488_v57 }
  0xab   : > { %v636_v41 = vadd.f32 %v635_v40, %v560_v37 }
  0xac   : > { %v654_v59 = vpack.c.bf16 %v529_v58, %v529_v58 }
  0xad   : > { %v658_v43 = vpack.c.bf16 %v636_v41, %v636_v41 }
  0xae   : > { %v998_v60 = vsel %vm742_vm1, %v654_v59, 0 }
  0xaf   : > { %2446 = vxpose.binary.xlu2.c.b16.start.end [1/2] (short) %v658_v43, %v657_v42, 128 }
  0xb0   : > { %1007 = vmatpush.bf16.msrb.mxu0 %v998_v60 }
  0xb1   : > { %v531_v45 = vpop.f32.mrf.mxu0 }
  0xb2   : > { %v532_v47 = vadd.f32 %v531_v45, %v493_v30  ;;  %v638_v48 = vpop.f32.mrf.mxu1  ;;  %v570_v53 = vpop.permute.xlu0 %569 }
  0xb3   : > { %v639_v49 = vadd.f32 %v638_v48, %v565_v46 }
  0xb4   : > { %v655_v50 = vpack.c.bf16 %v532_v47, %v532_v47 }
  0xb5   : > { %v659_v51 = vpack.c.bf16 %v639_v49, %v639_v49 }
  0xb6   : > { %v1220_v52 = vsel %vm742_vm1, %v655_v50, 0 }
  0xb7   : > { %1179 = vxpose.xlu1.c.b16.start.end [1/1] (short) %v659_v51, 128  ;;  %1229 = vmatpush.bf16.msrb.mxu1 %v1220_v52 }
  0xb9   : > { %v2840_v39 = vpop.f32.mrf.mxu0 }
  0xba   : > { %v640_v54 = vpop.f32.mrf.mxu1 }
  0xbb   : > { %v641_v55 = vadd.f32 %v640_v54, %v570_v53 }
  0xbd   : > { %v660_v56 = vpack.c.bf16 %v641_v55, %v641_v55 }
  0xbf   : > { %1401 = vxpose.xlu0.c.b16.start.end [1/1] (short) %v660_v56, 128 }
  0xc2   : > { %v2831_v32 = vpop.f32.mrf.mxu1 }
  0xca   : > { %v2834_v34 = vpop.f32.mrf.mxu1 }
  0xd2   : > { %v2838_v38 = vpop.f32.mrf.mxu1 }
  0xda   : > { %v2846_v42 = vpop.f32.mrf.mxu1 }
 0x150   : > { %v2447_v62 = vpop.trf.xlu2 }
 0x151   : > { %2283 = vmatmul.msk.bf16.vlgmr.msra.gmra.mxu2 %vm717_vm2, %v2447_v62 }
 0x158   : > { %v2448_v63 = vpop.trf.xlu2 }
 0x159   : > { %2291 = vmatmul.msk.bf16.vlgmr.msrb.gmra.mxu0 %vm717_vm2, %v2448_v63 }
 0x160   : > { %v2449_v0 = vpop.trf.xlu2 }
 0x161   : > { %2284 = vmatmul.msk.bf16.gmra.mxu2 %vm717_vm2, %v2449_v0 }
 0x163   : > { %v1187_v1 = vpop.trf.xlu1 }
 0x164   : > { %2299 = vmatmul.msk.bf16.vlgmr.msrb.gmra.mxu1 %vm717_vm2, %v1187_v1 }
 0x168   : > { %v2450_v2 = vpop.trf.xlu2 }
 0x169   : > { %2292 = vmatmul.msk.bf16.gmra.mxu0 %vm717_vm2, %v2450_v2 }
 0x170   : > { %v2451_v3 = vpop.trf.xlu2 }
 0x171   : > { %2285 = vmatmul.msk.bf16.gmra.mxu2 %vm717_vm2, %v2451_v3 }
 0x173   : > { %v1188_v18 = vpop.trf.xlu1 }
 0x174   : > { %2300 = vmatmul.msk.bf16.gmra.mxu1 %vm717_vm2, %v1188_v18 }
 0x178   : > { %v2452_v4 = vpop.trf.xlu2 }
 0x179   : > { %2293 = vmatmul.msk.bf16.gmra.mxu0 %vm717_vm2, %v2452_v4 }
 0x180   : > { %v2453_v6 = vpop.trf.xlu2 }
 0x181   : > { %589 = vperm.xlu1 %2444, %v551_v5   ;;  %2286 = vmatmul.msk.bf16.gmra.mxu2 %vm717_vm2, %v2453_v6 }
 0x183   : > { %v1189_v26 = vpop.trf.xlu1 }
 0x184   : > { %2301 = vmatmul.msk.bf16.gmra.mxu1 %vm717_vm2, %v1189_v26 }
 0x188   : > { %584 = vperm.xlu2 %2445, %v550_v8   ;;  %v2454_v10 = vpop.trf.xlu2 }
 0x189   : > { %1639 = vperm.xlu1 %2444, %v1633_v9   ;;  %2294 = vmatmul.msk.bf16.gmra.mxu0 %vm717_vm2, %v2454_v10 }
 0x190   : > { %1654 = vperm.xlu2 %2445, %v1636_v11   ;;  %v2455_v13 = vpop.trf.xlu2 }
 0x191   : > { %1872 = vperm.xlu1 %2444, %v1838_v12   ;;  %2287 = vmatmul.msk.bf16.gmra.mxu2 %vm717_vm2, %v2455_v13 }
 0x193   : > { %v1190_v31 = vpop.trf.xlu1 }
 0x194   : > { %2302 = vmatmul.msk.bf16.gmra.mxu1 %vm717_vm2, %v1190_v31 }
 0x198   : > { %1644 = vperm.xlu2 %2445, %v1634_v14   ;;  %v2456_v17 = vpop.trf.xlu2 }
 0x199   : > { %1862 = vperm.xlu1 %2444, %v1836_v16   ;;  %2295 = vmatmul.msk.bf16.gmra.mxu0 %vm717_vm2, %v2456_v17 }
 0x19d   : > { %1649 = vperm.xlu0 %2443, %v1635_v19  }
 0x1a0   : > { %1877 = vperm.xlu2 %2445, %v1839_v20   ;;  %v2457_v22 = vpop.trf.xlu2 }
 0x1a1   : > { %1852 = vperm.xlu1 %2444, %v1834_v21   ;;  %2288 = vmatmul.msk.bf16.gmra.mxu2 %vm717_vm2, %v2457_v22 }
 0x1a3   : > { %v1191_v37 = vpop.trf.xlu1 }
 0x1a4   : > { %2303 = vmatmul.msk.bf16.gmra.mxu1 %vm717_vm2, %v1191_v37 }
 0x1a8   : > { %1867 = vperm.xlu2 %2445, %v1837_v23   ;;  %v2458_v25 = vpop.trf.xlu2 }
 0x1a9   : > { %1842 = vperm.xlu1 %2444, %v1832_v24   ;;  %2296 = vmatmul.msk.bf16.gmra.mxu0 %vm717_vm2, %v2458_v25 }
 0x1b0   : > { %1857 = vperm.xlu2 %2445, %v1835_v27   ;;  %v2459_v28 = vpop.trf.xlu2 }
 0x1b1   : > { %2289 = vmatmul.msk.bf16.gmra.mxu2 %vm717_vm2, %v2459_v28 }
 0x1b3   : > { %v1192_v46 = vpop.trf.xlu1 }
 0x1b4   : > { %2304 = vmatmul.msk.bf16.gmra.mxu1 %vm717_vm2, %v1192_v46 }
 0x1b8   : > { %1847 = vperm.xlu2 %2445, %v1833_v29   ;;  %v2460_v30 = vpop.trf.xlu2 }
 0x1b9   : > { %2297 = vmatmul.msk.bf16.gmra.mxu0 %vm717_vm2, %v2460_v30 }
 0x1c0   : > { %v2461_v33 = vpop.trf.xlu2 }
 0x1c1   : > { %2290 = vmatmul.msk.bf16.gmra.mxu2 %vm717_vm2, %v2461_v33 }
 0x1c3   : > { %v1193_v8 = vpop.trf.xlu1 }
 0x1c4   : > { %2305 = vmatmul.msk.bf16.gmra.mxu1 %vm717_vm2, %v1193_v8 }
 0x1c8   : > { %v2462_v36 = vpop.trf.xlu2 }
 0x1c9   : > { %2298 = vmatmul.msk.bf16.gmra.mxu0 %vm717_vm2, %v2462_v36 }
 0x1d4   : > { %v2842_v40 = vpop.f32.mrf.mxu2 }
 0x1d5   : > { %v843_v43 = vmax.f32 %v2842_v40, -1e+30 }
 0x1d6   : > { %v2844_v41 = vpop.f32.mrf.mxu0 }
 0x1d7   : > { %v1065_v45 = vmax.f32 %v2844_v41, -1e+30  ;;  %v847_v47 = vmax.f32 %v843_v43, -1e+30 }
 0x1d9   : > { %v1069_v49 = vmax.f32 %v1065_v45, -1e+30  ;;  %v851_v54 = vmax.f32 %v847_v47, -1e+30 }
 0x1db   : > { %v1073_v55 = vmax.f32 %v1069_v49, -1e+30 }
 0x1dc   : > { %v757_v48 = vpop.f32.mrf.mxu2 }
 0x1dd   : > { %v844_v50 = vmax.f32 %v757_v48, -1e+30 }
 0x1de   : > { %v1011_v51 = vpop.f32.mrf.mxu0 }
 0x1df   : > { %v848_v52 = vmax.f32 %v844_v50, -1e+30  ;;  %v1066_v53 = vmax.f32 %v1011_v51, -1e+30 }
 0x1e1   : > { %v852_v56 = vmax.f32 %v848_v52, -1e+30  ;;  %v1070_v57 = vmax.f32 %v1066_v53, -1e+30  ;;  %v2851_v58 = vpop.f32.mrf.mxu1 }
 0x1e2   : > { %v1287_v61 = vmax.f32 %v2851_v58, -1e+30 }
 0x1e3   : > { %v855_v59 = vmax.f32 %v851_v54, %v852_v56  ;;  %v1074_v60 = vmax.f32 %v1070_v57, -1e+30 }
 0x1e4   : > { %v760_v62 = vpop.f32.mrf.mxu2  ;;  %v1291_v4 = vmax.f32 %v1287_v61, -1e+30 }
 0x1e5   : > { %v857_v63 = vmax.f32 %v855_v59, -1e+30  ;;  %v1077_v0 = vmax.f32 %v1073_v55, %v1074_v60  ;;  %v1194_v55 = vpop.trf.xlu1 }
 0x1e6   : > { %v1014_v1 = vpop.f32.mrf.mxu0  ;;  %v1295_v13 = vmax.f32 %v1291_v4, -1e+30  ;;  %2306 = vmatmul.msk.bf16.gmra.mxu1 %vm717_vm2, %v1194_v55 }
 0x1e7   : > { %v858_v2 = vrot.slane %v857_v63, 4  ;;  %v1079_v3 = vmax.f32 %v1077_v0, -1e+30 }
 0x1e9   : > { %v859_v5 = vmax.f32 %v857_v63, %v858_v2  ;;  %v1080_v6 = vrot.slane %v1079_v3, 4  ;;  %v1233_v9 = vpop.f32.mrf.mxu1 }
 0x1ea   : > { %v1288_v10 = vmax.f32 %v1233_v9, -1e+30 }
 0x1eb   : > { %v860_v11 = vrot.slane %v859_v5, 2  ;;  %v1081_v12 = vmax.f32 %v1079_v3, %v1080_v6 }
 0x1ec   : > { %v1292_v14 = vmax.f32 %v1288_v10, -1e+30  ;;  %v762_v16 = vpop.f32.mrf.mxu2 }
 0x1ed   : > { %v861_v17 = vmax.f32 %v859_v5, %v860_v11  ;;  %v1082_v18 = vrot.slane %v1081_v12, 2 }
 0x1ee   : > { %v1296_v19 = vmax.f32 %v1292_v14, -1e+30  ;;  %v1016_v20 = vpop.f32.mrf.mxu0 }
 0x1ef   : > { %v862_v21 = vrot.slane %v861_v17, 1  ;;  %v1083_v22 = vmax.f32 %v1081_v12, %v1082_v18 }
 0x1f0   : > { %v1299_v23 = vmax.f32 %v1295_v13, %v1296_v19 }
 0x1f1   : > { %v863_v24 = vmax.f32 %v861_v17, %v862_v21  ;;  %v1084_v25 = vrot.slane %v1083_v22, 1 }
 0x1f2   : > { %v1301_v26 = vmax.f32 %v1299_v23, -1e+30 }
 0x1f3   : > { %v865_v27 = vsub.f32 %v757_v48, %v863_v24  ;;  %v866_v28 = vsub.f32 -1e+30, %v863_v24  ;;  %v1085_v29 = vmax.f32 %v1083_v22, %v1084_v25  ;;  %v864_v30 = vsub.f32 %v2842_v40, %v863_v24 }
 0x1f4   : > { %v1302_v31 = vrot.slane %v1301_v26, 4  ;;  %v765_v33 = vpop.f32.mrf.mxu2 }
 0x1f5   : > { %v882_v36 = vmul.f32 1.442695, %v865_v27  ;;  %v884_v37 = vmul.f32 1.442695, %v866_v28  ;;  %v1087_v43 = vsub.f32 %v1011_v51, %v1085_v29  ;;  %v1088_v45 = vsub.f32 -1e+30, %v1085_v29 }
 0x1f6   : > { %v1303_v46 = vmax.f32 %v1301_v26, %v1302_v31  ;;  %v1086_v47 = vsub.f32 %v2844_v41, %v1085_v29  ;;  %v1019_v49 = vpop.f32.mrf.mxu0  ;;  %v880_v53 = vmul.f32 1.442695, %v864_v30 }
 0x1f7   : > { %2463 = vpow2.f32 %v882_v36  ;;  %v1104_v50 = vmul.f32 1.442695, %v1087_v43  ;;  %v1106_v52 = vmul.f32 1.442695, %v1088_v45 }
 0x1f8   : > { %2465 = vpow2.f32 %v884_v37  ;;  %v1304_v48 = vrot.slane %v1303_v46, 2  ;;  %v1102_v54 = vmul.f32 1.442695, %v1086_v47 }
 0x1f9   : > { %2467 = vpow2.f32 %v1104_v50 }
 0x1fa   : > { %2469 = vpow2.f32 %v1106_v52  ;;  %v1305_v40 = vmax.f32 %v1303_v46, %v1304_v48 }
 0x1fb   : > { %2471 = vpow2.f32 %v880_v53 }
 0x1fc   : > { %v1306_v51 = vrot.slane %v1305_v40, 1  ;;  %2473 = vpow2.f32 %v1102_v54  ;;  %v767_v56 = vpop.f32.mrf.mxu2 }
 0x1fd   : > { %v2858_v57 = vpop.eup %2463 }
 0x1fe   : > { %v2860_v41 = vpop.eup %2465  ;;  %v1307_v59 = vmax.f32 %v1305_v40, %v1306_v51  ;;  %v1021_v60 = vpop.f32.mrf.mxu0 }
 0x1ff   : > { %v2862_v61 = vpop.eup %2467  ;;  %v935_v62 = vpack.c.bf16 %v2860_v41, %v2860_v41  ;;  %v1236_v51 = vpop.f32.mrf.mxu1 }
 0x200   : > { %v2866_v63 = vpop.eup %2469  ;;  %v1308_v0 = vsub.f32 %v2851_v58, %v1307_v59  ;;  %v1309_v1 = vsub.f32 %v1233_v9, %v1307_v59  ;;  %v1310_v2 = vsub.f32 -1e+30, %v1307_v59 }
 0x201   : > { %v2869_v3 = vpop.eup %2471  ;;  %942 = vmatpush.bf16.msra.mxu3 %v935_v62 }
 0x202   : > { %v2871_v4 = vpop.eup %2473  ;;  %v1324_v5 = vmul.f32 1.442695, %v1308_v0  ;;  %v1326_v6 = vmul.f32 1.442695, %v1309_v1  ;;  %v1328_v8 = vmul.f32 1.442695, %v1310_v2  ;;  %v912_v10 = vadd.f32 %v2869_v3, %v2858_v57 }
 0x203   : > { %v1134_v11 = vadd.f32 %v2871_v4, %v2862_v61  ;;  %v1156_v12 = vpack.c.bf16 %v2862_v61, %v2871_v4  ;;  %v644_v0 = vadd.f32 %v2831_v32, %v2760_v35  ;;  %v585_v4 = vpop.permute.xlu2 %584 }
 0x204   : > { %2475 = vpow2.f32 %v1324_v5  ;;  %v913_v58 = vadd.f32 %v2860_v41, %v912_v10  ;;  %v770_v9 = vpop.f32.mrf.mxu2  ;;  %v934_v5 = vpack.c.bf16 %v2858_v57, %v2869_v3  ;;  %v1157_v10 = vpack.c.bf16 %v2866_v63, %v2866_v63 }
 0x205   : > { %2477 = vpow2.f32 %v1326_v6  ;;  %943 = vmatpush.bf16.msra.mxu3 %v935_v62  ;;  %v1135_v13 = vadd.f32 %v2866_v63, %v1134_v11  ;;  %v661_v32 = vpack.c.bf16 %v644_v0, %v644_v0 }
 0x206   : > { %2479 = vpow2.f32 %v1328_v8  ;;  %v914_v14 = vadd.f32 %v2860_v41, %v913_v58  ;;  %v1024_v16 = vpop.f32.mrf.mxu0 }
 0x207   : > { %v1136_v17 = vadd.f32 %v2866_v63, %v1135_v13  ;;  %v1238_v13 = vpop.f32.mrf.mxu1 }
 0x208   : > { %v915_v18 = vadd.f32 %v2860_v41, %v914_v14 }
 0x209   : > { %944 = vmatpush.bf16.msra.mxu3 %v935_v62  ;;  %v1137_v19 = vadd.f32 %v2866_v63, %v1136_v17 }
 0x20a   : > { %v2885_v20 = vpop.eup %2475  ;;  %v916_v21 = vadd.f32 %v2860_v41, %v915_v18 }
 0x20b   : > { %v2888_v22 = vpop.eup %2477  ;;  %v1138_v23 = vadd.f32 %v2866_v63, %v1137_v19 }
 0x20c   : > { %v2891_v24 = vpop.eup %2479  ;;  %v1356_v25 = vadd.f32 %v2888_v22, %v2885_v20  ;;  %v917_v26 = vadd.f32 %v2860_v41, %v916_v21  ;;  %v772_v27 = vpop.f32.mrf.mxu2 }
 0x20d   : > { %945 = vmatpush.bf16.msra.mxu3 %v935_v62  ;;  %v1139_v28 = vadd.f32 %v2866_v63, %v1138_v23 }
 0x20e   : > { %v1357_v29 = vadd.f32 %v2891_v24, %v1356_v25  ;;  %v918_v30 = vadd.f32 %v2860_v41, %v917_v26  ;;  %v1026_v31 = vpop.f32.mrf.mxu0 }
 0x20f   : > { %v1140_v33 = vadd.f32 %v2866_v63, %v1139_v28  ;;  %v1241_v21 = vpop.f32.mrf.mxu1  ;;  %v1379_v31 = vpack.c.bf16 %v2891_v24, %v2891_v24 }
 0x210   : > { %v1358_v36 = vadd.f32 %v2891_v24, %v1357_v29  ;;  %v919_v37 = vadd.f32 %v2860_v41, %v918_v30  ;;  %v646_v29 = vadd.f32 %v2834_v34, %v2763_v44  ;;  %v498_v34 = vpop.permute.xlu0 %497 }
 0x211   : > { %946 = vmatpush.bf16.msra.mxu3 %v935_v62  ;;  %v1141_v43 = vadd.f32 %v2866_v63, %v1140_v33 }
 0x212   : > { %v1359_v45 = vadd.f32 %v2891_v24, %v1358_v36  ;;  %v920_v46 = vadd.f32 %v2860_v41, %v919_v37  ;;  %v662_v33 = vpack.c.bf16 %v646_v29, %v646_v29 }
 0x213   : > { %v1142_v47 = vadd.f32 %v2866_v63, %v1141_v43 }
 0x214   : > { %v1360_v49 = vadd.f32 %v2891_v24, %v1359_v45  ;;  %v775_v50 = vpop.f32.mrf.mxu2  ;;  %v921_v52 = vadd.f32 %v2860_v41, %v920_v46 }
 0x215   : > { %947 = vmatpush.bf16.msra.mxu3 %v935_v62  ;;  %v1143_v53 = vadd.f32 %v2866_v63, %v1142_v47  ;;  %v649_v50 = vadd.f32 %v2838_v38, %v585_v4 }
 0x216   : > { %v1361_v48 = vadd.f32 %v2891_v24, %v1360_v49  ;;  %v1029_v54 = vpop.f32.mrf.mxu0  ;;  %v922_v55 = vadd.f32 %v2860_v41, %v921_v52  ;;  %v534_v49 = vadd.f32 %v2840_v39, %v498_v34  ;;  %v1378_v52 = vpack.c.bf16 %v2888_v22, %v2885_v20 }
 0x217   : > { %v1144_v40 = vadd.f32 %v2866_v63, %v1143_v53  ;;  %v1243_v26 = vpop.f32.mrf.mxu1  ;;  %v663_v54 = vpack.c.bf16 %v649_v50, %v649_v50 }
 0x218   : > { %v1362_v56 = vadd.f32 %v2891_v24, %v1361_v48  ;;  %v923_v59 = vadd.f32 %v2860_v41, %v922_v55  ;;  %v1409_v39 = vpop.trf.xlu0 }
 0x219   : > { %948 = vmatpush.bf16.msra.mxu3 %v935_v62  ;;  %v1145_v60 = vadd.f32 %v2866_v63, %v1144_v40 }
 0x21a   : > { %v1363_v1 = vadd.f32 %v2891_v24, %v1362_v56  ;;  %v924_v2 = vadd.f32 %v2860_v41, %v923_v59 }
 0x21b   : > { %v1146_v6 = vadd.f32 %v2866_v63, %v1145_v60 }
 0x21c   : > { %v1364_v8 = vadd.f32 %v2891_v24, %v1363_v1  ;;  %v777_v62 = vpop.f32.mrf.mxu2  ;;  %v925_v11 = vadd.f32 %v2860_v41, %v924_v2 }
 0x21d   : > { %949 = vmatpush.bf16.msra.mxu3 %v934_v5  ;;  %v1147_v35 = vadd.f32 %v2866_v63, %v1146_v6 }
 0x21e   : > { %v1031_v58 = vpop.f32.mrf.mxu0  ;;  %v2928_v9 = vadd.f32 %v2860_v41, %v925_v11  ;;  %v1365_v57 = vadd.f32 %v2891_v24, %v1364_v8 }
 0x21f   : > { %v2932_v3 = vadd.f32 %v2866_v63, %v1147_v35  ;;  %v1246_v30 = vpop.f32.mrf.mxu1 }
 0x220   : > { %950 = vmatmul.bf16.vlgmr.msra.gmra.mxu3 %v661_v32  ;;  %v1366_v14 = vadd.f32 %v2891_v24, %v1365_v57  ;;  %v1410_v59 = vpop.trf.xlu0  ;;  %v927_v20 = vrot.slane %v2928_v9, 4 }
 0x221   : > { %1164 = vmatpush.bf16.msrb.mxu3 %v1157_v10  ;;  %v1149_v8 = vrot.slane %v2932_v3, 4 }
 0x222   : > { %v1367_v16 = vadd.f32 %v2891_v24, %v1366_v14  ;;  %v928_v60 = vadd.f32 %v927_v20, %v2928_v9 }
 0x223   : > { %v1150_v35 = vadd.f32 %v1149_v8, %v2932_v3 }
 0x224   : > { %v780_v17 = vpop.f32.mrf.mxu2  ;;  %v1368_v18 = vadd.f32 %v2891_v24, %v1367_v16  ;;  %v929_v0 = vrot.slane %v928_v60, 2 }
 0x225   : > { %1165 = vmatpush.bf16.msrb.mxu3 %v1157_v10  ;;  %v1151_v58 = vrot.slane %v1150_v35, 2 }
 0x226   : > { %v1034_v19 = vpop.f32.mrf.mxu0  ;;  %v1369_v41 = vadd.f32 %v2891_v24, %v1368_v18  ;;  %v930_v1 = vadd.f32 %v929_v0, %v928_v60 }
 0x227   : > { %v1248_v43 = vpop.f32.mrf.mxu1  ;;  %v1152_v57 = vadd.f32 %v1151_v58, %v1150_v35 }
 0x228   : > { %v2939_v23 = vadd.f32 %v2891_v24, %v1369_v41  ;;  %v1411_v22 = vpop.trf.xlu0  ;;  %v931_v2 = vrot.slane %v930_v1, 1 }
 0x229   : > { %1166 = vmatpush.bf16.msrb.mxu3 %v1157_v10  ;;  %v1153_v13 = vrot.slane %v1152_v57, 1 }
 0x22a   : > { %v932_v6 = vadd.f32 %v931_v2, %v930_v1  ;;  %v1371_v17 = vrot.slane %v2939_v23, 4 }
 0x22b   : > { %v1154_v14 = vadd.f32 %v1153_v13, %v1152_v57 }
 0x22c   : > { %v782_v63 = vpop.f32.mrf.mxu2  ;;  %2481 = vrcp.f32 %v932_v6  ;;  %v1372_v21 = vadd.f32 %v1371_v17, %v2939_v23 }
 0x22d   : > { %1167 = vmatpush.bf16.msrb.mxu3 %v1157_v10  ;;  %2483 = vrcp.f32 %v1154_v14 }
 0x22e   : > { %v1036_v25 = vpop.f32.mrf.mxu0  ;;  %v1373_v63 = vrot.slane %v1372_v21, 2 }
 0x22f   : > { %v1251_v44 = vpop.f32.mrf.mxu1 }
 0x230   : > { %v1412_v5 = vpop.trf.xlu0 }
 0x231   : > { %1168 = vmatpush.bf16.msrb.mxu3 %v1157_v10 }
 0x234   : > { %v785_v27 = vpop.f32.mrf.mxu2 }
 0x235   : > { %1169 = vmatpush.bf16.msrb.mxu3 %v1157_v10  ;;  %v1374_v27 = vadd.f32 %v1373_v63, %v1372_v21 }
 0x236   : > { %v1039_v28 = vpop.f32.mrf.mxu0 }
 0x237   : > { %v1253_v61 = vpop.f32.mrf.mxu1  ;;  %v1375_v28 = vrot.slane %v1374_v27, 1 }
 0x238   : > { %v1413_v32 = vpop.trf.xlu0 }
 0x239   : > { %1170 = vmatpush.bf16.msrb.mxu3 %v1157_v10  ;;  %v2482_v10 = vpop.eup %2481  ;;  %v1376_v29 = vadd.f32 %v1375_v28, %v1374_v27 }
 0x23a   : > { %v2484_v18 = vpop.eup %2483 }
 0x23b   : > { %2485 = vrcp.f32 %v1376_v29 }
 0x23c   : > { %v787_v36 = vpop.f32.mrf.mxu2 }
 0x23d   : > { %1171 = vmatpush.bf16.msrb.mxu3 %v1156_v12  ;;  %v656_v12 = vpack.c.bf16 %v534_v49, %v534_v49 }
 0x23e   : > { %v1041_v37 = vpop.f32.mrf.mxu0 }
 0x23f   : > { %v1442_v53 = vsel %vm742_vm1, %v656_v12, 0  ;;  %v1256_v48 = vpop.f32.mrf.mxu1 }
 0x240   : > { %1172 = vmatmul.bf16.vlgmr.msrb.gmra.mxu3 %v662_v33  ;;  %v1414_v16 = vpop.trf.xlu0 }
 0x241   : > { %1386 = vmatpush.bf16.msra.mxu3 %v1379_v31 }
 0x244   : > { %v790_v45 = vpop.f32.mrf.mxu2 }
 0x245   : > { %1387 = vmatpush.bf16.msra.mxu3 %v1379_v31 }
 0x246   : > { %v1044_v46 = vpop.f32.mrf.mxu0 }
 0x247   : > { %v1258_v55 = vpop.f32.mrf.mxu1 }
 0x248   : > { %v1415_v26 = vpop.trf.xlu0 }
 0x249   : > { %1388 = vmatpush.bf16.msra.mxu3 %v1379_v31 }
 0x24c   : > { %v792_v47 = vpop.f32.mrf.mxu2 }
 0x24d   : > { %1389 = vmatpush.bf16.msra.mxu3 %v1379_v31 }
 0x24e   : > { %v1046_v24 = vpop.f32.mrf.mxu0 }
 0x24f   : > { %v1261_v40 = vpop.f32.mrf.mxu1 }
 0x250   : > { %v1416_v30 = vpop.trf.xlu0 }
 0x251   : > { %1390 = vmatpush.bf16.msra.mxu3 %v1379_v31 }
 0x255   : > { %1391 = vmatpush.bf16.msra.mxu3 %v1379_v31 }
 0x257   : > { %v1263_v51 = vpop.f32.mrf.mxu1 }
 0x259   : > { %1392 = vmatpush.bf16.msra.mxu3 %v1379_v31  ;;  %v2486_v31 = vpop.eup %2485 }
 0x25d   : > { %1393 = vmatpush.bf16.msra.mxu3 %v1378_v52 }
 0x260   : > { %1394 = vmatmul.bf16.vlgmr.msra.gmra.mxu3 %v663_v54 }
 0x261   : > { %1451 = vmatpush.bf16.msrb.mxu3 %v1442_v53 }
 0x263   : > { %v1266_v56 = vpop.f32.mrf.mxu1 }
 0x26b   : > { %v1268_v38 = vpop.f32.mrf.mxu1 }
 0x270   : > { %2307 = vmatmul.msk.bf16.vlgmr.msrb.gmra.mxu3 %vm717_vm2, %v1409_v39 }
 0x280   : > { %2308 = vmatmul.msk.bf16.gmra.mxu3 %vm717_vm2, %v1410_v59 }
 0x290   : > { %2309 = vmatmul.msk.bf16.gmra.mxu3 %vm717_vm2, %v1411_v22 }
 0x2a0   : > { %2310 = vmatmul.msk.bf16.gmra.mxu3 %vm717_vm2, %v1412_v5 }
 0x2a3   : > { %v951_v62 = vpop.f32.mrf.mxu3 }
 0x2a4   : > { %v2960_v11 = vmul.f32 %v2482_v10, %v951_v62 }
 0x2ab   : > { %v953_v9 = vpop.f32.mrf.mxu3 }
 0x2b0   : > { %2311 = vmatmul.msk.bf16.gmra.mxu3 %vm717_vm2, %v1413_v32 }
 0x2c0   : > { %2312 = vmatmul.msk.bf16.gmra.mxu3 %vm717_vm2, %v1414_v16 }
 0x2c3   : > { %v1173_v19 = vpop.f32.mrf.mxu3 }
 0x2c4   : > { %v2966_v41 = vmul.f32 %v2484_v18, %v1173_v19  ;;  %v590_v19 = vpop.permute.xlu1 %589 }
 0x2c5   : > { %v651_v63 = vadd.f32 %v2846_v42, %v590_v19 }
 0x2c6   : > { %v1631_v3 = vpack.c.bf16 %v2966_v41, %v2960_v11 }
 0x2c7   : > { %v664_v29 = vpack.c.bf16 %v651_v63, %v651_v63 }
 0x2cb   : > { %v1175_v25 = vpop.f32.mrf.mxu3 }
 0x2d0   : > { %2313 = vmatmul.msk.bf16.gmra.mxu3 %vm717_vm2, %v1415_v26 }
 0x2e0   : > { %2314 = vmatmul.msk.bf16.gmra.mxu3 %vm717_vm2, %v1416_v30 }
 0x2e3   : > { %v1395_v33 = vpop.f32.mrf.mxu3 }
 0x2e4   : > { %v2973_v36 = vmul.f32 %v2486_v31, %v1395_v33 }
 0x2eb   : > { %v1397_v37 = vpop.f32.mrf.mxu3 }
 0x2f3   : > { %v1453_v43 = vpop.f32.mrf.mxu3 }
 0x2f4   : > { %v1509_v45 = vmax.f32 %v1453_v43, -1e+30 }
 0x2f6   : > { %v1513_v46 = vmax.f32 %v1509_v45, -1e+30 }
 0x2f8   : > { %v1517_v47 = vmax.f32 %v1513_v46, -1e+30 }
 0x2fb   : > { %v1455_v23 = vpop.f32.mrf.mxu3 }
 0x2fc   : > { %v1510_v44 = vmax.f32 %v1455_v23, -1e+30 }
 0x2fe   : > { %v1514_v34 = vmax.f32 %v1510_v44, -1e+30 }
 0x300   : > { %v1518_v24 = vmax.f32 %v1514_v34, -1e+30 }
 0x302   : > { %v1521_v49 = vmax.f32 %v1517_v47, %v1518_v24 }
 0x303   : > { %v1458_v61 = vpop.f32.mrf.mxu3 }
 0x304   : > { %v1523_v4 = vmax.f32 %v1521_v49, -1e+30 }
 0x306   : > { %v1524_v12 = vrot.slane %v1523_v4, 4 }
 0x308   : > { %v1525_v50 = vmax.f32 %v1523_v4, %v1524_v12 }
 0x30a   : > { %v1526_v52 = vrot.slane %v1525_v50, 2 }
 0x30b   : > { %v1460_v53 = vpop.f32.mrf.mxu3 }
 0x30c   : > { %v1527_v48 = vmax.f32 %v1525_v50, %v1526_v52  ;;  %v2388_v50 = vld [vmem:[%s3266_s6] sm:$0xff]  ;;  %v2392_v53 = vld [vmem:[%s3268_s8 + $0x10] sm:$0xff] }
 0x30d   : > { %v2390_v52 = vld [vmem:[%s3268_s8] sm:$0xff] }
 0x30e   : > { %v1528_v54 = vrot.slane %v1527_v48, 1 }
 0x310   : > { %v1529_v55 = vmax.f32 %v1527_v48, %v1528_v54  ;;  %v1650_v48 = vpop.permute.xlu0 %1649 }
 0x312   : > { %v1531_v40 = vsub.f32 %v1455_v23, %v1529_v55  ;;  %v1532_v39 = vsub.f32 -1e+30, %v1529_v55  ;;  %v1530_v51 = vsub.f32 %v1453_v43, %v1529_v55 }
 0x313   : > { %v1463_v56 = vpop.f32.mrf.mxu3 }
 0x314   : > { %v1548_v59 = vmul.f32 1.442695, %v1531_v40  ;;  %v1550_v38 = vmul.f32 1.442695, %v1532_v39  ;;  %v1546_v20 = vmul.f32 1.442695, %v1530_v51 }
 0x316   : > { %2487 = vpow2.f32 %v1548_v59  ;;  %v1640_v59 = vpop.permute.xlu1 %1639 }
 0x317   : > { %2489 = vpow2.f32 %v1550_v38 }
 0x318   : > { %2491 = vpow2.f32 %v1546_v20 }
 0x31b   : > { %v1465_v22 = vpop.f32.mrf.mxu3 }
 0x31c   : > { %v2488_v60 = vpop.eup %2487  ;;  %v2394_v22 = vld [vmem:[%s3269_s9] sm:$0xff] }
 0x31d   : > { %v2490_v0 = vpop.eup %2489 }
 0x31e   : > { %v2492_v1 = vpop.eup %2491  ;;  %v1601_v2 = vpack.c.bf16 %v2490_v0, %v2490_v0 }
 0x31f   : > { %v1578_v5 = vadd.f32 %v2492_v1, %v2488_v60  ;;  %v1600_v26 = vpack.c.bf16 %v2488_v60, %v2492_v1  ;;  %v2393_v60 = vld [vmem:[%s3268_s8 + $0x18] sm:$0xff]  ;;  %v2396_v1 = vld [vmem:[%s3269_s9 + $0x10] sm:$0xff] }
 0x320   : > { %1608 = vmatpush.bf16.msrb.mxu2 %v1601_v2 }
 0x321   : > { %v1579_v6 = vadd.f32 %v2490_v0, %v1578_v5 }
 0x323   : > { %v1580_v8 = vadd.f32 %v2490_v0, %v1579_v6  ;;  %v1468_v10 = vpop.f32.mrf.mxu3 }
 0x324   : > { %1609 = vmatpush.bf16.msrb.mxu2 %v1601_v2 }
 0x325   : > { %v1581_v62 = vadd.f32 %v2490_v0, %v1580_v8  ;;  %v1873_v8 = vpop.permute.xlu1 %1872 }
 0x327   : > { %v1582_v35 = vadd.f32 %v2490_v0, %v1581_v62 }
 0x328   : > { %1610 = vmatpush.bf16.msrb.mxu2 %v1601_v2 }
 0x329   : > { %v1583_v32 = vadd.f32 %v2490_v0, %v1582_v35 }
 0x32b   : > { %v1584_v58 = vadd.f32 %v2490_v0, %v1583_v32  ;;  %v1470_v9 = vpop.f32.mrf.mxu3 }
 0x32c   : > { %1611 = vmatpush.bf16.msrb.mxu2 %v1601_v2 }
 0x32d   : > { %v1585_v57 = vadd.f32 %v2490_v0, %v1584_v58  ;;  %v1863_v58 = vpop.permute.xlu1 %1862 }
 0x32f   : > { %v1586_v13 = vadd.f32 %v2490_v0, %v1585_v57  ;;  %v698_v57 = vlaneseq }
 0x330   : > { %1612 = vmatpush.bf16.msrb.mxu2 %v1601_v2 }
 0x331   : > { %v1587_v14 = vadd.f32 %v2490_v0, %v1586_v13 }
 0x333   : > { %v1588_v16 = vadd.f32 %v2490_v0, %v1587_v14  ;;  %v1473_v17 = vpop.f32.mrf.mxu3 }
 0x334   : > { %1613 = vmatpush.bf16.msrb.mxu2 %v1601_v2 }
 0x335   : > { %v1589_v18 = vadd.f32 %v2490_v0, %v1588_v16  ;;  %v699_v16 = vand.u32 127, %v698_v57  ;;  %v1853_v19 = vpop.permute.xlu1 %1852 }
 0x337   : > { %v1590_v21 = vadd.f32 %v2490_v0, %v1589_v18  ;;  %vm700_vm3 = vcmp.lt.s32.totalorder %v699_v16, 16 }
 0x338   : > { %1614 = vmatpush.bf16.msrb.mxu2 %v1601_v2  ;;  %v2397_v2 = vld [vmem:[%s3269_s9 + $0x18] sm:$0xff] }
 0x339   : > { %v1591_v25 = vadd.f32 %v2490_v0, %v1590_v21 }
 0x33b   : > { %v1592_v27 = vadd.f32 %v2490_v0, %v1591_v25  ;;  %v1475_v28 = vpop.f32.mrf.mxu3  ;;  %v2395_v0 = vld [vmem:[%s3269_s9 + $0x8] sm:$0xff] }
 0x33c   : > { %1615 = vmatpush.bf16.msrb.mxu2 %v1600_v26 }
 0x33d   : > { %v1593_v23 = vrot.slane %v1592_v27, 4 }
 0x33f   : > { %1616 = vmatmul.bf16.vlgmr.msrb.gmra.mxu2 %v664_v29  ;;  %v1594_v46 = vadd.f32 %v1593_v23, %v1592_v27 }
 0x341   : > { %v1595_v44 = vrot.slane %v1594_v46, 2 }
 0x343   : > { %v1478_v30 = vpop.f32.mrf.mxu3  ;;  %v1596_v34 = vadd.f32 %v1595_v44, %v1594_v46 }
 0x345   : > { %v1597_v47 = vrot.slane %v1596_v34, 1 }
 0x347   : > { %v1598_v24 = vadd.f32 %v1597_v47, %v1596_v34 }
 0x349   : > { %2493 = vrcp.f32 %v1598_v24 }
 0x34b   : > { %v1480_v31 = vpop.f32.mrf.mxu3 }
 0x34f   : > { %v2494_v42 = vpop.eup %2493 }
 0x353   : > { %v1483_v33 = vpop.f32.mrf.mxu3 }
 0x35b   : > { %v1485_v37 = vpop.f32.mrf.mxu3 }
 0x363   : > { %v1488_v43 = vpop.f32.mrf.mxu3 }
 0x36b   : > { %v1490_v45 = vpop.f32.mrf.mxu3 }
 0x3c2   : > { %v1617_v49 = vpop.f32.mrf.mxu2 }
 0x3c3   : > { %v1621_v61 = vmul.f32 %v2494_v42, %v1617_v49 }
 0x3c5   : > { %v1632_v4 = vpack.c.bf16 %v1621_v61, %v2973_v36  ;;  %v2389_v36 = vld [vmem:[%s3266_s6 + $0x8] sm:$0xff] }
 0x3c7   : > { %1679 = vmatpush.bf16.msra.mxu2 %v1632_v4 }
 0x3ca   : > { %v1619_v12 = vpop.f32.mrf.mxu2 }
 0x3cb   : > { %1680 = vmatpush.bf16.msra.mxu2 %v1631_v3 }
 0x3ce   : > { %2323 = vmatmul.msk.bf16.vlgmr.msra.gmra.mxu2 %vm510_vm0, %v2388_v50 }
 0x3cf   : > { %1809 = vmatpush.bf16.msrb.mxu2 %v2713_v7  ;;  %v2391_v7 = vld [vmem:[%s3268_s8 + $0x8] sm:$0xff] }
 0x3d3   : > { %1810 = vmatpush.bf16.msrb.mxu2 %v2719_v15  ;;  %v1655_v15 = vpop.permute.xlu2 %1654 }
 0x3db   : > { %v1645_v39 = vpop.permute.xlu2 %1644 }
 0x3de   : > { %2324 = vmatmul.msk.bf16.gmra.mxu2 %vm510_vm0, %v2389_v36 }
 0x3e3   : > { %v1878_v35 = vpop.permute.xlu2 %1877 }
 0x3eb   : > { %v1868_v13 = vpop.permute.xlu2 %1867 }
 0x3ee   : > { %2361 = vmatmul.msk.bf16.vlgmr.msrb.gmra.mxu2 %vm510_vm0, %v2390_v52 }
 0x3f3   : > { %v1858_v27 = vpop.permute.xlu2 %1857 }
 0x3fe   : > { %2362 = vmatmul.msk.bf16.gmra.mxu2 %vm510_vm0, %v2391_v7 }
 0x40e   : > { %2363 = vmatmul.msk.bf16.gmra.mxu2 %vm510_vm0, %v2392_v53 }
 0x41e   : > { %2364 = vmatmul.msk.bf16.gmra.mxu2 %vm510_vm0, %v2393_v60  ;;  %v2093_v60 = vld [vmem:[%s3272_s12 + $0x18] sm:$0xff] }
 0x451   : > { %v1682_v11 = vpop.f32.mrf.mxu2 }
 0x452   : > { %v1683_v38 = vadd.f32 %v1682_v11, %v1640_v59 }
 0x459   : > { %v1684_v41 = vpop.f32.mrf.mxu2 }
 0x45a   : > { %v1685_v51 = vadd.f32 %v1684_v41, %v1645_v39 }
 0x45c   : > { %v1708_v20 = vpack.c.bf16 %v1685_v51, %v1683_v38 }
 0x461   : > { %v1687_v3 = vpop.f32.mrf.mxu2 }
 0x462   : > { %v1688_v55 = vadd.f32 %v1687_v3, %v1650_v48 }
 0x469   : > { %v1689_v54 = vpop.f32.mrf.mxu2 }
 0x46a   : > { %v1690_v40 = vadd.f32 %v1689_v54, %v1655_v15  ;;  %v1843_v15 = vpop.permute.xlu1 %1842 }
 0x46c   : > { %v1709_v56 = vpack.c.bf16 %v1690_v40, %v1688_v55  ;;  %v1848_v55 = vpop.permute.xlu2 %1847 }
 0x46e   : > { %1748 = vmatpush.bf16.msra.mxu0 %v1709_v56 }
 0x471   : > { %v1812_v5 = vpop.f32.mrf.mxu2 }
 0x472   : > { %1749 = vmatpush.bf16.msra.mxu0 %v1708_v20  ;;  %v2091_v20 = vld [vmem:[%s3272_s12 + $0x8] sm:$0xff] }
 0x475   : > { %2341 = vmatmul.msk.bf16.vlgmr.msra.gmra.mxu0 %vm510_vm0, %v2394_v22  ;;  %v2090_v22 = vld [vmem:[%s3272_s12] sm:$0xff] }
 0x479   : > { %v1814_v6 = vpop.f32.mrf.mxu2 }
 0x481   : > { %v1817_v32 = vpop.f32.mrf.mxu2 }
 0x485   : > { %2342 = vmatmul.msk.bf16.gmra.mxu0 %vm510_vm0, %v2395_v0  ;;  %v2092_v0 = vld [vmem:[%s3272_s12 + $0x10] sm:$0xff] }
 0x489   : > { %v1819_v17 = vpop.f32.mrf.mxu2 }
 0x491   : > { %v1822_v28 = vpop.f32.mrf.mxu2 }
 0x495   : > { %2343 = vmatmul.msk.bf16.gmra.mxu0 %vm510_vm0, %v2396_v1 }
 0x499   : > { %v1824_v43 = vpop.f32.mrf.mxu2 }
 0x4a1   : > { %v1827_v24 = vpop.f32.mrf.mxu2 }
 0x4a5   : > { %2344 = vmatmul.msk.bf16.gmra.mxu0 %vm510_vm0, %v2397_v2 }
 0x4a9   : > { %v1829_v36 = vpop.f32.mrf.mxu2 }
 0x4f2   : > { %v1751_v10 = vpop.f32.mrf.mxu0 }
 0x4f3   : > { %v1813_v62 = vadd.f32 %v1812_v5, %v1751_v10 }
 0x4f5   : > { %v3046_v48 = vadd.f32 %v1843_v15, %v1813_v62 }
 0x4f7   : > { %v1890_v39 = vsel %vm700_vm3, %v3046_v48, 0.0 }
 0x4f8   : > { %v1922_v56 = vmul.f32 %v1890_v39, %v1890_v39 }
 0x4fa   : > { %v1753_v9 = vpop.f32.mrf.mxu0 }
 0x4fb   : > { %v1815_v54 = vadd.f32 %v1814_v6, %v1753_v9 }
 0x4fd   : > { %v3048_v40 = vadd.f32 %v1848_v55, %v1815_v54 }
 0x4ff   : > { %v1891_v59 = vsel %vm700_vm3, %v3048_v40, 0.0 }
 0x500   : > { %v1923_v38 = vmul.f32 %v1891_v59, %v1891_v59 }
 0x502   : > { %v1756_v14 = vpop.f32.mrf.mxu0 }
 0x503   : > { %v1818_v18 = vadd.f32 %v1817_v32, %v1756_v14 }
 0x505   : > { %v3022_v21 = vadd.f32 %v1853_v19, %v1818_v18 }
 0x507   : > { %v1892_v63 = vsel %vm700_vm3, %v3022_v21, 0.0 }
 0x508   : > { %1902 = vadd.xlane.f32.xlu0 %v1892_v63  ;;  %v1924_v3 = vmul.f32 %v1892_v63, %v1892_v63 }
 0x50a   : > { %v1758_v25 = vpop.f32.mrf.mxu0 }
 0x50b   : > { %v1820_v26 = vadd.f32 %v1819_v17, %v1758_v25 }
 0x50d   : > { %v3026_v29 = vadd.f32 %v1858_v27, %v1820_v26 }
 0x50f   : > { %v1893_v30 = vsel %vm700_vm3, %v3026_v29, 0.0 }
 0x510   : > { %1904 = vadd.xlane.f32.xlu2 %v1893_v30  ;;  %v1925_v53 = vmul.f32 %v1893_v30, %v1893_v30 }
 0x512   : > { %v1761_v31 = vpop.f32.mrf.mxu0 }
 0x513   : > { %v1823_v33 = vadd.f32 %v1822_v28, %v1761_v31 }
 0x515   : > { %v3030_v37 = vadd.f32 %v1863_v58, %v1823_v33 }
 0x517   : > { %v1894_v45 = vsel %vm700_vm3, %v3030_v37, 0.0 }
 0x518   : > { %1906 = vadd.xlane.f32.xlu1 %v1894_v45  ;;  %v1926_v23 = vmul.f32 %v1894_v45, %v1894_v45 }
 0x51a   : > { %1938 = vadd.xlane.f32.xlu2 %v1926_v23  ;;  %v1763_v46 = vpop.f32.mrf.mxu0 }
 0x51b   : > { %v1825_v44 = vadd.f32 %v1824_v43, %v1763_v46 }
 0x51d   : > { %v3034_v34 = vadd.f32 %v1868_v13, %v1825_v44 }
 0x51f   : > { %v1895_v47 = vsel %vm700_vm3, %v3034_v34, 0.0 }
 0x520   : > { %1908 = vadd.xlane.f32.xlu0 %v1895_v47  ;;  %v1927_v42 = vmul.f32 %v1895_v47, %v1895_v47 }
 0x522   : > { %1940 = vadd.xlane.f32.xlu1 %v1927_v42  ;;  %v1766_v49 = vpop.f32.mrf.mxu0 }
 0x523   : > { %v1828_v61 = vadd.f32 %v1827_v24, %v1766_v49 }
 0x525   : > { %v3038_v4 = vadd.f32 %v1873_v8, %v1828_v61 }
 0x527   : > { %v1896_v12 = vsel %vm700_vm3, %v3038_v4, 0.0 }
 0x528   : > { %v1928_v50 = vmul.f32 %v1896_v12, %v1896_v12 }
 0x52a   : > { %1910 = vadd.xlane.f32.xlu1 %v1896_v12  ;;  %1942 = vadd.xlane.f32.xlu0 %v1928_v50  ;;  %v1768_v52 = vpop.f32.mrf.mxu0 }
 0x52b   : > { %v1830_v11 = vadd.f32 %v1829_v36, %v1768_v52 }
 0x52d   : > { %v3042_v7 = vadd.f32 %v1878_v35, %v1830_v11 }
 0x52f   : > { %v1897_v41 = vsel %vm700_vm3, %v3042_v7, 0.0 }
 0x530   : > { %1912 = vadd.xlane.f32.xlu2 %v1897_v41  ;;  %v1929_v51 = vmul.f32 %v1897_v41, %v1897_v41 }
 0x532   : > { %1934 = vadd.xlane.f32.xlu1 %v1924_v3  ;;  %1936 = vadd.xlane.f32.xlu0 %v1925_v53 }
 0x538   : > { %1944 = vadd.xlane.f32.xlu2 %v1929_v51 }
 0x53a   : > { %1900 = vadd.xlane.f32.xlu1 %v1891_v59  ;;  %1930 = vadd.xlane.f32.xlu0 %v1922_v56 }
 0x540   : > { %1898 = vadd.xlane.f32.xlu2 %v1890_v39 }
 0x548   : > { %1932 = vadd.xlane.f32.xlu2 %v1923_v38 }
 0x54e   : > { %2101 = vperm.xlu0 %2443, %v2091_v20  }
 0x553   : > { %2096 = vperm.xlu1 %2444, %v2090_v22  }
 0x556   : > { %2111 = vperm.xlu0 %2443, %v2093_v60  }
 0x560   : > { %2106 = vperm.xlu2 %2445, %v2092_v0  }
 0x57b   : > { %v1903_v1 = vpop.xlane.xlu0 %1902 }
 0x57c   : > { %v3082_v28 = vmul.f32 0.0625, %v1903_v1 }
 0x57e   : > { %v1956_v23 = vmul.f32 %v3082_v28, %v3082_v28 }
 0x583   : > { %v1905_v5 = vpop.xlane.xlu2 %1904 }
 0x584   : > { %v3084_v30 = vmul.f32 0.0625, %v1905_v5 }
 0x586   : > { %v1957_v46 = vmul.f32 %v3084_v30, %v3084_v30 }
 0x58b   : > { %v1907_v2 = vpop.xlane.xlu1 %1906 }
 0x58c   : > { %v3068_v10 = vmul.f32 0.0625, %v1907_v2 }
 0x58d   : > { %v1939_v35 = vpop.xlane.xlu2 %1938 }
 0x58e   : > { %v1958_v9 = vmul.f32 %v3068_v10, %v3068_v10  ;;  %v1950_v57 = vmul.f32 0.0625, %v1939_v35 }
 0x590   : > { %v1966_v14 = vsub.f32 %v1950_v57, %v1958_v9 }
 0x592   : > { %v3080_v26 = vadd.f32 1e-05, %v1966_v14 }
 0x593   : > { %v1909_v6 = vpop.xlane.xlu0 %1908 }
 0x594   : > { %v3066_v8 = vmul.f32 0.0625, %v1909_v6  ;;  %vm2032_vm4 = vweird.f32 %v3080_v26 }
 0x595   : > { %v1941_v62 = vpop.xlane.xlu1 %1940 }
 0x596   : > { %v1959_v32 = vmul.f32 %v3066_v8, %v3066_v8  ;;  %v1951_v58 = vmul.f32 0.0625, %v1941_v62 }
 0x598   : > { %v1967_v13 = vsub.f32 %v1951_v58, %v1959_v32 }
 0x59a   : > { %v3076_v19 = vadd.f32 1e-05, %v1967_v13 }
 0x59c   : > { %2495 = vrsqrt.f32 %v3076_v19  ;;  %vm2042_vm9 = vweird.f32 %v3076_v19 }
 0x59d   : > { %v1911_v16 = vpop.xlane.xlu1 %1910  ;;  %v1943_v17 = vpop.xlane.xlu0 %1942  ;;  %2497 = vrsqrt.f32 %v3080_v26 }
 0x59e   : > { %v3074_v18 = vmul.f32 0.0625, %v1911_v16  ;;  %v1952_v25 = vmul.f32 0.0625, %v1943_v17 }
 0x5a0   : > { %v1960_v63 = vmul.f32 %v3074_v18, %v3074_v18 }
 0x5a2   : > { %v1968_v27 = vsub.f32 %v1952_v25, %v1960_v63  ;;  %v3097_v42 = vpop.eup %2495 }
 0x5a3   : > { %v1913_v31 = vpop.xlane.xlu2 %1912  ;;  %v3099_v12 = vpop.eup %2497  ;;  %v2037_v41 = vmul.f32 %v3097_v42, %v3076_v19  ;;  %vm2043_vm5 = vweird.f32 %v3097_v42 }
 0x5a4   : > { %v3087_v33 = vadd.f32 1e-05, %v1968_v27  ;;  %v3095_v24 = vmul.f32 0.0625, %v1913_v31  ;;  %v2027_v54 = vmul.f32 %v3099_v12, %v3080_v26  ;;  %vm2033_vm8 = vweird.f32 %v3099_v12  ;;  %vm3163_vm11 = vmor %vm2042_vm9, %vm2043_vm5 }
 0x5a5   : > { %v1935_v43 = vpop.xlane.xlu1 %1934  ;;  %v1937_v45 = vpop.xlane.xlu0 %1936  ;;  %v2038_v51 = vmul.f32 %v3097_v42, %v2037_v41  ;;  %vm3178_vm15 = vmor %vm2032_vm4, %vm2033_vm8 }
 0x5a6   : > { %2499 = vrsqrt.f32 %v3087_v33  ;;  %v1948_v44 = vmul.f32 0.0625, %v1935_v43  ;;  %v1949_v47 = vmul.f32 0.0625, %v1937_v45  ;;  %v1961_v15 = vmul.f32 %v3095_v24, %v3095_v24 }
 0x5a7   : > { %v2028_v59 = vmul.f32 %v3099_v12, %v2027_v54  ;;  %v2039_v1 = vmul.f32 0.5, %v2038_v51  ;;  %v1975_v45 = vsub.f32 %v3034_v34, %v3066_v8  ;;  %vm2052_vm7 = vweird.f32 %v3087_v33 }
 0x5a8   : > { %v1964_v49 = vsub.f32 %v1948_v44, %v1956_v23  ;;  %v1965_v61 = vsub.f32 %v1949_v47, %v1957_v46 }
 0x5a9   : > { %v2029_v35 = vmul.f32 0.5, %v2028_v59  ;;  %v2040_v16 = vsub.f32 1.5, %v2039_v1 }
 0x5aa   : > { %v3101_v50 = vadd.f32 1e-05, %v1964_v49  ;;  %v3103_v36 = vadd.f32 1e-05, %v1965_v61 }
 0x5ab   : > { %v1945_v52 = vpop.xlane.xlu2 %1944  ;;  %v2030_v43 = vsub.f32 1.5, %v2029_v35 }
 0x5ac   : > { %v3105_v11 = vpop.eup %2499  ;;  %v1953_v3 = vmul.f32 0.0625, %v1945_v52  ;;  %2501 = vrsqrt.f32 %v3101_v50  ;;  %v2041_v52 = vmul.f32 %v3097_v42, %v2040_v16  ;;  %vm2012_vm1 = vweird.f32 %v3101_v50 }
 0x5ad   : > { %v2047_v53 = vmul.f32 %v3105_v11, %v3087_v33  ;;  %2503 = vrsqrt.f32 %v3103_v36  ;;  %v1931_v22 = vpop.xlane.xlu0 %1930  ;;  %v1901_v62 = vpop.xlane.xlu1 %1900  ;;  %vm2053_vm6 = vweird.f32 %v3105_v11  ;;  %v2031_v19 = vmul.f32 %v3099_v12, %v2030_v43 }
 0x5ae   : > { %v1969_v55 = vsub.f32 %v1953_v3, %v1961_v15  ;;  %v1946_v58 = vmul.f32 0.0625, %v1931_v22  ;;  %v3137_v17 = vmul.f32 0.0625, %v1901_v62  ;;  %v1976_v15 = vsub.f32 %v3038_v4, %v3074_v18  ;;  %vm3157_vm10 = vmor %vm2052_vm7, %vm2053_vm6 }
 0x5af   : > { %v2048_v39 = vmul.f32 %v3105_v11, %v2047_v53  ;;  %v2045_v18 = vsel %vm3163_vm11, %v3097_v42, %v2041_v52  ;;  %vm2022_vm4 = vweird.f32 %v3103_v36 }
 0x5b0   : > { %v3119_v56 = vadd.f32 1e-05, %v1969_v55  ;;  %v1955_v49 = vmul.f32 %v3137_v17, %v3137_v17 }
 0x5b1   : > { %v2049_v20 = vmul.f32 0.5, %v2048_v39 }
 0x5b2   : > { %2505 = vrsqrt.f32 %v3119_v56  ;;  %v3123_v38 = vpop.eup %2501  ;;  %vm2062_vm14 = vweird.f32 %v3119_v56 }
 0x5b3   : > { %v1899_v60 = vpop.xlane.xlu2 %1898  ;;  %v3125_v0 = vpop.eup %2503  ;;  %v2007_v2 = vmul.f32 %v3123_v38, %v3101_v50  ;;  %v2050_v57 = vsub.f32 1.5, %v2049_v20  ;;  %vm2013_vm13 = vweird.f32 %v3123_v38 }
 0x5b4   : > { %v3129_v5 = vmul.f32 0.0625, %v1899_v60  ;;  %v2017_v6 = vmul.f32 %v3125_v0, %v3103_v36  ;;  %vm2023_vm0 = vweird.f32 %v3125_v0  ;;  %vm3190_vm3 = vmor %vm2012_vm1, %vm2013_vm13  ;;  %v1972_v36 = vsub.f32 %v3022_v21, %v3082_v28 }
 0x5b5   : > { %v2008_v32 = vmul.f32 %v3123_v38, %v2007_v2  ;;  %v2051_v46 = vmul.f32 %v3105_v11, %v2050_v57  ;;  %vm3203_vm5 = vmor %vm2022_vm4, %vm2023_vm0  ;;  %v2071_v2 = vmul.f32 %v2045_v18, %v1975_v45 }
 0x5b6   : > { %v1954_v9 = vmul.f32 %v3129_v5, %v3129_v5  ;;  %v2018_v13 = vmul.f32 %v3125_v0, %v2017_v6  ;;  %v1970_v45 = vsub.f32 %v3046_v48, %v3129_v5  ;;  %v2399_v48 = vld [vmem:[%s3271_s11 + $0x8] sm:$0xff] }
 0x5b7   : > { %v2009_v25 = vmul.f32 0.5, %v2008_v32  ;;  %v2055_v33 = vsel %vm3157_vm10, %v3105_v11, %v2051_v46 }
 0x5b8   : > { %v2506_v14 = vpop.eup %2505  ;;  %v1962_v63 = vsub.f32 %v1946_v58, %v1954_v9  ;;  %v2019_v27 = vmul.f32 0.5, %v2018_v13  ;;  %v2072_v26 = vmul.f32 %v2055_v33, %v1976_v15  ;;  %v2079_v13 = vmax.f32 %v2071_v2, 0.0 }
 0x5b9   : > { %v2057_v31 = vmul.f32 %v2506_v14, %v3119_v56  ;;  %v2010_v34 = vsub.f32 1.5, %v2009_v25  ;;  %vm2063_vm12 = vweird.f32 %v2506_v14  ;;  %v1977_v56 = vsub.f32 %v3042_v7, %v3095_v24 }
 0x5ba   : > { %v3143_v23 = vadd.f32 1e-05, %v1962_v63  ;;  %v2020_v8 = vsub.f32 1.5, %v2019_v27  ;;  %vm2064_vm2 = vmor %vm2062_vm14, %vm2063_vm12  ;;  %v2035_v7 = vsel %vm3178_vm15, %v3099_v12, %v2031_v19  ;;  %v1974_v24 = vsub.f32 %v3030_v37, %v3068_v10 }
 0x5bb   : > { %v2058_v44 = vmul.f32 %v2506_v14, %v2057_v31  ;;  %v1933_v47 = vpop.xlane.xlu2 %1932  ;;  %v2011_v51 = vmul.f32 %v3123_v38, %v2010_v34  ;;  %v1973_v10 = vsub.f32 %v3026_v29, %v3084_v30  ;;  %v2080_v12 = vmax.f32 %v2072_v26, 0.0 }
 0x5bc   : > { %2507 = vrsqrt.f32 %v3143_v23  ;;  %v1947_v61 = vmul.f32 0.0625, %v1933_v47  ;;  %v2021_v59 = vmul.f32 %v3125_v0, %v2020_v8  ;;  %v2070_v32 = vmul.f32 %v2035_v7, %v1974_v24 }
 0x5bd   : > { %v2059_v41 = vmul.f32 0.5, %v2058_v44  ;;  %v2015_v62 = vsel %vm3190_vm3, %v3123_v38, %v2011_v51  ;;  %vm1992_vm7 = vweird.f32 %v3143_v23  ;;  %v1971_v47 = vsub.f32 %v3048_v40, %v3137_v17 }
 0x5be   : > { %v1963_v53 = vsub.f32 %v1947_v61, %v1955_v49  ;;  %v2025_v37 = vsel %vm3203_vm5, %v3125_v0, %v2021_v59  ;;  %v2068_v21 = vmul.f32 %v2015_v62, %v1972_v36  ;;  %v2078_v38 = vmax.f32 %v2070_v32, 0.0 }
 0x5bf   : > { %v2060_v55 = vsub.f32 1.5, %v2059_v41  ;;  %v2069_v28 = vmul.f32 %v2025_v37, %v1973_v10  ;;  %v2398_v41 = vld [vmem:[%s3271_s11] sm:$0xff]  ;;  %vm2124_vm12 = vcmask 523264  }
 0x5c0   : > { %v1979_v4 = vadd.f32 1e-05, %v1963_v53  ;;  %v2088_v0 = vpack.c.bf16 %v2079_v13, %v2078_v38  ;;  %v2076_v27 = vmax.f32 %v2068_v21, 0.0  ;;  %v2102_v15 = vpop.permute.xlu0 %2101 }
 0x5c1   : > { %v2061_v11 = vmul.f32 %v2506_v14, %v2060_v55  ;;  %v2077_v31 = vmax.f32 %v2069_v28, 0.0 }
 0x5c2   : > { %v2508_v20 = vpop.eup %2507  ;;  %2509 = vrsqrt.f32 %v1979_v4  ;;  %vm2002_vm10 = vweird.f32 %v1979_v4 }
 0x5c3   : > { %v2065_v22 = vsel %vm2064_vm2, %v2506_v14, %v2061_v11  ;;  %v1987_v60 = vmul.f32 %v2508_v20, %v3143_v23  ;;  %vm1993_vm6 = vweird.f32 %v2508_v20  ;;  %v2087_v46 = vpack.c.bf16 %v2077_v31, %v2076_v27  ;;  %v2107_v54 = vpop.permute.xlu2 %2106 }
 0x5c4   : > { %v2073_v1 = vmul.f32 %v2065_v22, %v1977_v56  ;;  %vm1994_vm8 = vmor %vm1992_vm7, %vm1993_vm6 }
 0x5c5   : > { %v1988_v6 = vmul.f32 %v2508_v20, %v1987_v60  ;;  %v2097_v40 = vpop.permute.xlu1 %2096 }
 0x5c6   : > { %v2081_v35 = vmax.f32 %v2073_v1, 0.0 }
 0x5c7   : > { %v1989_v58 = vmul.f32 0.5, %v1988_v6 }
 0x5c8   : > { %v2510_v9 = vpop.eup %2509  ;;  %v2089_v57 = vpack.c.bf16 %v2081_v35, %v2080_v12  ;;  %v2112_v19 = vpop.permute.xlu0 %2111 }
 0x5c9   : > { %v1990_v14 = vsub.f32 1.5, %v1989_v58  ;;  %v1997_v16 = vmul.f32 %v2510_v9, %v1979_v4  ;;  %vm2003_vm9 = vweird.f32 %v2510_v9 }
 0x5ca   : > { %2135 = vmatpush.bf16.msra.mxu1 %v2089_v57  ;;  %vm2004_vm11 = vmor %vm2002_vm10, %vm2003_vm9 }
 0x5cb   : > { %v1991_v63 = vmul.f32 %v2508_v20, %v1990_v14  ;;  %v1998_v25 = vmul.f32 %v2510_v9, %v1997_v16 }
 0x5cd   : > { %v1999_v29 = vmul.f32 0.5, %v1998_v25  ;;  %v1995_v30 = vsel %vm1994_vm8, %v2508_v20, %v1991_v63 }
 0x5ce   : > { %2136 = vmatpush.bf16.msra.mxu1 %v2088_v0  ;;  %v2066_v49 = vmul.f32 %v1995_v30, %v1970_v45 }
 0x5cf   : > { %v2000_v43 = vsub.f32 1.5, %v1999_v29 }
 0x5d0   : > { %v2074_v52 = vmax.f32 %v2066_v49, 0.0 }
 0x5d1   : > { %v2001_v44 = vmul.f32 %v2510_v9, %v2000_v43 }
 0x5d2   : > { %2137 = vmatpush.bf16.msra.mxu1 %v2087_v46 }
 0x5d3   : > { %v2005_v23 = vsel %vm2004_vm11, %v2510_v9, %v2001_v44 }
 0x5d4   : > { %v2067_v61 = vmul.f32 %v2005_v23, %v1971_v47 }
 0x5d6   : > { %v2075_v34 = vmax.f32 %v2067_v61, 0.0 }
 0x5d8   : > { %v2086_v8 = vpack.c.bf16 %v2075_v34, %v2074_v52 }
 0x5da   : > { %2138 = vmatpush.bf16.msra.mxu1 %v2086_v8 }
 0x5dd   : > { %2373 = vmatmul.msk.bf16.vlgmr.msra.gmra.mxu1 %vm2124_vm12, %v2398_v41 }
 0x5ed   : > { %2374 = vmatmul.msk.bf16.gmra.mxu1 %vm2124_vm12, %v2399_v48 }
 0x65a   : > { %v2140_v5 = vpop.f32.mrf.mxu1 }
 0x65b   : > { %v2141_v17 = vadd.f32 %v2140_v5, %v2097_v40 }
 0x65d   : > { %2150 = vst [vmem:[%s448_s27] sm:$0xff] %v2141_v17 }
 0x662   : > { %v2142_v3 = vpop.f32.mrf.mxu1 }
 0x663   : > { %v2143_v53 = vadd.f32 %v2142_v3, %v2102_v15 }
 0x665   : > { %2151 = vst [vmem:[%s448_s27 + $0x8] sm:$0xff] %v2143_v53 }
 0x66a   : > { %v2145_v33 = vpop.f32.mrf.mxu1 }
 0x66b   : > { %v2146_v55 = vadd.f32 %v2145_v33, %v2107_v54 }
 0x66d   : > { %2152 = vst [vmem:[%s448_s27 + $0x10] sm:$0xff] %v2146_v55 }
 0x672   : > { %v2147_v4 = vpop.f32.mrf.mxu1 }
 0x673   : > { %v2148_v18 = vadd.f32 %v2147_v4, %v2112_v19 }
 0x675   : > { %2153 = vst [vmem:[%s448_s27 + $0x18] sm:$0xff] %v2148_v18 }
 0x676   : > { %2538 = shalt.err (!%p2535_p3)
}
 0x677   : > { %s2576_s14 = smov 128   ;;  %s2577_s27 = smov 8  }
 0x678   : > { %2401 = dma.vmem_to_hbm [thread:$0]  (%p2686_p5), %s2168_s16, 512, %s2170_s20, %s2155_s21, %s2576_s14, %s2576_s14, %s2577_s27  }
 0x679 PF: > { %p2407_p4 = scmp.ge.s32.totalorder %s2573_s28, 2  ;;  %s2184_s29 = sand.u32 1, %s2561_s25  }
 0x67a   : > { %s2185_s17 = scalar_lea.sflag [#allocation4], %s2184_s29 }
 0x67b   : > { %p2404_p7 = pnand %p2407_p4, %p2690_p6 }
 0x67d   : > { %p2405_p8 = pneg %p2404_p7 }
 0x67f   : > { %2556 = dma.done.wait (%p2405_p8), %s2185_s17, 512  }
 0x680   : > { %2558 = vsyncadd (%p2405_p8), %s2185_s17, 4294966784  ;;  %s3295_s28 = sld [smem:[#allocation7_spill]]  ;;  %s3298_s25 = smov %s2565_s26 }
 0x681   : > { %s3296_s22 = sld [smem:[#allocation6_spill]] }
 0x682   : > { %s3297_s27 = sld [smem:[#allocation8_spill]] }
 0x686   : > { %p23_p9 = scmp.ge.s32.totalorder %s3295_s28, 4  }
 0x687   : > { %s3299_s26 = smov %s3296_s22 }
 0x688   :  { %25 = sbr.rel (!%p23_p9) target bundleno = 3 (0x3), region = 110 }
 0x68d   :  { %2191 = vsyncpa [#allocation4], 1 }
 0x68e   :  { %2193 = vsyncpa [#allocation4 + $0x1], 1 }

</bundles_post_ra>
